<compile_context>
chip_gen: v7x
topology: tpu7x:2x2x1
jax: 0.10.0
libtpu: 0.0.40
codegen_flags: <defaults>
</compile_context>

<pallas_src>
import functools

import jax
import jax.numpy as jnp
from jax.experimental import pallas as pl
from jax.experimental.pallas import tpu as pltpu


TILE_B = 128  # batch tile: multiple of 128 -> full MXU rows on v5e/v6e/v7x


def vae_kernel(
    # inputs
    x_ref, eps_ref,
    w1_ref, b1_ref,        # fc1:  input_dim -> 512
    w2p_ref, b2p_ref,      # fused [fc2 | fc1_dim_adjust]: 512 -> 512
    w3_ref, b3_ref,        # fc3:  256 -> 128
    wmv_ref, bmv_ref,      # fused [fc_mean | fc_logvar]: 128 -> 2*latent
    w4_ref, b4_ref,        # fc4:  latent -> 128
    w45_ref, b45_ref,      # fused [fc4_dim_adjust | fc5]: 128 -> 512
    w6_ref, b6_ref,        # fc6:  256 -> 512
    w7_ref, b7_ref,        # fc7:  512 -> input_dim
    # outputs
    recon_ref, mv_ref,
    *, latent_dim,
):
    def lin(h, w_ref, b_ref):
        # bf16 MXU inputs, f32 accumulation, f32 bias add on the VPU.
        return jnp.dot(h.astype(w_ref.dtype), w_ref[...],
                       preferred_element_type=jnp.float32) + b_ref[...]

    def lrelu(h):
        # LeakyReLU(0.2)
        return jnp.where(h > 0, h, 0.2 * h)

    x = x_ref[...]

    # ---------------- encode ----------------  (dropout = identity, eval mode)
    h1 = lrelu(lin(x, w1_ref, b1_ref))
    h2p = lin(h1, w2p_ref, b2p_ref)              # fused fc2 + fc1_dim_adjust
    h2 = lrelu(h2p[:, :256])
    h1_adjusted = h2p[:, 256:]
    h3 = lrelu(lin(h2 + h1_adjusted, w3_ref, b3_ref))
    mv = lin(h3, wmv_ref, bmv_ref)               # fused [mean | logvar], lane-denser
    mean = mv[:, :latent_dim]
    logvar = mv[:, latent_dim:]

    # ---------------- reparameterize ----------------
    std = jnp.exp(0.5 * logvar)
    z = mean + eps_ref[...] * std

    # ---------------- decode ----------------
    h4 = lrelu(lin(z, w4_ref, b4_ref))
    h45 = lin(h4, w45_ref, b45_ref)              # fused fc4_dim_adjust + fc5
    h4_adjusted = h45[:, :256]
    h5 = lrelu(h45[:, 256:])
    h6 = lrelu(lin(h5 + h4_adjusted, w6_ref, b6_ref))
    recon = jax.nn.sigmoid(lin(h6, w7_ref, b7_ref))

    recon_ref[...] = recon.astype(recon_ref.dtype)
    mv_ref[...] = mv.astype(mv_ref.dtype)


def init_linear(key, in_features, out_features):
    """torch.nn.Linear default init: U(-1/sqrt(in), 1/sqrt(in)).
    Weight stored transposed as (in, out); bias as (1, out)."""
    kw, kb = jax.random.split(key)
    bound = 1.0 / jnp.sqrt(jnp.float32(in_features))
    w = jax.random.uniform(kw, (in_features, out_features), jnp.float32, -bound, bound)
    b = jax.random.uniform(kb, (1, out_features), jnp.float32, -bound, bound)
    return w, b


def make_params(key, input_dim, latent_dim, weight_dtype=jnp.bfloat16):
    layer_dims = [
        ("fc1", input_dim, 512),
        ("fc2", 512, 256),
        ("fc3", 256, 128),
        ("fc_mean", 128, latent_dim),
        ("fc_logvar", 128, latent_dim),
        ("fc4", latent_dim, 128),
        ("fc4_dim_adjust", 128, 256),
        ("fc5", 128, 256),
        ("fc6", 256, 512),
        ("fc7", 512, input_dim),
        ("fc1_dim_adjust", 512, 256),
    ]
    keys = jax.random.split(key, len(layer_dims))
    raw = {name: init_linear(k, din, dout)
           for k, (name, din, dout) in zip(keys, layer_dims)}

    def fuse(a, b):
        wa, ba = raw[a]
        wb, bb = raw[b]
        return jnp.concatenate([wa, wb], axis=1), jnp.concatenate([ba, bb], axis=1)

    w2p, b2p = fuse("fc2", "fc1_dim_adjust")        # 512 -> (256 | 256)
    wmv, bmv = fuse("fc_mean", "fc_logvar")         # 128 -> (latent | latent)
    w45, b45 = fuse("fc4_dim_adjust", "fc5")        # 128 -> (256 | 256)

    ordered = [
        raw["fc1"][0], raw["fc1"][1],
        w2p, b2p,
        raw["fc3"][0], raw["fc3"][1],
        wmv, bmv,
        raw["fc4"][0], raw["fc4"][1],
        w45, b45,
        raw["fc6"][0], raw["fc6"][1],
        raw["fc7"][0], raw["fc7"][1],
    ]
    # Weights -> bf16 for MXU throughput (f32 accumulation in-kernel); biases stay f32.
    params = []
    for i, p in enumerate(ordered):
        params.append(p.astype(weight_dtype) if i % 2 == 0 else p)
    return params  # flat [w, b, w, b, ...] in kernel argument order


def complex_vae_forward(x, eps, params, *, tile_b=TILE_B):
    batch, input_dim = x.shape
    latent_dim = eps.shape[1]

    # Pad batch to a multiple of tile_b so every MXU matmul sees full rows.
    n_tiles = pl.cdiv(batch, tile_b)
    padded = n_tiles * tile_b
    if padded != batch:
        pad = padded - batch
        x = jnp.pad(x, ((0, pad), (0, 0)))
        eps = jnp.pad(eps, ((0, pad), (0, 0)))

    def batch_spec(feat):
        return pl.BlockSpec((tile_b, feat), lambda i: (i, 0))

    def resident_spec(shape):
        # Weights/biases: same block every grid step -> DMA'd once, stay in VMEM.
        return pl.BlockSpec(shape, lambda i: (0, 0))

    in_specs = [batch_spec(input_dim), batch_spec(latent_dim)]
    in_specs += [resident_spec(p.shape) for p in params]

    out_specs = (batch_spec(input_dim), batch_spec(2 * latent_dim))
    out_shapes = (
        jax.ShapeDtypeStruct((padded, input_dim), jnp.float32),      # recon
        jax.ShapeDtypeStruct((padded, 2 * latent_dim), jnp.float32),  # packed [mean|logvar]
    )

    # Advisory cost estimate (fused layer dims).
    layer_kn = [
        (input_dim, 512), (512, 512), (256, 128), (128, 2 * latent_dim),
        (latent_dim, 128), (128, 512), (256, 512), (512, input_dim),
    ]
    flops = 2 * padded * sum(k * n for k, n in layer_kn)
    bytes_accessed = sum(p.size * p.dtype.itemsize for p in params)
    bytes_accessed += (x.size + eps.size) * 4
    bytes_accessed += (padded * input_dim + padded * 2 * latent_dim) * 4
    transcendentals = padded * (latent_dim + input_dim)  # exp(std) + sigmoid

    kernel = functools.partial(vae_kernel, latent_dim=latent_dim)

    recon, mv = pl.pallas_call(
        kernel,
        out_shape=out_shapes,
        grid_spec=pltpu.PrefetchScalarGridSpec(
            num_scalar_prefetch=0,
            grid=(n_tiles,),
            in_specs=in_specs,
            out_specs=out_specs,
        ),
        compiler_params=pltpu.CompilerParams(
            dimension_semantics=("parallel",),
        ),
        cost_estimate=pl.CostEstimate(
            flops=flops,
            transcendentals=transcendentals,
            bytes_accessed=bytes_accessed,
        ),
    )(x, eps, *params)

    recon = recon[:batch]
    mean = mv[:batch, :latent_dim]
    logvar = mv[:batch, latent_dim:]
    return recon, mean, logvar


if __name__ == "__main__":
    input_dim = 32
    latent_dim = 8
    batch = 8

    root = jax.random.PRNGKey(0)
    k_params, k_x, k_eps = jax.random.split(root, 3)

    params = make_params(k_params, input_dim, latent_dim)
    x = jax.random.normal(k_x, (batch, input_dim), jnp.float32)
    eps = jax.random.normal(k_eps, (batch, latent_dim), jnp.float32)

    recon, mean, logvar = complex_vae_forward(x, eps, params)
    jax.block_until_ready((recon, mean, logvar))

    assert recon.shape == (batch, input_dim)
    assert mean.shape == (batch, latent_dim)
    assert logvar.shape == (batch, latent_dim)
    assert bool(jnp.all(jnp.isfinite(recon)))
    assert bool(jnp.all((recon >= 0) & (recon <= 1)))  # sigmoid range

    print("KERNEL_OK")
</pallas_src>

<mosaic_0001>
module attributes {stable_mosaic.version = 11 : i64} {
  func.func @vae_kernel(%arg0: i32, %arg1: memref<128x32xf32, #tpu.memory_space<vmem>>, %arg2: memref<128x8xf32, #tpu.memory_space<vmem>>, %arg3: memref<32x512xbf16, #tpu.memory_space<vmem>>, %arg4: memref<1x512xf32, #tpu.memory_space<vmem>>, %arg5: memref<512x512xbf16, #tpu.memory_space<vmem>>, %arg6: memref<1x512xf32, #tpu.memory_space<vmem>>, %arg7: memref<256x128xbf16, #tpu.memory_space<vmem>>, %arg8: memref<1x128xf32, #tpu.memory_space<vmem>>, %arg9: memref<128x16xbf16, #tpu.memory_space<vmem>>, %arg10: memref<1x16xf32, #tpu.memory_space<vmem>>, %arg11: memref<8x128xbf16, #tpu.memory_space<vmem>>, %arg12: memref<1x128xf32, #tpu.memory_space<vmem>>, %arg13: memref<128x512xbf16, #tpu.memory_space<vmem>>, %arg14: memref<1x512xf32, #tpu.memory_space<vmem>>, %arg15: memref<256x512xbf16, #tpu.memory_space<vmem>>, %arg16: memref<1x512xf32, #tpu.memory_space<vmem>>, %arg17: memref<512x32xbf16, #tpu.memory_space<vmem>>, %arg18: memref<1x32xf32, #tpu.memory_space<vmem>>, %arg19: memref<128x32xf32, #tpu.memory_space<vmem>>, %arg20: memref<128x16xf32, #tpu.memory_space<vmem>>) attributes {dimension_semantics = [#tpu.dimension_semantics<parallel>], iteration_bounds = array<i64: 1>, scalar_prefetch = 0 : i64, scratch_operands = 0 : i64, tpu.core_type = #tpu.core_type<tc>, window_params = [{transform_indices = @transform_0, window_bounds = array<i64: 128, 32>}, {transform_indices = @transform_1, window_bounds = array<i64: 128, 8>}, {pipeline_mode = #tpu.pipeline_mode<synchronous>, transform_indices = @transform_2, window_bounds = array<i64: 32, 512>}, {pipeline_mode = #tpu.pipeline_mode<synchronous>, transform_indices = @transform_3, window_bounds = array<i64: 1, 512>}, {pipeline_mode = #tpu.pipeline_mode<synchronous>, transform_indices = @transform_4, window_bounds = array<i64: 512, 512>}, {pipeline_mode = #tpu.pipeline_mode<synchronous>, transform_indices = @transform_5, window_bounds = array<i64: 1, 512>}, {pipeline_mode = #tpu.pipeline_mode<synchronous>, transform_indices = @transform_6, window_bounds = array<i64: 256, 128>}, {pipeline_mode = #tpu.pipeline_mode<synchronous>, transform_indices = @transform_7, window_bounds = array<i64: 1, 128>}, {pipeline_mode = #tpu.pipeline_mode<synchronous>, transform_indices = @transform_8, window_bounds = array<i64: 128, 16>}, {pipeline_mode = #tpu.pipeline_mode<synchronous>, transform_indices = @transform_9, window_bounds = array<i64: 1, 16>}, {pipeline_mode = #tpu.pipeline_mode<synchronous>, transform_indices = @transform_10, window_bounds = array<i64: 8, 128>}, {pipeline_mode = #tpu.pipeline_mode<synchronous>, transform_indices = @transform_11, window_bounds = array<i64: 1, 128>}, {pipeline_mode = #tpu.pipeline_mode<synchronous>, transform_indices = @transform_12, window_bounds = array<i64: 128, 512>}, {pipeline_mode = #tpu.pipeline_mode<synchronous>, transform_indices = @transform_13, window_bounds = array<i64: 1, 512>}, {pipeline_mode = #tpu.pipeline_mode<synchronous>, transform_indices = @transform_14, window_bounds = array<i64: 256, 512>}, {pipeline_mode = #tpu.pipeline_mode<synchronous>, transform_indices = @transform_15, window_bounds = array<i64: 1, 512>}, {pipeline_mode = #tpu.pipeline_mode<synchronous>, transform_indices = @transform_16, window_bounds = array<i64: 512, 32>}, {pipeline_mode = #tpu.pipeline_mode<synchronous>, transform_indices = @transform_17, window_bounds = array<i64: 1, 32>}, {transform_indices = @transform_18, window_bounds = array<i64: 128, 32>}, {transform_indices = @transform_19, window_bounds = array<i64: 128, 16>}]} {
    %c0 = arith.constant 0 : index
    %c0_0 = arith.constant 0 : index
    %0 = vector.load %arg1[%c0, %c0_0] : memref<128x32xf32, #tpu.memory_space<vmem>>, vector<128x32xf32>
    %1 = arith.truncf %0 : vector<128x32xf32> to vector<128x32xbf16>
    %c0_1 = arith.constant 0 : index
    %c0_2 = arith.constant 0 : index
    %2 = vector.load %arg3[%c0_1, %c0_2] : memref<32x512xbf16, #tpu.memory_space<vmem>>, vector<32x512xbf16>
    %cst = arith.constant dense<0.000000e+00> : vector<128x512xf32>
    %3 = tpu.matmul %1, %2, %cst {dimension_numbers = #tpu.dot_dimension_numbers<[1], [0], [0], [1], [0, 0, 1, 1], [], []>} : vector<128x32xbf16>, vector<32x512xbf16>, vector<128x512xf32> -> vector<128x512xf32>
    %c0_3 = arith.constant 0 : index
    %c0_4 = arith.constant 0 : index
    %4 = vector.load %arg4[%c0_3, %c0_4] : memref<1x512xf32, #tpu.memory_space<vmem>>, vector<1x512xf32>
    %5 = vector.broadcast %4 : vector<1x512xf32> to vector<128x512xf32>
    %6 = arith.addf %3, %5 : vector<128x512xf32>
    %cst_5 = arith.constant 0.000000e+00 : f32
    %7 = vector.broadcast %cst_5 : f32 to vector<128x512xf32>
    %8 = arith.cmpf ogt, %6, %7 : vector<128x512xf32>
    %cst_6 = arith.constant 2.000000e-01 : f32
    %9 = vector.broadcast %cst_6 : f32 to vector<128x512xf32>
    %10 = arith.mulf %9, %6 : vector<128x512xf32>
    %11 = arith.select %8, %6, %10 : vector<128x512xi1>, vector<128x512xf32>
    %12 = arith.truncf %11 : vector<128x512xf32> to vector<128x512xbf16>
    %c0_7 = arith.constant 0 : index
    %c0_8 = arith.constant 0 : index
    %13 = vector.load %arg5[%c0_7, %c0_8] : memref<512x512xbf16, #tpu.memory_space<vmem>>, vector<512x512xbf16>
    %cst_9 = arith.constant dense<0.000000e+00> : vector<128x512xf32>
    %14 = tpu.matmul %12, %13, %cst_9 {dimension_numbers = #tpu.dot_dimension_numbers<[1], [0], [0], [1], [0, 0, 1, 1], [], []>} : vector<128x512xbf16>, vector<512x512xbf16>, vector<128x512xf32> -> vector<128x512xf32>
    %c0_10 = arith.constant 0 : index
    %c0_11 = arith.constant 0 : index
    %15 = vector.load %arg6[%c0_10, %c0_11] : memref<1x512xf32, #tpu.memory_space<vmem>>, vector<1x512xf32>
    %16 = vector.broadcast %15 : vector<1x512xf32> to vector<128x512xf32>
    %17 = arith.addf %14, %16 : vector<128x512xf32>
    %18 = vector.extract_strided_slice %17 {offsets = [0, 0], sizes = [128, 256], strides = [1, 1]} : vector<128x512xf32> to vector<128x256xf32>
    %cst_12 = arith.constant 0.000000e+00 : f32
    %19 = vector.broadcast %cst_12 : f32 to vector<128x256xf32>
    %20 = arith.cmpf ogt, %18, %19 : vector<128x256xf32>
    %cst_13 = arith.constant 2.000000e-01 : f32
    %21 = vector.broadcast %cst_13 : f32 to vector<128x256xf32>
    %22 = arith.mulf %21, %18 : vector<128x256xf32>
    %23 = arith.select %20, %18, %22 : vector<128x256xi1>, vector<128x256xf32>
    %24 = vector.extract_strided_slice %17 {offsets = [0, 256], sizes = [128, 256], strides = [1, 1]} : vector<128x512xf32> to vector<128x256xf32>
    %25 = arith.addf %23, %24 : vector<128x256xf32>
    %26 = arith.truncf %25 : vector<128x256xf32> to vector<128x256xbf16>
    %c0_14 = arith.constant 0 : index
    %c0_15 = arith.constant 0 : index
    %27 = vector.load %arg7[%c0_14, %c0_15] : memref<256x128xbf16, #tpu.memory_space<vmem>>, vector<256x128xbf16>
    %cst_16 = arith.constant dense<0.000000e+00> : vector<128x128xf32>
    %28 = tpu.matmul %26, %27, %cst_16 {dimension_numbers = #tpu.dot_dimension_numbers<[1], [0], [0], [1], [0, 0, 1, 1], [], []>} : vector<128x256xbf16>, vector<256x128xbf16>, vector<128x128xf32> -> vector<128x128xf32>
    %c0_17 = arith.constant 0 : index
    %c0_18 = arith.constant 0 : index
    %29 = vector.load %arg8[%c0_17, %c0_18] : memref<1x128xf32, #tpu.memory_space<vmem>>, vector<1x128xf32>
    %30 = vector.broadcast %29 : vector<1x128xf32> to vector<128x128xf32>
    %31 = arith.addf %28, %30 : vector<128x128xf32>
    %cst_19 = arith.constant 0.000000e+00 : f32
    %32 = vector.broadcast %cst_19 : f32 to vector<128x128xf32>
    %33 = arith.cmpf ogt, %31, %32 : vector<128x128xf32>
    %cst_20 = arith.constant 2.000000e-01 : f32
    %34 = vector.broadcast %cst_20 : f32 to vector<128x128xf32>
    %35 = arith.mulf %34, %31 : vector<128x128xf32>
    %36 = arith.select %33, %31, %35 : vector<128x128xi1>, vector<128x128xf32>
    %37 = arith.truncf %36 : vector<128x128xf32> to vector<128x128xbf16>
    %c0_21 = arith.constant 0 : index
    %c0_22 = arith.constant 0 : index
    %38 = vector.load %arg9[%c0_21, %c0_22] : memref<128x16xbf16, #tpu.memory_space<vmem>>, vector<128x16xbf16>
    %cst_23 = arith.constant dense<0.000000e+00> : vector<128x16xf32>
    %39 = tpu.matmul %37, %38, %cst_23 {dimension_numbers = #tpu.dot_dimension_numbers<[1], [0], [0], [1], [0, 0, 1, 1], [], []>} : vector<128x128xbf16>, vector<128x16xbf16>, vector<128x16xf32> -> vector<128x16xf32>
    %c0_24 = arith.constant 0 : index
    %c0_25 = arith.constant 0 : index
    %40 = vector.load %arg10[%c0_24, %c0_25] : memref<1x16xf32, #tpu.memory_space<vmem>>, vector<1x16xf32>
    %41 = vector.broadcast %40 : vector<1x16xf32> to vector<128x16xf32>
    %42 = arith.addf %39, %41 : vector<128x16xf32>
    %43 = vector.extract_strided_slice %42 {offsets = [0, 0], sizes = [128, 8], strides = [1, 1]} : vector<128x16xf32> to vector<128x8xf32>
    %44 = vector.extract_strided_slice %42 {offsets = [0, 8], sizes = [128, 8], strides = [1, 1]} : vector<128x16xf32> to vector<128x8xf32>
    %cst_26 = arith.constant 5.000000e-01 : f32
    %45 = vector.broadcast %cst_26 : f32 to vector<128x8xf32>
    %46 = arith.mulf %45, %44 : vector<128x8xf32>
    %47 = math.exp %46 : vector<128x8xf32>
    %c0_27 = arith.constant 0 : index
    %c0_28 = arith.constant 0 : index
    %48 = vector.load %arg2[%c0_27, %c0_28] : memref<128x8xf32, #tpu.memory_space<vmem>>, vector<128x8xf32>
    %49 = arith.mulf %48, %47 : vector<128x8xf32>
    %50 = arith.addf %43, %49 : vector<128x8xf32>
    %51 = arith.truncf %50 : vector<128x8xf32> to vector<128x8xbf16>
    %c0_29 = arith.constant 0 : index
    %c0_30 = arith.constant 0 : index
    %52 = vector.load %arg11[%c0_29, %c0_30] : memref<8x128xbf16, #tpu.memory_space<vmem>>, vector<8x128xbf16>
    %cst_31 = arith.constant dense<0.000000e+00> : vector<128x128xf32>
    %53 = tpu.matmul %51, %52, %cst_31 {dimension_numbers = #tpu.dot_dimension_numbers<[1], [0], [0], [1], [0, 0, 1, 1], [], []>} : vector<128x8xbf16>, vector<8x128xbf16>, vector<128x128xf32> -> vector<128x128xf32>
    %c0_32 = arith.constant 0 : index
    %c0_33 = arith.constant 0 : index
    %54 = vector.load %arg12[%c0_32, %c0_33] : memref<1x128xf32, #tpu.memory_space<vmem>>, vector<1x128xf32>
    %55 = vector.broadcast %54 : vector<1x128xf32> to vector<128x128xf32>
    %56 = arith.addf %53, %55 : vector<128x128xf32>
    %cst_34 = arith.constant 0.000000e+00 : f32
    %57 = vector.broadcast %cst_34 : f32 to vector<128x128xf32>
    %58 = arith.cmpf ogt, %56, %57 : vector<128x128xf32>
    %cst_35 = arith.constant 2.000000e-01 : f32
    %59 = vector.broadcast %cst_35 : f32 to vector<128x128xf32>
    %60 = arith.mulf %59, %56 : vector<128x128xf32>
    %61 = arith.select %58, %56, %60 : vector<128x128xi1>, vector<128x128xf32>
    %62 = arith.truncf %61 : vector<128x128xf32> to vector<128x128xbf16>
    %c0_36 = arith.constant 0 : index
    %c0_37 = arith.constant 0 : index
    %63 = vector.load %arg13[%c0_36, %c0_37] : memref<128x512xbf16, #tpu.memory_space<vmem>>, vector<128x512xbf16>
    %cst_38 = arith.constant dense<0.000000e+00> : vector<128x512xf32>
    %64 = tpu.matmul %62, %63, %cst_38 {dimension_numbers = #tpu.dot_dimension_numbers<[1], [0], [0], [1], [0, 0, 1, 1], [], []>} : vector<128x128xbf16>, vector<128x512xbf16>, vector<128x512xf32> -> vector<128x512xf32>
    %c0_39 = arith.constant 0 : index
    %c0_40 = arith.constant 0 : index
    %65 = vector.load %arg14[%c0_39, %c0_40] : memref<1x512xf32, #tpu.memory_space<vmem>>, vector<1x512xf32>
    %66 = vector.broadcast %65 : vector<1x512xf32> to vector<128x512xf32>
    %67 = arith.addf %64, %66 : vector<128x512xf32>
    %68 = vector.extract_strided_slice %67 {offsets = [0, 0], sizes = [128, 256], strides = [1, 1]} : vector<128x512xf32> to vector<128x256xf32>
    %69 = vector.extract_strided_slice %67 {offsets = [0, 256], sizes = [128, 256], strides = [1, 1]} : vector<128x512xf32> to vector<128x256xf32>
    %cst_41 = arith.constant 0.000000e+00 : f32
    %70 = vector.broadcast %cst_41 : f32 to vector<128x256xf32>
    %71 = arith.cmpf ogt, %69, %70 : vector<128x256xf32>
    %cst_42 = arith.constant 2.000000e-01 : f32
    %72 = vector.broadcast %cst_42 : f32 to vector<128x256xf32>
    %73 = arith.mulf %72, %69 : vector<128x256xf32>
    %74 = arith.select %71, %69, %73 : vector<128x256xi1>, vector<128x256xf32>
    %75 = arith.addf %74, %68 : vector<128x256xf32>
    %76 = arith.truncf %75 : vector<128x256xf32> to vector<128x256xbf16>
    %c0_43 = arith.constant 0 : index
    %c0_44 = arith.constant 0 : index
    %77 = vector.load %arg15[%c0_43, %c0_44] : memref<256x512xbf16, #tpu.memory_space<vmem>>, vector<256x512xbf16>
    %cst_45 = arith.constant dense<0.000000e+00> : vector<128x512xf32>
    %78 = tpu.matmul %76, %77, %cst_45 {dimension_numbers = #tpu.dot_dimension_numbers<[1], [0], [0], [1], [0, 0, 1, 1], [], []>} : vector<128x256xbf16>, vector<256x512xbf16>, vector<128x512xf32> -> vector<128x512xf32>
    %c0_46 = arith.constant 0 : index
    %c0_47 = arith.constant 0 : index
    %79 = vector.load %arg16[%c0_46, %c0_47] : memref<1x512xf32, #tpu.memory_space<vmem>>, vector<1x512xf32>
    %80 = vector.broadcast %79 : vector<1x512xf32> to vector<128x512xf32>
    %81 = arith.addf %78, %80 : vector<128x512xf32>
    %cst_48 = arith.constant 0.000000e+00 : f32
    %82 = vector.broadcast %cst_48 : f32 to vector<128x512xf32>
    %83 = arith.cmpf ogt, %81, %82 : vector<128x512xf32>
    %cst_49 = arith.constant 2.000000e-01 : f32
    %84 = vector.broadcast %cst_49 : f32 to vector<128x512xf32>
    %85 = arith.mulf %84, %81 : vector<128x512xf32>
    %86 = arith.select %83, %81, %85 : vector<128x512xi1>, vector<128x512xf32>
    %87 = arith.truncf %86 : vector<128x512xf32> to vector<128x512xbf16>
    %c0_50 = arith.constant 0 : index
    %c0_51 = arith.constant 0 : index
    %88 = vector.load %arg17[%c0_50, %c0_51] : memref<512x32xbf16, #tpu.memory_space<vmem>>, vector<512x32xbf16>
    %cst_52 = arith.constant dense<0.000000e+00> : vector<128x32xf32>
    %89 = tpu.matmul %87, %88, %cst_52 {dimension_numbers = #tpu.dot_dimension_numbers<[1], [0], [0], [1], [0, 0, 1, 1], [], []>} : vector<128x512xbf16>, vector<512x32xbf16>, vector<128x32xf32> -> vector<128x32xf32>
    %c0_53 = arith.constant 0 : index
    %c0_54 = arith.constant 0 : index
    %90 = vector.load %arg18[%c0_53, %c0_54] : memref<1x32xf32, #tpu.memory_space<vmem>>, vector<1x32xf32>
    %91 = vector.broadcast %90 : vector<1x32xf32> to vector<128x32xf32>
    %92 = arith.addf %89, %91 : vector<128x32xf32>
    %93 = arith.negf %92 : vector<128x32xf32>
    %94 = math.exp %93 : vector<128x32xf32>
    %cst_55 = arith.constant 1.000000e+00 : f32
    %95 = vector.broadcast %cst_55 : f32 to vector<128x32xf32>
    %96 = arith.addf %95, %94 : vector<128x32xf32>
    %97 = arith.divf %95, %96 : vector<128x32xf32>
    %c0_56 = arith.constant 0 : index
    %c0_57 = arith.constant 0 : index
    %98 = vector.load %arg19[%c0_56, %c0_57] : memref<128x32xf32, #tpu.memory_space<vmem>>, vector<128x32xf32>
    tpu.vector_store %arg19[%c0_56, %c0_57], %97 {strides = array<i32>} : memref<128x32xf32, #tpu.memory_space<vmem>>, vector<128x32xf32>,
    %c0_58 = arith.constant 0 : index
    %c0_59 = arith.constant 0 : index
    %99 = vector.load %arg20[%c0_58, %c0_59] : memref<128x16xf32, #tpu.memory_space<vmem>>, vector<128x16xf32>
    tpu.vector_store %arg20[%c0_58, %c0_59], %42 {strides = array<i32>} : memref<128x16xf32, #tpu.memory_space<vmem>>, vector<128x16xf32>,
    return
  }
  func.func @transform_0(%arg0: i32) -> (i32, i32) {
    %c0_i32 = arith.constant 0 : i32
    %c0_i32_0 = arith.constant 0 : i32
    return %arg0, %c0_i32 : i32, i32
  }
  func.func @transform_1(%arg0: i32) -> (i32, i32) {
    %c0_i32 = arith.constant 0 : i32
    %c0_i32_0 = arith.constant 0 : i32
    return %arg0, %c0_i32 : i32, i32
  }
  func.func @transform_2(%arg0: i32) -> (i32, i32) {
    %c0_i32 = arith.constant 0 : i32
    %c0_i32_0 = arith.constant 0 : i32
    %c0_i32_1 = arith.constant 0 : i32
    return %c0_i32, %c0_i32_0 : i32, i32
  }
  func.func @transform_3(%arg0: i32) -> (i32, i32) {
    %c0_i32 = arith.constant 0 : i32
    %c0_i32_0 = arith.constant 0 : i32
    %c0_i32_1 = arith.constant 0 : i32
    return %c0_i32, %c0_i32_0 : i32, i32
  }
  func.func @transform_4(%arg0: i32) -> (i32, i32) {
    %c0_i32 = arith.constant 0 : i32
    %c0_i32_0 = arith.constant 0 : i32
    %c0_i32_1 = arith.constant 0 : i32
    return %c0_i32, %c0_i32_0 : i32, i32
  }
  func.func @transform_5(%arg0: i32) -> (i32, i32) {
    %c0_i32 = arith.constant 0 : i32
    %c0_i32_0 = arith.constant 0 : i32
    %c0_i32_1 = arith.constant 0 : i32
    return %c0_i32, %c0_i32_0 : i32, i32
  }
  func.func @transform_6(%arg0: i32) -> (i32, i32) {
    %c0_i32 = arith.constant 0 : i32
    %c0_i32_0 = arith.constant 0 : i32
    %c0_i32_1 = arith.constant 0 : i32
    return %c0_i32, %c0_i32_0 : i32, i32
  }
  func.func @transform_7(%arg0: i32) -> (i32, i32) {
    %c0_i32 = arith.constant 0 : i32
    %c0_i32_0 = arith.constant 0 : i32
    %c0_i32_1 = arith.constant 0 : i32
    return %c0_i32, %c0_i32_0 : i32, i32
  }
  func.func @transform_8(%arg0: i32) -> (i32, i32) {
    %c0_i32 = arith.constant 0 : i32
    %c0_i32_0 = arith.constant 0 : i32
    %c0_i32_1 = arith.constant 0 : i32
    return %c0_i32, %c0_i32_0 : i32, i32
  }
  func.func @transform_9(%arg0: i32) -> (i32, i32) {
    %c0_i32 = arith.constant 0 : i32
    %c0_i32_0 = arith.constant 0 : i32
    %c0_i32_1 = arith.constant 0 : i32
    return %c0_i32, %c0_i32_0 : i32, i32
  }
  func.func @transform_10(%arg0: i32) -> (i32, i32) {
    %c0_i32 = arith.constant 0 : i32
    %c0_i32_0 = arith.constant 0 : i32
    %c0_i32_1 = arith.constant 0 : i32
    return %c0_i32, %c0_i32_0 : i32, i32
  }
  func.func @transform_11(%arg0: i32) -> (i32, i32) {
    %c0_i32 = arith.constant 0 : i32
    %c0_i32_0 = arith.constant 0 : i32
    %c0_i32_1 = arith.constant 0 : i32
    return %c0_i32, %c0_i32_0 : i32, i32
  }
  func.func @transform_12(%arg0: i32) -> (i32, i32) {
    %c0_i32 = arith.constant 0 : i32
    %c0_i32_0 = arith.constant 0 : i32
    %c0_i32_1 = arith.constant 0 : i32
    return %c0_i32, %c0_i32_0 : i32, i32
  }
  func.func @transform_13(%arg0: i32) -> (i32, i32) {
    %c0_i32 = arith.constant 0 : i32
    %c0_i32_0 = arith.constant 0 : i32
    %c0_i32_1 = arith.constant 0 : i32
    return %c0_i32, %c0_i32_0 : i32, i32
  }
  func.func @transform_14(%arg0: i32) -> (i32, i32) {
    %c0_i32 = arith.constant 0 : i32
    %c0_i32_0 = arith.constant 0 : i32
    %c0_i32_1 = arith.constant 0 : i32
    return %c0_i32, %c0_i32_0 : i32, i32
  }
  func.func @transform_15(%arg0: i32) -> (i32, i32) {
    %c0_i32 = arith.constant 0 : i32
    %c0_i32_0 = arith.constant 0 : i32
    %c0_i32_1 = arith.constant 0 : i32
    return %c0_i32, %c0_i32_0 : i32, i32
  }
  func.func @transform_16(%arg0: i32) -> (i32, i32) {
    %c0_i32 = arith.constant 0 : i32
    %c0_i32_0 = arith.constant 0 : i32
    %c0_i32_1 = arith.constant 0 : i32
    return %c0_i32, %c0_i32_0 : i32, i32
  }
  func.func @transform_17(%arg0: i32) -> (i32, i32) {
    %c0_i32 = arith.constant 0 : i32
    %c0_i32_0 = arith.constant 0 : i32
    %c0_i32_1 = arith.constant 0 : i32
    return %c0_i32, %c0_i32_0 : i32, i32
  }
  func.func @transform_18(%arg0: i32) -> (i32, i32) {
    %c0_i32 = arith.constant 0 : i32
    %c0_i32_0 = arith.constant 0 : i32
    return %arg0, %c0_i32 : i32, i32
  }
  func.func @transform_19(%arg0: i32) -> (i32, i32) {
    %c0_i32 = arith.constant 0 : i32
    %c0_i32_0 = arith.constant 0 : i32
    return %arg0, %c0_i32 : i32, i32
  }
}

</mosaic_0001>

<bundles_post_ra>
// kernel: tpu_custom_call.1
= control target key start
LH: loop header
LB: loop body
LE: loop exit
PB: predicated region body
PF: predicated region fallthrough
CT: control target
= control target key end

     0   :  { %s7986_s0 = inlined_call_operand.vmem [shape: f32[128,32], index: 0, kind: input, shape index: {}]   ;;  %s7987_s1 = inlined_call_operand.vmem [shape: f32[128,8], index: 1, kind: input, shape index: {}]   ;;  %s7988_s2 = inlined_call_operand.hbm [shape: bf16[32,512], index: 2, kind: input, shape index: {}]   ;;  %s7989_s3 = inlined_call_operand.vmem [shape: f32[1,512], index: 3, kind: input, shape index: {}]   ;;  %s7990_s4 = inlined_call_operand.hbm [shape: bf16[512,512], index: 4, kind: input, shape index: {}]   ;;  %s7991_s5 = inlined_call_operand.vmem [shape: f32[1,512], index: 5, kind: input, shape index: {}]   ;;  %s7992_s6 = inlined_call_operand.vmem [shape: bf16[256,128], index: 6, kind: input, shape index: {}]   ;;  %s7993_s7 = inlined_call_operand.vmem [shape: f32[1,128], index: 7, kind: input, shape index: {}]   ;;  %s7994_s8 = inlined_call_operand.vmem [shape: bf16[128,16], index: 8, kind: input, shape index: {}]   ;;  %s7995_s9 = inlined_call_operand.vmem [shape: f32[1,16], index: 9, kind: input, shape index: {}]   ;;  %s7996_s10 = inlined_call_operand.vmem [shape: bf16[8,128], index: 10, kind: input, shape index: {}]   ;;  %s7997_s11 = inlined_call_operand.vmem [shape: f32[1,128], index: 11, kind: input, shape index: {}]   ;;  %s7998_s12 = inlined_call_operand.hbm [shape: bf16[128,512], index: 12, kind: input, shape index: {}]   ;;  %s7999_s13 = inlined_call_operand.vmem [shape: f32[1,512], index: 13, kind: input, shape index: {}]   ;;  %s8000_s14 = inlined_call_operand.vmem [shape: bf16[256,512], index: 14, kind: input, shape index: {}]   ;;  %s8001_s15 = inlined_call_operand.vmem [shape: f32[1,512], index: 15, kind: input, shape index: {}]   ;;  %s8002_s16 = inlined_call_operand.vmem [shape: bf16[512,32], index: 16, kind: input, shape index: {}]   ;;  %s8003_s17 = inlined_call_operand.vmem [shape: f32[1,32], index: 17, kind: input, shape index: {}]   ;;  %s8004_s18 = inlined_call_operand.vmem [shape: f32[128,32], index: 18, kind: output, shape index: {0}]   ;;  %s8005_s19 = inlined_call_operand.vmem [shape: f32[128,16], index: 19, kind: output, shape index: {1}]  }
   0x1   :  { %8010 = sst [smem:[#allocation9_spill]] %s7986_s0 }
   0x2   :  { %8011 = sst [smem:[#allocation10_spill]] %s7987_s1 }
   0x3   :  { %8012 = sst [smem:[#allocation11_spill]] %s7988_s2 }
   0x4   :  { %8013 = sst [smem:[#allocation12_spill]] %s7989_s3 }
   0x5   :  { %25 = vsyncpa [#allocation3], 0 }
   0x6   :  { %26 = vsyncpa [#allocation5], 0  ;;  %s6213_s0 = smov [#allocation4]   ;;  %s6214_s20 = smov [#allocation2]  }
   0x7   :  { %s50_s30 = sshll.u32 %s6213_s0, 4  ;;  %s36_s21 = sshll.u32 %s6214_s20, 4  ;;  %s51_s30 = int_to_ptr.vmem [resolvable:$true] %s50_s30  ;;  %s6320_s21 = int_to_ptr.vmem [resolvable:$true] %s36_s21 }
   0x8   :  { %s6143_s2 = scalar_lea.hbm %s7990_s4, 16384 }
   0x9   :  { %p6144_p0 = scmp.ne.s32.totalorder %s7990_s4, %s6143_s2  ;;  %p6147_p1 = scmp.lt.u32.totalorder %s6143_s2, %s7990_s4 }
   0xb   :  { %p6149_p2 = pnand %p6147_p1, %p6144_p0 }
   0xd   :  { %6152 = shalt.err (!%p6149_p2)
}
   0xe   :  { %s6153_s26 = scalar_lea.vmem %s51_s30, 16384  ;;  %p6158_p4 = scmp.lt.s32.totalorder %s51_s30, %s51_s30 }
   0xf   :  { %p6154_p3 = scmp.ne.s32.totalorder %s51_s30, %s6153_s26  ;;  %p6159_p5 = scmp.lt.s32.totalorder %s6153_s26, %s6153_s26 }
  0x11   :  { %p6160_p6 = por %p6159_p5, %p6158_p4 }
  0x13   :  { %p6161_p7 = pnand %p6160_p6, %p6154_p3 }
  0x15   :  { %6164 = shalt.err (!%p6161_p7)
}
  0x16   :  { %s6215_s27 = smov 256   ;;  %s6216_s28 = smov 16  }
  0x17   :  { %56 = dma.hbm_to_vmem [thread:$0]  %s7990_s4, 16384, %s51_s30, [#allocation5], %s6215_s27, %s6215_s27, %s6216_s28  }
  0x18   :  { %s8014_s22 = sld [smem:[#allocation11_spill]] }
  0x1e   :  { %s6165_s2 = scalar_lea.hbm %s8014_s22, 1024 }
  0x1f   :  { %p6166_p8 = scmp.ne.s32.totalorder %s8014_s22, %s6165_s2  ;;  %p6169_p9 = scmp.lt.u32.totalorder %s6165_s2, %s8014_s22 }
  0x21   :  { %p6171_p10 = pnand %p6169_p9, %p6166_p8 }
  0x23   :  { %6174 = shalt.err (!%p6171_p10)
}
  0x24   :  { %s6175_s26 = scalar_lea.vmem %s6320_s21, 1024  ;;  %p6180_p12 = scmp.lt.s32.totalorder %s6320_s21, %s6320_s21 }
  0x25   :  { %p6176_p11 = scmp.ne.s32.totalorder %s6320_s21, %s6175_s26  ;;  %p6181_p13 = scmp.lt.s32.totalorder %s6175_s26, %s6175_s26 }
  0x27   :  { %p6182_p0 = por %p6181_p13, %p6180_p12 }
  0x29   :  { %p6183_p1 = pnand %p6182_p0, %p6176_p11 }
  0x2b   :  { %6186 = shalt.err (!%p6183_p1)
}
  0x2c   :  { %42 = dma.hbm_to_vmem [thread:$0]  %s8014_s22, 1024, %s6320_s21, [#allocation3], %s6215_s27, %s6215_s27, %s6216_s28  }
  0x2d   :  { %s6217_s29 = smov [#allocation6]   ;;  %s6187_s2 = scalar_lea.hbm %s7998_s12, 4096 }
  0x2e   :  { %s76_s0 = sshll.u32 %s6217_s29, 4  ;;  %p6188_p2 = scmp.ne.s32.totalorder %s7998_s12, %s6187_s2  ;;  %s77_s0 = int_to_ptr.vmem [resolvable:$true] %s76_s0 }
  0x2f   :  { %p6191_p3 = scmp.lt.u32.totalorder %s6187_s2, %s7998_s12 }
  0x31   :  { %p6193_p4 = pnand %p6191_p3, %p6188_p2 }
  0x33   :  { %6196 = shalt.err (!%p6193_p4)
}
  0x34   :  { %s6197_s26 = scalar_lea.vmem %s77_s0, 4096  ;;  %p6202_p6 = scmp.lt.s32.totalorder %s77_s0, %s77_s0 }
  0x35   :  { %p6198_p5 = scmp.ne.s32.totalorder %s77_s0, %s6197_s26  ;;  %p6203_p7 = scmp.lt.s32.totalorder %s6197_s26, %s6197_s26 }
  0x37   :  { %p6204_p8 = por %p6203_p7, %p6202_p6 }
  0x39   :  { %p6205_p9 = pnand %p6204_p8, %p6198_p5 }
  0x3b   :  { %6208 = shalt.err (!%p6205_p9)
}
  0x3c   :  { %82 = dma.hbm_to_vmem [thread:$0]  %s7998_s12, 4096, %s77_s0, [#allocation5], %s6215_s27, %s6215_s27, %s6216_s28  }
  0x3d   :  { %6209 = dma.done.wait [#allocation3], 1024  }
  0x3e   :  { %6210 = vsyncadd [#allocation3], 4294966272 }
  0x3f   :  { %6211 = dma.done.wait [#allocation5], 20480  }
  0x40   :  { %6212 = vsyncadd [#allocation5], 4294946816  ;;  %v6218_v0 = vmov 0   ;;  %v5643_v1 = vld [vmem:[#allocation2 + $0x4] ss:$16 sps:$4 sm:$0xff]   ;;  %s8015_s29 = sld [smem:[#allocation9_spill]] }
  0x41   :  { %254 = vmatprep.mubr.bf16.mxu0 %v6218_v0  ;;  %367 = vmatprep.mubr.bf16.mxu1 %v6218_v0  ;;  %v5645_v2 = vld [vmem:[#allocation2] ss:$16 sps:$4 sm:$0xff]   ;;  %v5646_v3 = vld [vmem:[#allocation2 + $0x24] ss:$16 sps:$4 sm:$0xff]   ;;  %vm8009_vm0 = vcmask 261120   ;;  %s8016_s30 = sld [smem:[#allocation12_spill]] }
  0x42   :  { %222 = vmatprep.subr.bf16.mxu0 %v5643_v1  ;;  %v5648_v4 = vld [vmem:[#allocation2 + $0x20] ss:$16 sps:$4 sm:$0xff]   ;;  %v5649_v8 = vld [vmem:[#allocation2 + $0xc] ss:$16 sps:$4 sm:$0xff]   ;;  %v5651_v9 = vld [vmem:[#allocation2 + $0x8] ss:$16 sps:$4 sm:$0xff]  }
  0x43   :  { %223 = vmatpush1.bf16.msra.mxu0 %v5645_v2  ;;  %v5652_v11 = vld [vmem:[#allocation2 + $0x2c] ss:$16 sps:$4 sm:$0xff]   ;;  %335 = vmatprep.subr.bf16.mxu1 %v5649_v8  ;;  %v5654_v13 = vld [vmem:[#allocation2 + $0x28] ss:$16 sps:$4 sm:$0xff]   ;;  %v5655_v14 = vld [vmem:[#allocation4] ss:$16 sps:$4 sm:$0xff]  }
  0x44   :  { %224 = vmatprep.subr.bf16.mxu0 %v5646_v3  ;;  %336 = vmatpush1.bf16.msra.mxu1 %v5651_v9  ;;  %v5657_v15 = vld [vmem:[#allocation4 + $0x4] ss:$16 sps:$4 sm:$0xff]   ;;  %v5660_v16 = vld [vmem:[#allocation4 + $0xc] ss:$16 sps:$4 sm:$0xff]   ;;  %v5658_v19 = vld [vmem:[#allocation4 + $0x8] ss:$16 sps:$4 sm:$0xff]  }
  0x45   :  { %337 = vmatprep.subr.bf16.mxu1 %v5652_v11  ;;  %v5663_v18 = vld [vmem:[#allocation4 + $0x24] ss:$16 sps:$4 sm:$0xff]   ;;  %v5661_v20 = vld [vmem:[#allocation4 + $0x20] ss:$16 sps:$4 sm:$0xff]   ;;  %v5666_v21 = vld [vmem:[#allocation4 + $0x2c] ss:$16 sps:$4 sm:$0xff]  }
  0x46   :  { %v103_v5 = vld [vmem:[%s8015_s29] sm:$0xff]  ;;  %v104_v6 = vld [vmem:[%s8015_s29 + $0x8] sm:$0xff]  ;;  %v105_v10 = vld [vmem:[%s8015_s29 + $0x10] sm:$0xff]  ;;  %s6219_s2 = smov 120   ;;  %s8017_s25 = sld [smem:[#allocation10_spill]] }
  0x47   :  { %v119_v7 = vpack.c.bf16 %v104_v6, %v103_v5  ;;  %225 = vmatpush1.bf16.msra.mxu0 %v5648_v4  ;;  %v106_v12 = vld [vmem:[%s8015_s29 + $0x18] sm:$0xff]  ;;  %v5669_v22 = vld [vmem:[#allocation4 + $0x44] ss:$16 sps:$4 sm:$0xff]   ;;  %v108_v24 = vld [vmem:[%s8015_s29 + $0x28] sm:$0xff] }
  0x48   :  { %1462 = vmatprep.subr.bf16.mxu0 %v5657_v15  ;;  %v120_v17 = vpack.c.bf16 %v106_v12, %v105_v10  ;;  %338 = vmatpush1.bf16.msra.mxu1 %v5654_v13  ;;  %v107_v23 = vld [vmem:[%s8015_s29 + $0x20] sm:$0xff]  ;;  %v5664_v25 = vld [vmem:[#allocation4 + $0x28] ss:$16 sps:$4 sm:$0xff]   ;;  %v5672_v27 = vld [vmem:[#allocation4 + $0x4c] ss:$16 sps:$4 sm:$0xff]  }
  0x49   :  { %1688 = vmatprep.subr.bf16.mxu1 %v5660_v16  ;;  %v5667_v26 = vld [vmem:[#allocation4 + $0x40] ss:$16 sps:$4 sm:$0xff]   ;;  %v5675_v28 = vld [vmem:[#allocation4 + $0x64] ss:$16 sps:$4 sm:$0xff]   ;;  %v121_v29 = vpack.c.bf16 %v108_v24, %v107_v23  ;;  %v5670_v30 = vld [vmem:[#allocation4 + $0x48] ss:$16 sps:$4 sm:$0xff]  }
  0x4a   :  { %4916 = vmatmul.mubr.msk.bf16.vlgmr.msra.gmra.mrb[0].mxu0 %vm8009_vm0, %v119_v7  ;;  %v5673_v31 = vld [vmem:[#allocation4 + $0x60] ss:$16 sps:$4 sm:$0xff]   ;;  %v5678_v32 = vld [vmem:[#allocation4 + $0x6c] ss:$16 sps:$4 sm:$0xff]   ;;  %v5681_v33 = vld [vmem:[#allocation4 + $0x84] ss:$16 sps:$4 sm:$0xff]  }
  0x4b   :  { %264 = vmatprep.mubr.bf16.mxu0 %v6218_v0  ;;  %1463 = vmatpush1.bf16.msra.mxu0 %v5655_v14  ;;  %v109_v34 = vld [vmem:[%s8015_s29 + $0x30] sm:$0xff]  ;;  %v110_v35 = vld [vmem:[%s8015_s29 + $0x38] sm:$0xff]  ;;  %v111_v45 = vld [vmem:[%s8015_s29 + $0x40] sm:$0xff] }
  0x4c   :  { %1464 = vmatprep.subr.bf16.mxu0 %v5663_v18  ;;  %4924 = vmatmul.mubr.msk.bf16.vlgmr.msra.gmra.mrb[0].mxu1 %vm8009_vm0, %v119_v7  ;;  %v5676_v36 = vld [vmem:[#allocation4 + $0x68] ss:$16 sps:$4 sm:$0xff]   ;;  %v5679_v37 = vld [vmem:[#allocation4 + $0x80] ss:$16 sps:$4 sm:$0xff]   ;;  %v5684_v38 = vld [vmem:[#allocation4 + $0x8c] ss:$16 sps:$4 sm:$0xff]   ;;  %v122_v40 = vpack.c.bf16 %v110_v35, %v109_v34 }
  0x4d   :  { %377 = vmatprep.mubr.bf16.mxu1 %v6218_v0  ;;  %1689 = vmatpush1.bf16.msra.mxu1 %v5658_v19  ;;  %v5687_v39 = vld [vmem:[#allocation4 + $0xa4] ss:$16 sps:$4 sm:$0xff]   ;;  %v5682_v41 = vld [vmem:[#allocation4 + $0x88] ss:$16 sps:$4 sm:$0xff]   ;;  %v5685_v42 = vld [vmem:[#allocation4 + $0xa0] ss:$16 sps:$4 sm:$0xff]  }
  0x4e   :  { %1690 = vmatprep.subr.bf16.mxu1 %v5666_v21  ;;  %v5690_v43 = vld [vmem:[#allocation4 + $0xac] ss:$16 sps:$4 sm:$0xff]   ;;  %v5693_v44 = vld [vmem:[#allocation4 + $0xc4] ss:$16 sps:$4 sm:$0xff]   ;;  %v5688_v47 = vld [vmem:[#allocation4 + $0xa8] ss:$16 sps:$4 sm:$0xff]  }
  0x4f   :  { %1465 = vmatpush1.bf16.msra.mxu0 %v5661_v20  ;;  %v112_v46 = vld [vmem:[%s8015_s29 + $0x48] sm:$0xff]  ;;  %v5691_v48 = vld [vmem:[#allocation4 + $0xc0] ss:$16 sps:$4 sm:$0xff]   ;;  %v5699_v50 = vld [vmem:[#allocation4 + $0xe4] ss:$16 sps:$4 sm:$0xff]  }
  0x50   :  { %1466 = vmatprep.subr.bf16.mxu0 %v5669_v22  ;;  %v5696_v49 = vld [vmem:[#allocation4 + $0xcc] ss:$16 sps:$4 sm:$0xff]   ;;  %v123_v51 = vpack.c.bf16 %v112_v46, %v111_v45  ;;  %v5694_v52 = vld [vmem:[#allocation4 + $0xc8] ss:$16 sps:$4 sm:$0xff]   ;;  %v5697_v53 = vld [vmem:[#allocation4 + $0xe0] ss:$16 sps:$4 sm:$0xff]  }
  0x51   :  { %1691 = vmatpush1.bf16.msra.mxu1 %v5664_v25  ;;  %v5702_v54 = vld [vmem:[#allocation4 + $0xec] ss:$16 sps:$4 sm:$0xff]   ;;  %v5705_v55 = vld [vmem:[#allocation4 + $0x104] ss:$16 sps:$4 sm:$0xff]   ;;  %v5700_v58 = vld [vmem:[#allocation4 + $0xe8] ss:$16 sps:$4 sm:$0xff]  }
  0x52   :  { %4917 = vmatmul.mubr.msk.bf16.gmra.mrb[4].mxu0 %vm8009_vm0, %v120_v17  ;;  %1692 = vmatprep.subr.bf16.mxu1 %v5672_v27  ;;  %v113_v56 = vld [vmem:[%s8015_s29 + $0x50] sm:$0xff]  ;;  %v114_v57 = vld [vmem:[%s8015_s29 + $0x58] sm:$0xff]  ;;  %v115_v4 = vld [vmem:[%s8015_s29 + $0x60] sm:$0xff] }
  0x53   :  { %274 = vmatprep.mubr.bf16.mxu0 %v6218_v0  ;;  %1467 = vmatpush1.bf16.msra.mxu0 %v5667_v26  ;;  %v5703_v59 = vld [vmem:[#allocation4 + $0x100] ss:$16 sps:$4 sm:$0xff]   ;;  %v5708_v60 = vld [vmem:[#allocation4 + $0x10c] ss:$16 sps:$4 sm:$0xff]   ;;  %v5711_v61 = vld [vmem:[#allocation4 + $0x124] ss:$16 sps:$4 sm:$0xff]   ;;  %v124_v62 = vpack.c.bf16 %v114_v57, %v113_v56 }
  0x54   :  { %1468 = vmatprep.subr.bf16.mxu0 %v5675_v28  ;;  %4925 = vmatmul.mubr.msk.bf16.gmra.mrb[4].mxu1 %vm8009_vm0, %v120_v17  ;;  %v5706_v63 = vld [vmem:[#allocation4 + $0x108] ss:$16 sps:$4 sm:$0xff]   ;;  %v5709_v1 = vld [vmem:[#allocation4 + $0x120] ss:$16 sps:$4 sm:$0xff]   ;;  %v5714_v2 = vld [vmem:[#allocation4 + $0x12c] ss:$16 sps:$4 sm:$0xff]  }
  0x55   :  { %387 = vmatprep.mubr.bf16.mxu1 %v6218_v0  ;;  %1693 = vmatpush1.bf16.msra.mxu1 %v5670_v30  ;;  %v5717_v3 = vld [vmem:[#allocation4 + $0x144] ss:$16 sps:$4 sm:$0xff]   ;;  %v116_v5 = vld [vmem:[%s8015_s29 + $0x68] sm:$0xff]  ;;  %v5715_v7 = vld [vmem:[#allocation4 + $0x140] ss:$16 sps:$4 sm:$0xff]  }
  0x56   :  { %1694 = vmatprep.subr.bf16.mxu1 %v5678_v32  ;;  %v5712_v6 = vld [vmem:[#allocation4 + $0x128] ss:$16 sps:$4 sm:$0xff]   ;;  %v5720_v8 = vld [vmem:[#allocation4 + $0x14c] ss:$16 sps:$4 sm:$0xff]   ;;  %v5723_v9 = vld [vmem:[#allocation4 + $0x164] ss:$16 sps:$4 sm:$0xff]   ;;  %v125_v10 = vpack.c.bf16 %v116_v5, %v115_v4 }
  0x57   :  { %1469 = vmatpush1.bf16.msra.mxu0 %v5673_v31  ;;  %v5718_v11 = vld [vmem:[#allocation4 + $0x148] ss:$16 sps:$4 sm:$0xff]   ;;  %v5721_v12 = vld [vmem:[#allocation4 + $0x160] ss:$16 sps:$4 sm:$0xff]   ;;  %v5726_v13 = vld [vmem:[#allocation4 + $0x16c] ss:$16 sps:$4 sm:$0xff]  }
  0x58   :  { %1470 = vmatprep.subr.bf16.mxu0 %v5681_v33  ;;  %v5729_v14 = vld [vmem:[#allocation4 + $0x184] ss:$16 sps:$4 sm:$0xff]   ;;  %v118_v16 = vld [vmem:[%s8015_s29 + $0x78] sm:$0xff]  ;;  %v5727_v18 = vld [vmem:[#allocation4 + $0x180] ss:$16 sps:$4 sm:$0xff]  }
  0x59   :  { %1695 = vmatpush1.bf16.msra.mxu1 %v5676_v36  ;;  %v117_v15 = vld [vmem:[%s8015_s29 + $0x70] sm:$0xff]  ;;  %v5724_v17 = vld [vmem:[#allocation4 + $0x168] ss:$16 sps:$4 sm:$0xff]   ;;  %v5732_v19 = vld [vmem:[#allocation4 + $0x18c] ss:$16 sps:$4 sm:$0xff]   ;;  %v137_v36 = vlaneseq }
  0x5a   :  { %4918 = vmatmul.mubr.msk.bf16.gmra.mrb[8].mxu0 %vm8009_vm0, %v121_v29  ;;  %1696 = vmatprep.subr.bf16.mxu1 %v5684_v38  ;;  %v5735_v20 = vld [vmem:[#allocation4 + $0x1a4] ss:$16 sps:$4 sm:$0xff]   ;;  %v126_v21 = vpack.c.bf16 %v118_v16, %v117_v15  ;;  %v5730_v22 = vld [vmem:[#allocation4 + $0x188] ss:$16 sps:$4 sm:$0xff]   ;;  %v5733_v23 = vld [vmem:[#allocation4 + $0x1a0] ss:$16 sps:$4 sm:$0xff]  }
  0x5b   :  { %284 = vmatprep.mubr.bf16.mxu0 %v6218_v0  ;;  %1471 = vmatpush1.bf16.msra.mxu0 %v5679_v37  ;;  %v5738_v24 = vld [vmem:[#allocation4 + $0x1ac] ss:$16 sps:$4 sm:$0xff]   ;;  %v5736_v25 = vld [vmem:[#allocation4 + $0x1a8] ss:$16 sps:$4 sm:$0xff]   ;;  %v5741_v26 = vld [vmem:[#allocation4 + $0x1c4] ss:$16 sps:$4 sm:$0xff]  }
  0x5c   :  { %1472 = vmatprep.subr.bf16.mxu0 %v5687_v39  ;;  %4926 = vmatmul.mubr.msk.bf16.gmra.mrb[8].mxu1 %vm8009_vm0, %v121_v29  ;;  %v5744_v27 = vld [vmem:[#allocation4 + $0x1cc] ss:$16 sps:$4 sm:$0xff]   ;;  %v5739_v28 = vld [vmem:[#allocation4 + $0x1c0] ss:$16 sps:$4 sm:$0xff]   ;;  %v5742_v29 = vld [vmem:[#allocation4 + $0x1c8] ss:$16 sps:$4 sm:$0xff]  }
  0x5d   :  { %397 = vmatprep.mubr.bf16.mxu1 %v6218_v0  ;;  %1697 = vmatpush1.bf16.msra.mxu1 %v5682_v41  ;;  %v5747_v30 = vld [vmem:[#allocation4 + $0x1e4] ss:$16 sps:$4 sm:$0xff]   ;;  %v5750_v31 = vld [vmem:[#allocation4 + $0x1ec] ss:$16 sps:$4 sm:$0xff]   ;;  %v5745_v32 = vld [vmem:[#allocation4 + $0x1e0] ss:$16 sps:$4 sm:$0xff]  }
  0x5e   :  { %1698 = vmatprep.subr.bf16.mxu1 %v5690_v43  ;;  %v5748_v33 = vld [vmem:[#allocation4 + $0x1e8] ss:$16 sps:$4 sm:$0xff]   ;;  %v5753_v34 = vld [vmem:[#allocation4 + $0x204] ss:$16 sps:$4 sm:$0xff]   ;;  %v5756_v35 = vld [vmem:[#allocation4 + $0x20c] ss:$16 sps:$4 sm:$0xff]  }
  0x5f   :  { %1473 = vmatpush1.bf16.msra.mxu0 %v5685_v42  ;;  %v138_v37 = vshrl.u32 %v137_v36, 7  ;;  %v135_v39 = vld [vmem:[%s8016_s30] sm:$0xf] }
  0x60   :  { %1474 = vmatprep.subr.bf16.mxu0 %v5693_v44  ;;  %v5751_v5 = vld [vmem:[#allocation4 + $0x200] ss:$16 sps:$4 sm:$0xff]  }
  0x61   :  { %1699 = vmatpush1.bf16.msra.mxu1 %v5688_v47  ;;  %v6452_v38 = vsub.s32 0, %v138_v37  ;;  %v6466_v46 = vsub.s32 2, %v138_v37  ;;  %v6474_v57 = vsub.s32 3, %v138_v37 }
  0x62   :  { %4919 = vmatmul.mubr.msk.bf16.gmra.mrb[12].mxu0 %vm8009_vm0, %v122_v40  ;;  %1700 = vmatprep.subr.bf16.mxu1 %v5696_v49 }
  0x63   :  { %294 = vmatprep.mubr.bf16.mxu0 %v6218_v0  ;;  %1475 = vmatpush1.bf16.msra.mxu0 %v5691_v48  ;;  %v6460_v41 = vrot.slane %v135_v39, %v6452_v38 }
  0x64   :  { %1476 = vmatprep.subr.bf16.mxu0 %v5699_v50  ;;  %4927 = vmatmul.mubr.msk.bf16.gmra.mrb[12].mxu1 %vm8009_vm0, %v122_v40  ;;  %v6457_v40 = vsub.s32 1, %v138_v37  ;;  %v5766_v37 = vld [vmem:[#allocation4 + $0x248] ss:$16 sps:$4 sm:$0xff]  }
  0x65   :  { %407 = vmatprep.mubr.bf16.mxu1 %v6218_v0  ;;  %1701 = vmatpush1.bf16.msra.mxu1 %v5694_v52 }
  0x66   :  { %1702 = vmatprep.subr.bf16.mxu1 %v5702_v54  ;;  %v6463_v42 = vrot.slane %v135_v39, %v6457_v40 }
  0x67   :  { %1477 = vmatpush1.bf16.msra.mxu0 %v5697_v53 }
  0x68   :  { %1478 = vmatprep.subr.bf16.mxu0 %v5705_v55  ;;  %v6472_v55 = vrot.slane %v135_v39, %v6466_v46 }
  0x69   :  { %1703 = vmatpush1.bf16.msra.mxu1 %v5700_v58 }
  0x6a   :  { %4920 = vmatmul.mubr.msk.bf16.gmra.mrb[16].mxu0 %vm8009_vm0, %v123_v51  ;;  %1704 = vmatprep.subr.bf16.mxu1 %v5708_v60 }
  0x6b   :  { %304 = vmatprep.mubr.bf16.mxu0 %v6218_v0  ;;  %1479 = vmatpush1.bf16.msra.mxu0 %v5703_v59 }
  0x6c   :  { %1480 = vmatprep.subr.bf16.mxu0 %v5711_v61  ;;  %4928 = vmatmul.mubr.msk.bf16.gmra.mrb[16].mxu1 %vm8009_vm0, %v123_v51 }
  0x6d   :  { %417 = vmatprep.mubr.bf16.mxu1 %v6218_v0  ;;  %1705 = vmatpush1.bf16.msra.mxu1 %v5706_v63 }
  0x6e   :  { %1706 = vmatprep.subr.bf16.mxu1 %v5714_v2 }
  0x6f   :  { %1481 = vmatpush1.bf16.msra.mxu0 %v5709_v1 }
  0x70   :  { %1482 = vmatprep.subr.bf16.mxu0 %v5717_v3 }
  0x71   :  { %1707 = vmatpush1.bf16.msra.mxu1 %v5712_v6  ;;  %v5754_v6 = vld [vmem:[#allocation4 + $0x208] ss:$16 sps:$4 sm:$0xff]  }
  0x72   :  { %4921 = vmatmul.mubr.msk.bf16.gmra.mrb[20].mxu0 %vm8009_vm0, %v124_v62  ;;  %1708 = vmatprep.subr.bf16.mxu1 %v5720_v8 }
  0x73   :  { %314 = vmatprep.mubr.bf16.mxu0 %v6218_v0  ;;  %1483 = vmatpush1.bf16.msra.mxu0 %v5715_v7 }
  0x74   :  { %1484 = vmatprep.subr.bf16.mxu0 %v5723_v9  ;;  %4929 = vmatmul.mubr.msk.bf16.gmra.mrb[20].mxu1 %vm8009_vm0, %v124_v62 }
  0x75   :  { %427 = vmatprep.mubr.bf16.mxu1 %v6218_v0  ;;  %1709 = vmatpush1.bf16.msra.mxu1 %v5718_v11  ;;  %v5759_v11 = vld [vmem:[#allocation4 + $0x224] ss:$16 sps:$4 sm:$0xff]  }
  0x76   :  { %1710 = vmatprep.subr.bf16.mxu1 %v5726_v13  ;;  %v6480_v13 = vrot.slane %v135_v39, %v6474_v57  ;;  %v5771_v39 = vld [vmem:[#allocation4 + $0x264] ss:$16 sps:$4 sm:$0xff]  }
  0x77   :  { %1485 = vmatpush1.bf16.msra.mxu0 %v5721_v12  ;;  %v5762_v12 = vld [vmem:[#allocation4 + $0x22c] ss:$16 sps:$4 sm:$0xff]  }
  0x78   :  { %1486 = vmatprep.subr.bf16.mxu0 %v5729_v14 }
  0x79   :  { %1711 = vmatpush1.bf16.msra.mxu1 %v5724_v17 }
  0x7a   :  { %4922 = vmatmul.mubr.msk.bf16.gmra.mrb[24].mxu0 %vm8009_vm0, %v125_v10  ;;  %1712 = vmatprep.subr.bf16.mxu1 %v5732_v19  ;;  %v5760_v19 = vld [vmem:[#allocation4 + $0x228] ss:$16 sps:$4 sm:$0xff]  }
  0x7b   :  { %324 = vmatprep.mubr.bf16.mxu0 %v6218_v0  ;;  %1487 = vmatpush1.bf16.msra.mxu0 %v5727_v18  ;;  %v5757_v18 = vld [vmem:[#allocation4 + $0x220] ss:$16 sps:$4 sm:$0xff]  }
  0x7c   :  { %1488 = vmatprep.subr.bf16.mxu0 %v5735_v20  ;;  %4930 = vmatmul.mubr.msk.bf16.gmra.mrb[24].mxu1 %vm8009_vm0, %v125_v10 }
  0x7d   :  { %437 = vmatprep.mubr.bf16.mxu1 %v6218_v0  ;;  %1713 = vmatpush1.bf16.msra.mxu1 %v5730_v22 }
  0x7e   :  { %1714 = vmatprep.subr.bf16.mxu1 %v5738_v24 }
  0x7f   :  { %1489 = vmatpush1.bf16.msra.mxu0 %v5733_v23 }
  0x80   :  { %1490 = vmatprep.subr.bf16.mxu0 %v5741_v26 }
  0x81   :  { %1715 = vmatpush1.bf16.msra.mxu1 %v5736_v25  ;;  %v5765_v25 = vld [vmem:[#allocation4 + $0x244] ss:$16 sps:$4 sm:$0xff]  }
  0x82   :  { %4923 = vmatmul.mubr.msk.bf16.gmra.mrb[28].mxu0 %vm8009_vm0, %v126_v21  ;;  %1716 = vmatprep.subr.bf16.mxu1 %v5744_v27  ;;  %v5768_v27 = vld [vmem:[#allocation4 + $0x24c] ss:$16 sps:$4 sm:$0xff]  }
  0x83   :  { %1491 = vmatpush1.bf16.msra.mxu0 %v5739_v28 }
  0x84   :  { %4931 = vmatmul.mubr.msk.bf16.gmra.mrb[28].mxu1 %vm8009_vm0, %v126_v21  ;;  %1492 = vmatprep.subr.bf16.mxu0 %v5747_v30  ;;  %v5763_v30 = vld [vmem:[#allocation4 + $0x240] ss:$16 sps:$4 sm:$0xff]  }
  0x85   :  { %1717 = vmatpush1.bf16.msra.mxu1 %v5742_v29 }
  0x86   :  { %1718 = vmatprep.subr.bf16.mxu1 %v5750_v31 }
  0x87   :  { %1493 = vmatpush1.bf16.msra.mxu0 %v5745_v32 }
  0x88   :  { %1575 = vmatprep.subr.bf16.mxu0 %v5753_v34 }
  0x89   :  { %1719 = vmatpush1.bf16.msra.mxu1 %v5748_v33 }
  0x8a   :  { %1801 = vmatprep.subr.bf16.mxu1 %v5756_v35 }
 0x11d   :  { %v256_v43 = vpop.f32.mrb[0].mxu0 }
 0x11e   :  { %v257_v44 = vadd.f32 %v256_v43, %v6460_v41  ;;  %v258_v45 = vpop.f32.mrb[1].mxu0 }
 0x11f   :  { %v259_v47 = vadd.f32 %v258_v45, %v6463_v42  ;;  %v260_v48 = vpop.f32.mrb[2].mxu0  ;;  %v369_v1 = vpop.f32.mrb[0].mxu1 }
 0x120   :  { %v512_v49 = vmul.f32 0.2, %v257_v44  ;;  %v261_v50 = vadd.f32 %v260_v48, %v6460_v41  ;;  %v262_v51 = vpop.f32.mrb[3].mxu0  ;;  %vm448_vm1 = vcmp.gt.f32.partialorder %v257_v44, 0.0  ;;  %v370_v7 = vadd.f32 %v369_v1, %v6472_v55  ;;  %v371_v8 = vpop.f32.mrb[1].mxu1 }
 0x121   :  { %v513_v52 = vmul.f32 0.2, %v259_v47  ;;  %v263_v53 = vadd.f32 %v262_v51, %v6463_v42  ;;  %vm449_vm2 = vcmp.gt.f32.partialorder %v259_v47, 0.0  ;;  %v373_v14 = vpop.f32.mrb[2].mxu1  ;;  %v6485_v28 = vadd.f32 %v371_v8, %v6480_v13 }
 0x122   :  { %vm452_vm3 = vcmp.gt.f32.partialorder %v261_v50, 0.0  ;;  %v516_v54 = vmul.f32 0.2, %v261_v50  ;;  %v576_v58 = vsel %vm448_vm1, %v257_v44, %v512_v49  ;;  %v375_v20 = vpop.f32.mrb[3].mxu1  ;;  %v514_v23 = vmul.f32 0.2, %v370_v7 }
 0x123   :  { %vm453_vm4 = vcmp.gt.f32.partialorder %v263_v53, 0.0  ;;  %v517_v56 = vmul.f32 0.2, %v263_v53  ;;  %v577_v62 = vsel %vm449_vm2, %v259_v47, %v513_v52  ;;  %vm450_vm8 = vcmp.gt.f32.partialorder %v370_v7, 0.0 }
 0x124   :  { %v580_v59 = vsel %vm452_vm3, %v261_v50, %v516_v54  ;;  %v374_v33 = vadd.f32 %v373_v14, %v6472_v55  ;;  %v578_v43 = vsel %vm450_vm8, %v370_v7, %v514_v23  ;;  %v6492_v44 = vadd.f32 %v375_v20, %v6480_v13  ;;  %v5774_v54 = vld [vmem:[#allocation4 + $0x26c] ss:$16 sps:$4 sm:$0xff]  }
 0x125   :  { %v640_v60 = vpack.c.bf16 %v580_v59, %v576_v58  ;;  %v266_v61 = vpop.f32.mrb[4].mxu0  ;;  %v581_v63 = vsel %vm453_vm4, %v263_v53, %v517_v56  ;;  %v515_v56 = vmul.f32 0.2, %v6485_v28  ;;  %vm451_vm14 = vcmp.gt.f32.partialorder %v6485_v28, 0.0 }
 0x126   :  { %v267_v2 = vadd.f32 %v266_v61, %v6460_v41  ;;  %v268_v3 = vpop.f32.mrb[5].mxu0  ;;  %v641_v4 = vpack.c.bf16 %v581_v63, %v577_v62  ;;  %vm454_vm10 = vcmp.gt.f32.partialorder %v374_v33, 0.0  ;;  %v518_v50 = vmul.f32 0.2, %v374_v33  ;;  %v5769_v62 = vld [vmem:[#allocation4 + $0x260] ss:$16 sps:$4 sm:$0xff]  }
 0x127   :  { %v269_v9 = vadd.f32 %v268_v3, %v6463_v42  ;;  %v270_v10 = vpop.f32.mrb[6].mxu0  ;;  %v379_v45 = vpop.f32.mrb[4].mxu1  ;;  %v5772_v63 = vld [vmem:[#allocation4 + $0x268] ss:$16 sps:$4 sm:$0xff]   ;;  %v519_v8 = vmul.f32 0.2, %v6492_v44  ;;  %v579_v20 = vsel %vm451_vm14, %v6485_v28, %v515_v56 }
 0x128   :  { %vm456_vm5 = vcmp.gt.f32.partialorder %v267_v2, 0.0  ;;  %v520_v15 = vmul.f32 0.2, %v267_v2  ;;  %v271_v16 = vadd.f32 %v270_v10, %v6460_v41  ;;  %v272_v17 = vpop.f32.mrb[7].mxu0  ;;  %1494 = vmatprep.mubr.bf16.mxu0 %v641_v4  ;;  %1720 = vmatprep.mubr.bf16.mxu1 %v641_v4  ;;  %v381_v51 = vpop.f32.mrb[5].mxu1  ;;  %v582_v1 = vsel %vm454_vm10, %v374_v33, %v518_v50 }
 0x129   :  { %vm457_vm6 = vcmp.gt.f32.partialorder %v269_v9, 0.0  ;;  %v521_v21 = vmul.f32 0.2, %v269_v9  ;;  %v273_v22 = vadd.f32 %v272_v17, %v6463_v42  ;;  %1495 = vmatmul.mubr.bf16.vlgmr.msra.gmra.mrb[32].mxu0 %v640_v60  ;;  %1721 = vmatmul.mubr.bf16.vlgmr.msra.gmra.mrb[32].mxu1 %v640_v60  ;;  %v6497_v58 = vpop.f32.mrb[6].mxu1  ;;  %v5780_v10 = vld [vmem:[#allocation4 + $0x28c] ss:$16 sps:$4 sm:$0xff]  }
 0x12a   :  { %vm460_vm7 = vcmp.gt.f32.partialorder %v271_v16, 0.0  ;;  %v524_v24 = vmul.f32 0.2, %v271_v16  ;;  %1576 = vmatpush1.bf16.msra.mxu0 %v5751_v5  ;;  %1802 = vmatpush1.bf16.msra.mxu1 %v5754_v6  ;;  %v584_v31 = vsel %vm456_vm5, %v267_v2, %v520_v15  ;;  %v385_v2 = vpop.f32.mrb[7].mxu1  ;;  %v5777_v5 = vld [vmem:[#allocation4 + $0x284] ss:$16 sps:$4 sm:$0xff]   ;;  %v6502_v6 = vpack.c.bf16 %v582_v1, %v578_v43 }
 0x12b   :  { %vm461_vm9 = vcmp.gt.f32.partialorder %v273_v22, 0.0  ;;  %v525_v26 = vmul.f32 0.2, %v273_v22  ;;  %1577 = vmatprep.subr.bf16.mxu0 %v5759_v11  ;;  %1803 = vmatprep.subr.bf16.mxu1 %v5762_v12  ;;  %v585_v29 = vsel %vm457_vm6, %v269_v9, %v521_v21  ;;  %vm455_vm1 = vcmp.gt.f32.partialorder %v6492_v44, 0.0  ;;  %v5783_v28 = vld [vmem:[#allocation4 + $0x2a4] ss:$16 sps:$4 sm:$0xff]  }
 0x12c   :  { %v588_v32 = vsel %vm460_vm7, %v271_v16, %v524_v24  ;;  %v6510_v15 = vadd.f32 %v379_v45, %v6472_v55  ;;  %v6526_v43 = vadd.f32 %v6497_v58, %v6472_v55  ;;  %v5787_v58 = vld [vmem:[#allocation4 + $0x2c0] ss:$16 sps:$4 sm:$0xff]  }
 0x12d   :  { %v276_v34 = vpop.f32.mrb[8].mxu0  ;;  %v589_v35 = vsel %vm461_vm9, %v273_v22, %v525_v26  ;;  %v644_v36 = vpack.c.bf16 %v588_v32, %v584_v31  ;;  %v5778_v26 = vld [vmem:[#allocation4 + $0x288] ss:$16 sps:$4 sm:$0xff]   ;;  %v5786_v32 = vld [vmem:[#allocation4 + $0x2ac] ss:$16 sps:$4 sm:$0xff]  }
 0x12e   :  { %v277_v47 = vadd.f32 %v276_v34, %v6460_v41  ;;  %1578 = vmatpush1.bf16.msra.mxu0 %v5757_v18  ;;  %v278_v48 = vpop.f32.mrb[9].mxu0  ;;  %1804 = vmatpush1.bf16.msra.mxu1 %v5760_v19  ;;  %v645_v49 = vpack.c.bf16 %v589_v35, %v585_v29  ;;  %v6513_v19 = vadd.f32 %v381_v51, %v6480_v13  ;;  %vm458_vm3 = vcmp.gt.f32.partialorder %v6510_v15, 0.0 }
 0x12f   :  { %v279_v52 = vadd.f32 %v278_v48, %v6463_v42  ;;  %v280_v53 = vpop.f32.mrb[10].mxu0  ;;  %1579 = vmatprep.subr.bf16.mxu0 %v5765_v25  ;;  %1805 = vmatprep.subr.bf16.mxu1 %v5768_v27  ;;  %v389_v21 = vpop.f32.mrb[8].mxu1  ;;  %v5775_v25 = vld [vmem:[#allocation4 + $0x280] ss:$16 sps:$4 sm:$0xff]   ;;  %v583_v27 = vsel %vm455_vm1, %v6492_v44, %v519_v8  ;;  %v386_v44 = vadd.f32 %v385_v2, %v6480_v13  ;;  %v5789_v48 = vld [vmem:[#allocation4 + $0x2c4] ss:$16 sps:$4 sm:$0xff]  }
 0x130   :  { %vm464_vm11 = vcmp.gt.f32.partialorder %v277_v47, 0.0  ;;  %v528_v59 = vmul.f32 0.2, %v277_v47  ;;  %v281_v60 = vadd.f32 %v280_v53, %v6460_v41  ;;  %v282_v61 = vpop.f32.mrb[11].mxu0  ;;  %1504 = vmatprep.mubr.bf16.mxu0 %v645_v49  ;;  %1730 = vmatprep.mubr.bf16.mxu1 %v645_v49  ;;  %v391_v29 = vpop.f32.mrb[9].mxu1  ;;  %v6531_v50 = vpack.c.bf16 %v583_v27, %v579_v20 }
 0x131   :  { %vm465_vm12 = vcmp.gt.f32.partialorder %v279_v52, 0.0  ;;  %v529_v3 = vmul.f32 0.2, %v279_v52  ;;  %v283_v4 = vadd.f32 %v282_v61, %v6463_v42  ;;  %1505 = vmatmul.mubr.bf16.gmra.mrb[36].mxu0 %v644_v36  ;;  %1731 = vmatmul.mubr.bf16.gmra.mrb[36].mxu1 %v644_v36  ;;  %v393_v33 = vpop.f32.mrb[10].mxu1  ;;  %v5792_v49 = vld [vmem:[#allocation4 + $0x2cc] ss:$16 sps:$4 sm:$0xff]   ;;  %v6538_v56 = vadd.f32 %v389_v21, %v6472_v55 }
 0x132   :  { %vm468_vm13 = vcmp.gt.f32.partialorder %v281_v60, 0.0  ;;  %v532_v7 = vmul.f32 0.2, %v281_v60  ;;  %1580 = vmatpush1.bf16.msra.mxu0 %v5763_v30  ;;  %1806 = vmatpush1.bf16.msra.mxu1 %v5766_v37  ;;  %v592_v12 = vsel %vm464_vm11, %v277_v47, %v528_v59  ;;  %v5781_v37 = vld [vmem:[#allocation4 + $0x2a0] ss:$16 sps:$4 sm:$0xff]   ;;  %v6533_v51 = vpop.f32.mrb[11].mxu1  ;;  %v6554_v21 = vadd.f32 %v393_v33, %v6472_v55 }
 0x133   :  { %vm469_vm15 = vcmp.gt.f32.partialorder %v283_v4, 0.0  ;;  %v533_v9 = vmul.f32 0.2, %v283_v4  ;;  %1581 = vmatprep.subr.bf16.mxu0 %v5771_v39  ;;  %1807 = vmatprep.subr.bf16.mxu1 %v5774_v54  ;;  %v593_v11 = vsel %vm465_vm12, %v279_v52, %v529_v3  ;;  %v5784_v39 = vld [vmem:[#allocation4 + $0x2a8] ss:$16 sps:$4 sm:$0xff]   ;;  %vm459_vm6 = vcmp.gt.f32.partialorder %v6513_v19, 0.0 }
 0x134   :  { %v596_v14 = vsel %vm468_vm13, %v281_v60, %v532_v7  ;;  %v523_v54 = vmul.f32 0.2, %v6513_v19  ;;  %v5790_v61 = vld [vmem:[#allocation4 + $0x2c8] ss:$16 sps:$4 sm:$0xff]   ;;  %vm463_vm8 = vcmp.gt.f32.partialorder %v386_v44, 0.0  ;;  %v6543_v7 = vadd.f32 %v391_v29, %v6480_v13 }
 0x135   :  { %v286_v16 = vpop.f32.mrb[12].mxu0  ;;  %v597_v17 = vsel %vm469_vm15, %v283_v4, %v533_v9  ;;  %v648_v18 = vpack.c.bf16 %v596_v14, %v592_v12  ;;  %v5795_v4 = vld [vmem:[#allocation4 + $0x2e4] ss:$16 sps:$4 sm:$0xff]   ;;  %v522_v12 = vmul.f32 0.2, %v6510_v15  ;;  %vm462_vm9 = vcmp.gt.f32.partialorder %v6526_v43, 0.0 }
 0x136   :  { %v287_v22 = vadd.f32 %v286_v16, %v6460_v41  ;;  %1582 = vmatpush1.bf16.msra.mxu0 %v5769_v62  ;;  %v288_v23 = vpop.f32.mrb[13].mxu0  ;;  %1808 = vmatpush1.bf16.msra.mxu1 %v5772_v63  ;;  %v649_v24 = vpack.c.bf16 %v597_v17, %v593_v11  ;;  %v527_v62 = vmul.f32 0.2, %v386_v44  ;;  %v6551_v20 = vmul.f32 0.2, %v6538_v56 }
 0x137   :  { %v289_v30 = vadd.f32 %v288_v23, %v6463_v42  ;;  %v290_v31 = vpop.f32.mrb[14].mxu0  ;;  %1583 = vmatprep.subr.bf16.mxu0 %v5777_v5  ;;  %1809 = vmatprep.subr.bf16.mxu1 %v5780_v10  ;;  %v5798_v5 = vld [vmem:[#allocation4 + $0x2ec] ss:$16 sps:$4 sm:$0xff]   ;;  %v399_v8 = vpop.f32.mrb[12].mxu1  ;;  %v5796_v27 = vld [vmem:[#allocation4 + $0x2e8] ss:$16 sps:$4 sm:$0xff]   ;;  %v587_v29 = vsel %vm459_vm6, %v6513_v19, %v523_v54 }
 0x138   :  { %v536_v34 = vmul.f32 0.2, %v287_v22  ;;  %v291_v35 = vadd.f32 %v290_v31, %v6460_v41  ;;  %v292_v36 = vpop.f32.mrb[15].mxu0  ;;  %1514 = vmatprep.mubr.bf16.mxu0 %v649_v24  ;;  %1740 = vmatprep.mubr.bf16.mxu1 %v649_v24  ;;  %vm472_vm2 = vcmp.gt.f32.partialorder %v287_v22, 0.0  ;;  %v401_v14 = vpop.f32.mrb[13].mxu1  ;;  %vm467_vm11 = vcmp.gt.f32.partialorder %v6543_v7, 0.0 }
 0x139   :  { %v537_v45 = vmul.f32 0.2, %v289_v30  ;;  %v293_v47 = vadd.f32 %v292_v36, %v6463_v42  ;;  %1515 = vmatmul.mubr.bf16.gmra.mrb[40].mxu0 %v648_v18  ;;  %1741 = vmatmul.mubr.bf16.gmra.mrb[40].mxu1 %v648_v18  ;;  %vm473_vm4 = vcmp.gt.f32.partialorder %v289_v30, 0.0  ;;  %v526_v18 = vmul.f32 0.2, %v6526_v43 }
 0x13a   :  { %vm476_vm5 = vcmp.gt.f32.partialorder %v291_v35, 0.0  ;;  %v540_v52 = vmul.f32 0.2, %v291_v35  ;;  %1584 = vmatpush1.bf16.msra.mxu0 %v5775_v25  ;;  %1810 = vmatpush1.bf16.msra.mxu1 %v5778_v26  ;;  %v600_v59 = vsel %vm472_vm2, %v287_v22, %v536_v34  ;;  %v6556_v22 = vpop.f32.mrb[14].mxu1  ;;  %v5793_v26 = vld [vmem:[#allocation4 + $0x2e0] ss:$16 sps:$4 sm:$0xff]  }
 0x13b   :  { %vm477_vm7 = vcmp.gt.f32.partialorder %v293_v47, 0.0  ;;  %v541_v53 = vmul.f32 0.2, %v293_v47  ;;  %1585 = vmatprep.subr.bf16.mxu0 %v5783_v28  ;;  %1811 = vmatprep.subr.bf16.mxu1 %v5786_v32  ;;  %v601_v1 = vsel %vm473_vm4, %v289_v30, %v537_v45  ;;  %v591_v30 = vsel %vm463_vm8, %v386_v44, %v527_v62  ;;  %v6563_v31 = vpop.f32.mrb[15].mxu1  ;;  %v5801_v33 = vld [vmem:[#allocation4 + $0x304] ss:$16 sps:$4 sm:$0xff]  }
 0x13c   :  { %v604_v60 = vsel %vm476_vm5, %v291_v35, %v540_v52  ;;  %v6568_v19 = vmul.f32 0.2, %v6543_v7  ;;  %v5804_v36 = vld [vmem:[#allocation4 + $0x30c] ss:$16 sps:$4 sm:$0xff]   ;;  %v5799_v44 = vld [vmem:[#allocation4 + $0x300] ss:$16 sps:$4 sm:$0xff]  }
 0x13d   :  { %v296_v63 = vpop.f32.mrb[16].mxu0  ;;  %v605_v2 = vsel %vm477_vm7, %v293_v47, %v541_v53  ;;  %v652_v3 = vpack.c.bf16 %v604_v60, %v600_v59  ;;  %v5807_v59 = vld [vmem:[#allocation4 + $0x324] ss:$16 sps:$4 sm:$0xff]   ;;  %vm466_vm15 = vcmp.gt.f32.partialorder %v6538_v56, 0.0  ;;  %v590_v60 = vsel %vm462_vm9, %v6526_v43, %v526_v18 }
 0x13e   :  { %v297_v9 = vadd.f32 %v296_v63, %v6460_v41  ;;  %1586 = vmatpush1.bf16.msra.mxu0 %v5781_v37  ;;  %v298_v10 = vpop.f32.mrb[17].mxu0  ;;  %1812 = vmatpush1.bf16.msra.mxu1 %v5784_v39  ;;  %v653_v11 = vpack.c.bf16 %v605_v2, %v601_v1  ;;  %v6572_v37 = vadd.f32 %v6533_v51, %v6480_v13  ;;  %v5802_v51 = vld [vmem:[#allocation4 + $0x308] ss:$16 sps:$4 sm:$0xff]   ;;  %v5810_v1 = vld [vmem:[#allocation4 + $0x32c] ss:$16 sps:$4 sm:$0xff]   ;;  %vm470_vm1 = vcmp.gt.f32.partialorder %v6554_v21, 0.0 }
 0x13f   :  { %v299_v16 = vadd.f32 %v298_v10, %v6463_v42  ;;  %v300_v17 = vpop.f32.mrb[18].mxu0  ;;  %1587 = vmatprep.subr.bf16.mxu0 %v5789_v48  ;;  %1813 = vmatprep.subr.bf16.mxu1 %v5792_v49  ;;  %v6574_v39 = vpack.c.bf16 %v591_v30, %v587_v29  ;;  %v6578_v48 = vadd.f32 %v399_v8, %v6472_v55  ;;  %v6590_v2 = vmul.f32 0.2, %v6554_v21 }
 0x140   :  { %v544_v23 = vmul.f32 0.2, %v297_v9  ;;  %v301_v24 = vadd.f32 %v300_v17, %v6460_v41  ;;  %v302_v25 = vpop.f32.mrb[19].mxu0  ;;  %1524 = vmatprep.mubr.bf16.mxu0 %v653_v11  ;;  %1750 = vmatprep.mubr.bf16.mxu1 %v653_v11  ;;  %vm480_vm10 = vcmp.gt.f32.partialorder %v297_v9, 0.0  ;;  %v586_v49 = vsel %vm458_vm3, %v6510_v15, %v522_v12  ;;  %v5808_v17 = vld [vmem:[#allocation4 + $0x328] ss:$16 sps:$4 sm:$0xff]  }
 0x141   :  { %v545_v28 = vmul.f32 0.2, %v299_v16  ;;  %v303_v32 = vadd.f32 %v302_v25, %v6463_v42  ;;  %1525 = vmatmul.mubr.bf16.gmra.mrb[44].mxu0 %v652_v3  ;;  %1751 = vmatmul.mubr.bf16.gmra.mrb[44].mxu1 %v652_v3  ;;  %vm481_vm12 = vcmp.gt.f32.partialorder %v299_v16, 0.0  ;;  %v6593_v3 = vadd.f32 %v401_v14, %v6480_v13 }
 0x142   :  { %vm484_vm13 = vcmp.gt.f32.partialorder %v301_v24, 0.0  ;;  %v548_v34 = vmul.f32 0.2, %v301_v24  ;;  %1588 = vmatpush1.bf16.msra.mxu0 %v5787_v58  ;;  %1814 = vmatpush1.bf16.msra.mxu1 %v5790_v61  ;;  %v608_v45 = vsel %vm480_vm10, %v297_v9, %v544_v23  ;;  %v409_v61 = vpop.f32.mrb[16].mxu1  ;;  %vm471_vm2 = vcmp.gt.f32.partialorder %v6572_v37, 0.0 }
 0x143   :  { %vm485_vm14 = vcmp.gt.f32.partialorder %v303_v32, 0.0  ;;  %v549_v35 = vmul.f32 0.2, %v303_v32  ;;  %1589 = vmatprep.subr.bf16.mxu0 %v5795_v4  ;;  %1815 = vmatprep.subr.bf16.mxu1 %v5798_v5  ;;  %v609_v53 = vsel %vm481_vm12, %v299_v16, %v545_v28  ;;  %v411_v4 = vpop.f32.mrb[17].mxu1  ;;  %v535_v43 = vmul.f32 0.2, %v6572_v37 }
 0x144   :  { %v612_v47 = vsel %vm484_vm13, %v301_v24, %v548_v34  ;;  %v6599_v9 = vpack.c.bf16 %v590_v60, %v586_v49  ;;  %v6601_v10 = vpop.f32.mrb[18].mxu1  ;;  %v5805_v16 = vld [vmem:[#allocation4 + $0x320] ss:$16 sps:$4 sm:$0xff]   ;;  %v6605_v18 = vmul.f32 0.2, %v6578_v48  ;;  %v6615_v30 = vadd.f32 %v6556_v22, %v6472_v55 }
 0x145   :  { %v306_v52 = vpop.f32.mrb[20].mxu0  ;;  %v613_v54 = vsel %vm485_vm14, %v303_v32, %v549_v35  ;;  %v656_v58 = vpack.c.bf16 %v612_v47, %v608_v45  ;;  %v6607_v23 = vpop.f32.mrb[19].mxu1  ;;  %v6611_v29 = vmul.f32 0.2, %v6593_v3  ;;  %v5816_v32 = vld [vmem:[#allocation4 + $0x34c] ss:$16 sps:$4 sm:$0xff]   ;;  %v595_v34 = vsel %vm467_vm11, %v6543_v7, %v6568_v19 }
 0x146   :  { %v307_v62 = vadd.f32 %v306_v52, %v6460_v41  ;;  %1590 = vmatpush1.bf16.msra.mxu0 %v5793_v26  ;;  %v308_v63 = vpop.f32.mrb[21].mxu0  ;;  %1816 = vmatpush1.bf16.msra.mxu1 %v5796_v27  ;;  %v657_v15 = vpack.c.bf16 %v613_v54, %v609_v53  ;;  %v5813_v26 = vld [vmem:[#allocation4 + $0x344] ss:$16 sps:$4 sm:$0xff]   ;;  %v599_v45 = vsel %vm471_vm2, %v6572_v37, %v535_v43  ;;  %v5814_v52 = vld [vmem:[#allocation4 + $0x348] ss:$16 sps:$4 sm:$0xff]   ;;  %vm475_vm7 = vcmp.gt.f32.partialorder %v6593_v3, 0.0 }
 0x147   :  { %v309_v5 = vadd.f32 %v308_v63, %v6463_v42  ;;  %v310_v8 = vpop.f32.mrb[22].mxu0  ;;  %1591 = vmatprep.subr.bf16.mxu0 %v5801_v33  ;;  %1817 = vmatprep.subr.bf16.mxu1 %v5804_v36  ;;  %v6619_v33 = vadd.f32 %v6563_v31, %v6480_v13  ;;  %v5811_v36 = vld [vmem:[#allocation4 + $0x340] ss:$16 sps:$4 sm:$0xff]   ;;  %v5819_v53 = vld [vmem:[#allocation4 + $0x364] ss:$16 sps:$4 sm:$0xff]   ;;  %v6631_v54 = vpack.c.bf16 %v599_v45, %v595_v34  ;;  %v6636_v19 = vpop.f32.mrb[20].mxu1 }
 0x148   :  { %v552_v11 = vmul.f32 0.2, %v307_v62  ;;  %v311_v12 = vadd.f32 %v310_v8, %v6460_v41  ;;  %v312_v14 = vpop.f32.mrb[23].mxu0  ;;  %1534 = vmatprep.mubr.bf16.mxu0 %v657_v15  ;;  %1760 = vmatprep.mubr.bf16.mxu1 %v657_v15  ;;  %vm488_vm3 = vcmp.gt.f32.partialorder %v307_v62, 0.0  ;;  %v6634_v7 = vadd.f32 %v409_v61, %v6472_v55  ;;  %v5822_v60 = vld [vmem:[#allocation4 + $0x36c] ss:$16 sps:$4 sm:$0xff]  }
 0x149   :  { %vm489_vm4 = vcmp.gt.f32.partialorder %v309_v5, 0.0  ;;  %v553_v24 = vmul.f32 0.2, %v309_v5  ;;  %v313_v25 = vadd.f32 %v312_v14, %v6463_v42  ;;  %1535 = vmatmul.mubr.bf16.gmra.mrb[48].mxu0 %v656_v58  ;;  %1761 = vmatmul.mubr.bf16.gmra.mrb[48].mxu1 %v656_v58  ;;  %v6640_v37 = vmul.f32 0.2, %v6615_v30  ;;  %v6645_v63 = vpop.f32.mrb[21].mxu1 }
 0x14a   :  { %vm492_vm5 = vcmp.gt.f32.partialorder %v311_v12, 0.0  ;;  %v556_v27 = vmul.f32 0.2, %v311_v12  ;;  %1592 = vmatpush1.bf16.msra.mxu0 %v5799_v44  ;;  %1818 = vmatpush1.bf16.msra.mxu1 %v5802_v51  ;;  %v616_v22 = vsel %vm488_vm3, %v307_v62, %v552_v11  ;;  %v6643_v62 = vadd.f32 %v411_v4, %v6480_v13  ;;  %v5817_v11 = vld [vmem:[#allocation4 + $0x360] ss:$16 sps:$4 sm:$0xff]  }
 0x14b   :  { %vm493_vm6 = vcmp.gt.f32.partialorder %v313_v25, 0.0  ;;  %v557_v28 = vmul.f32 0.2, %v313_v25  ;;  %1593 = vmatprep.subr.bf16.mxu0 %v5807_v59  ;;  %1819 = vmatprep.subr.bf16.mxu1 %v5810_v1  ;;  %v617_v35 = vsel %vm489_vm4, %v309_v5, %v553_v24  ;;  %vm479_vm8 = vcmp.gt.f32.partialorder %v6619_v33, 0.0  ;;  %v6651_v5 = vpop.f32.mrb[22].mxu1 }
 0x14c   :  { %v620_v44 = vsel %vm492_vm5, %v311_v12, %v556_v27  ;;  %v543_v1 = vmul.f32 0.2, %v6619_v33  ;;  %v5820_v12 = vld [vmem:[#allocation4 + $0x368] ss:$16 sps:$4 sm:$0xff]   ;;  %vm474_vm10 = vcmp.gt.f32.partialorder %v6578_v48, 0.0  ;;  %v594_v14 = vsel %vm466_vm15, %v6538_v56, %v6551_v20 }
 0x14d   :  { %v316_v47 = vpop.f32.mrb[24].mxu0  ;;  %v621_v49 = vsel %vm493_vm6, %v313_v25, %v557_v28  ;;  %v660_v31 = vpack.c.bf16 %v620_v44, %v616_v22  ;;  %v5825_v25 = vld [vmem:[#allocation4 + $0x384] ss:$16 sps:$4 sm:$0xff]   ;;  %vm478_vm12 = vcmp.gt.f32.partialorder %v6615_v30, 0.0  ;;  %v6667_v56 = vmul.f32 0.2, %v6643_v62 }
 0x14e   :  { %v317_v58 = vadd.f32 %v316_v47, %v6460_v41  ;;  %1594 = vmatpush1.bf16.msra.mxu0 %v5805_v16  ;;  %v318_v51 = vpop.f32.mrb[25].mxu0  ;;  %1820 = vmatpush1.bf16.msra.mxu1 %v5808_v17  ;;  %v661_v59 = vpack.c.bf16 %v621_v49, %v617_v35  ;;  %v6659_v16 = vpop.f32.mrb[23].mxu1  ;;  %v598_v20 = vsel %vm470_vm1, %v6554_v21, %v6590_v2  ;;  %v5828_v34 = vld [vmem:[#allocation4 + $0x38c] ss:$16 sps:$4 sm:$0xff]   ;;  %vm483_vm15 = vcmp.gt.f32.partialorder %v6643_v62, 0.0 }
 0x14f   :  { %v319_v61 = vadd.f32 %v318_v51, %v6463_v42  ;;  %v320_v15 = vpop.f32.mrb[26].mxu0  ;;  %1595 = vmatprep.subr.bf16.mxu0 %v5813_v26  ;;  %1821 = vmatprep.subr.bf16.mxu1 %v5816_v32  ;;  %v6664_v26 = vmul.f32 0.2, %v6634_v7  ;;  %v6675_v35 = vpack.c.bf16 %v598_v20, %v594_v14  ;;  %v6679_v44 = vadd.f32 %v6601_v10, %v6472_v55 }
 0x150   :  { %vm496_vm9 = vcmp.gt.f32.partialorder %v317_v58, 0.0  ;;  %v560_v8 = vmul.f32 0.2, %v317_v58  ;;  %v321_v4 = vadd.f32 %v320_v15, %v6460_v41  ;;  %v322_v43 = vpop.f32.mrb[27].mxu0  ;;  %1544 = vmatprep.mubr.bf16.mxu0 %v661_v59  ;;  %1770 = vmatprep.mubr.bf16.mxu1 %v661_v59  ;;  %v6683_v21 = vadd.f32 %v6607_v23, %v6480_v13 }
 0x151   :  { %vm497_vm11 = vcmp.gt.f32.partialorder %v319_v61, 0.0  ;;  %v561_v17 = vmul.f32 0.2, %v319_v61  ;;  %v323_v24 = vadd.f32 %v322_v43, %v6463_v42  ;;  %1545 = vmatmul.mubr.bf16.gmra.mrb[52].mxu0 %v660_v31  ;;  %1771 = vmatmul.mubr.bf16.gmra.mrb[52].mxu1 %v660_v31  ;;  %v603_v2 = vsel %vm475_vm7, %v6593_v3, %v6611_v29  ;;  %v5834_v3 = vld [vmem:[#allocation4 + $0x3ac] ss:$16 sps:$4 sm:$0xff]  }
 0x152   :  { %vm500_vm13 = vcmp.gt.f32.partialorder %v321_v4, 0.0  ;;  %v564_v27 = vmul.f32 0.2, %v321_v4  ;;  %1596 = vmatpush1.bf16.msra.mxu0 %v5811_v36  ;;  %1822 = vmatpush1.bf16.msra.mxu1 %v5814_v52  ;;  %v624_v32 = vsel %vm496_vm9, %v317_v58, %v560_v8  ;;  %v5823_v36 = vld [vmem:[#allocation4 + $0x380] ss:$16 sps:$4 sm:$0xff]   ;;  %v607_v10 = vsel %vm479_vm8, %v6619_v33, %v543_v1  ;;  %v6693_v58 = vpop.f32.mrb[24].mxu1 }
 0x153   :  { %vm501_vm14 = vcmp.gt.f32.partialorder %v323_v24, 0.0  ;;  %v565_v28 = vmul.f32 0.2, %v323_v24  ;;  %1597 = vmatprep.subr.bf16.mxu0 %v5819_v53  ;;  %1823 = vmatprep.subr.bf16.mxu1 %v5822_v60  ;;  %v625_v47 = vsel %vm497_vm11, %v319_v61, %v561_v17  ;;  %v5826_v52 = vld [vmem:[#allocation4 + $0x388] ss:$16 sps:$4 sm:$0xff]   ;;  %vm482_vm1 = vcmp.gt.f32.partialorder %v6634_v7, 0.0 }
 0x154   :  { %v628_v22 = vsel %vm500_vm13, %v321_v4, %v564_v27  ;;  %v5831_v53 = vld [vmem:[#allocation4 + $0x3a4] ss:$16 sps:$4 sm:$0xff]   ;;  %vm486_vm2 = vcmp.gt.f32.partialorder %v6679_v44, 0.0  ;;  %v6700_v29 = vadd.f32 %v6636_v19, %v6472_v55  ;;  %v6702_v60 = vpop.f32.mrb[25].mxu1  ;;  %v6706_v15 = vmul.f32 0.2, %v6679_v44 }
 0x155   :  { %v326_v45 = vpop.f32.mrb[28].mxu0  ;;  %v629_v49 = vsel %vm501_vm14, %v323_v24, %v565_v28  ;;  %v664_v31 = vpack.c.bf16 %v628_v22, %v624_v32  ;;  %vm487_vm3 = vcmp.gt.f32.partialorder %v6683_v21, 0.0  ;;  %v6709_v1 = vpack.c.bf16 %v607_v10, %v603_v2  ;;  %v6711_v8 = vpop.f32.mrb[26].mxu1  ;;  %v5837_v27 = vld [vmem:[#allocation4 + $0x3c4] ss:$16 sps:$4 sm:$0xff]  }
 0x156   :  { %v327_v23 = vadd.f32 %v326_v45, %v6460_v41  ;;  %1598 = vmatpush1.bf16.msra.mxu0 %v5817_v11  ;;  %v328_v51 = vpop.f32.mrb[29].mxu0  ;;  %1824 = vmatpush1.bf16.msra.mxu1 %v5820_v12  ;;  %v665_v59 = vpack.c.bf16 %v629_v49, %v625_v47  ;;  %v5829_v11 = vld [vmem:[#allocation4 + $0x3a0] ss:$16 sps:$4 sm:$0xff]   ;;  %v5832_v12 = vld [vmem:[#allocation4 + $0x3a8] ss:$16 sps:$4 sm:$0xff]   ;;  %v6715_v17 = vpop.f32.mrb[27].mxu1  ;;  %v422_v28 = vadd.f32 %v6645_v63, %v6480_v13 }
 0x157   :  { %v329_v33 = vadd.f32 %v328_v51, %v6463_v42  ;;  %v330_v61 = vpop.f32.mrb[30].mxu0  ;;  %1599 = vmatprep.subr.bf16.mxu0 %v5825_v25  ;;  %1825 = vmatprep.subr.bf16.mxu1 %v5828_v34  ;;  %v551_v14 = vmul.f32 0.2, %v6683_v21  ;;  %vm490_vm7 = vcmp.gt.f32.partialorder %v6700_v29, 0.0  ;;  %v6722_v34 = vmul.f32 0.2, %v6700_v29 }
 0x158   :  { %v568_v4 = vmul.f32 0.2, %v327_v23  ;;  %v331_v19 = vadd.f32 %v330_v61, %v6460_v41  ;;  %v332_v43 = vpop.f32.mrb[31].mxu0  ;;  %1554 = vmatprep.mubr.bf16.mxu0 %v665_v59  ;;  %1780 = vmatprep.mubr.bf16.mxu1 %v665_v59  ;;  %vm504_vm4 = vcmp.gt.f32.partialorder %v327_v23, 0.0  ;;  %v5840_v41 = vld [vmem:[#allocation4 + $0x3cc] ss:$16 sps:$4 sm:$0xff]   ;;  %v606_v63 = vsel %vm478_vm12, %v6615_v30, %v6640_v37 }
 0x159   :  { %vm505_vm5 = vcmp.gt.f32.partialorder %v329_v33, 0.0  ;;  %v569_v24 = vmul.f32 0.2, %v329_v33  ;;  %v333_v25 = vadd.f32 %v332_v43, %v6463_v42  ;;  %1555 = vmatmul.mubr.bf16.gmra.mrb[56].mxu0 %v664_v31  ;;  %1781 = vmatmul.mubr.bf16.gmra.mrb[56].mxu1 %v664_v31  ;;  %v602_v42 = vsel %vm474_vm10, %v6578_v48, %v6605_v18  ;;  %v5835_v18 = vld [vmem:[#allocation4 + $0x3c0] ss:$16 sps:$4 sm:$0xff]  }
 0x15a   :  { %vm508_vm6 = vcmp.gt.f32.partialorder %v331_v19, 0.0  ;;  %v572_v20 = vmul.f32 0.2, %v331_v19  ;;  %1600 = vmatpush1.bf16.msra.mxu0 %v5823_v36  ;;  %1826 = vmatpush1.bf16.msra.mxu1 %v5826_v52  ;;  %v632_v22 = vsel %vm504_vm4, %v327_v23, %v568_v4  ;;  %v6734_v49 = vpack.c.bf16 %v606_v63, %v602_v42  ;;  %v439_v52 = vpop.f32.mrb[28].mxu1  ;;  %v5841_v4 = vld [vmem:[#allocation4 + $0x3e0] ss:$16 sps:$4 sm:$0xff]  }
 0x15b   :  { %vm509_vm8 = vcmp.gt.f32.partialorder %v333_v25, 0.0  ;;  %v573_v32 = vmul.f32 0.2, %v333_v25  ;;  %1601 = vmatprep.subr.bf16.mxu0 %v5831_v53  ;;  %1827 = vmatprep.subr.bf16.mxu1 %v5834_v3  ;;  %v633_v36 = vsel %vm505_vm5, %v329_v33, %v569_v24  ;;  %v6738_v31 = vadd.f32 %v6651_v5, %v6472_v55  ;;  %v5838_v53 = vld [vmem:[#allocation4 + $0x3c8] ss:$16 sps:$4 sm:$0xff]   ;;  %v441_v37 = vpop.f32.mrb[29].mxu1 }
 0x15c   :  { %v636_v2 = vsel %vm508_vm6, %v331_v19, %v572_v20  ;;  %vm491_vm9 = vcmp.gt.f32.partialorder %v422_v28, 0.0  ;;  %v426_v10 = vadd.f32 %v6659_v16, %v6480_v13  ;;  %v611_v30 = vsel %vm483_vm15, %v6643_v62, %v6667_v56  ;;  %v5843_v5 = vld [vmem:[#allocation4 + $0x3e4] ss:$16 sps:$4 sm:$0xff]   ;;  %v443_v16 = vpop.f32.mrb[30].mxu1  ;;  %v5846_v3 = vld [vmem:[#allocation4 + $0x3ec] ss:$16 sps:$4 sm:$0xff]  }
 0x15d   :  { %v637_v45 = vsel %vm509_vm8, %v333_v25, %v573_v32  ;;  %v668_v47 = vpack.c.bf16 %v636_v2, %v632_v22  ;;  %v555_v23 = vmul.f32 0.2, %v422_v28  ;;  %vm494_vm10 = vcmp.gt.f32.partialorder %v6738_v31, 0.0  ;;  %v445_v61 = vpop.f32.mrb[31].mxu1 }
 0x15e   :  { %1602 = vmatpush1.bf16.msra.mxu0 %v5829_v11  ;;  %1828 = vmatpush1.bf16.msra.mxu1 %v5832_v12  ;;  %v669_v48 = vpack.c.bf16 %v637_v45, %v633_v36  ;;  %v615_v51 = vsel %vm487_vm3, %v6683_v21, %v551_v14  ;;  %v6752_v59 = vadd.f32 %v6693_v58, %v6472_v55  ;;  %vm495_vm11 = vcmp.gt.f32.partialorder %v426_v10, 0.0  ;;  %v5847_v14 = vld [vmem:[%s7992_s6 + $0x40] sm:$0xff]  }
 0x15f   :  { %1603 = vmatprep.subr.bf16.mxu0 %v5837_v27  ;;  %1829 = vmatprep.subr.bf16.mxu1 %v5840_v41  ;;  %v559_v62 = vmul.f32 0.2, %v426_v10  ;;  %v6754_v56 = vpack.c.bf16 %v615_v51, %v611_v30  ;;  %v432_v33 = vadd.f32 %v6702_v60, %v6480_v13  ;;  %v558_v21 = vmul.f32 0.2, %v6738_v31  ;;  %v5844_v60 = vld [vmem:[#allocation4 + $0x3e8] ss:$16 sps:$4 sm:$0xff]  }
 0x160   :  { %1564 = vmatprep.mubr.bf16.mxu0 %v669_v48  ;;  %1790 = vmatprep.mubr.bf16.mxu1 %v669_v48  ;;  %vm498_vm12 = vcmp.gt.f32.partialorder %v6752_v59, 0.0  ;;  %v610_v58 = vsel %vm482_vm1, %v6634_v7, %v6664_v26  ;;  %v614_v19 = vsel %vm486_vm2, %v6679_v44, %v6706_v15  ;;  %v562_v43 = vmul.f32 0.2, %v6752_v59  ;;  %v5855_v51 = vld [vmem:[%s7992_s6 + $0x60] sm:$0xff]  }
 0x161   :  { %1565 = vmatmul.mubr.bf16.gmra.mrb[60].mxu0 %v668_v47  ;;  %1791 = vmatmul.mubr.bf16.gmra.mrb[60].mxu1 %v668_v47  ;;  %vm499_vm13 = vcmp.gt.f32.partialorder %v432_v33, 0.0  ;;  %v6769_v11 = vpack.c.bf16 %v614_v19, %v610_v58  ;;  %v434_v12 = vadd.f32 %v6711_v8, %v6472_v55  ;;  %v563_v7 = vmul.f32 0.2, %v432_v33 }
 0x162   :  { %1604 = vmatpush1.bf16.msra.mxu0 %v5835_v18  ;;  %1830 = vmatpush1.bf16.msra.mxu1 %v5838_v53  ;;  %v436_v26 = vadd.f32 %v6715_v17, %v6480_v13  ;;  %v619_v44 = vsel %vm491_vm9, %v422_v28, %v555_v23  ;;  %v623_v15 = vsel %vm495_vm11, %v426_v10, %v559_v62  ;;  %v5850_v53 = vld [vmem:[%s7992_s6 + $0x8] sm:$0xff]   ;;  %v5854_v23 = vld [vmem:[%s7992_s6 + $0x18] sm:$0xff]  }
 0x163   :  { %1607 = vmatprep.mubr.bf16.mxu0 %v6531_v50  ;;  %1833 = vmatprep.mubr.bf16.mxu1 %v6531_v50  ;;  %vm502_vm14 = vcmp.gt.f32.partialorder %v434_v12, 0.0  ;;  %v566_v8 = vmul.f32 0.2, %v434_v12  ;;  %v6782_v24 = vpack.c.bf16 %v623_v15, %v619_v44  ;;  %v440_v50 = vadd.f32 %v439_v52, %v6472_v55  ;;  %v5864_v62 = vld [vmem:[%s7994_s8 + $0x8] sm:$0xff]  }
 0x164   :  { %1605 = vmatprep.subr.bf16.mxu0 %v5843_v5  ;;  %1831 = vmatprep.subr.bf16.mxu1 %v5846_v3  ;;  %vm503_vm15 = vcmp.gt.f32.partialorder %v436_v26, 0.0  ;;  %v567_v25 = vmul.f32 0.2, %v436_v26  ;;  %v442_v17 = vadd.f32 %v441_v37, %v6480_v13  ;;  %v618_v27 = vsel %vm490_vm7, %v6700_v29, %v6722_v34  ;;  %v5848_v29 = vld [vmem:[%s7992_s6] sm:$0xff]   ;;  %v5852_v37 = vld [vmem:[%s7992_s6 + $0x10] sm:$0xff]   ;;  %v5853_v5 = vld [vmem:[%s7992_s6 + $0x58] sm:$0xff]  }
 0x165   :  { %vm506_vm1 = vcmp.gt.f32.partialorder %v440_v50, 0.0  ;;  %v570_v20 = vmul.f32 0.2, %v440_v50  ;;  %v622_v41 = vsel %vm494_vm10, %v6738_v31, %v558_v21  ;;  %v444_v28 = vadd.f32 %v443_v16, %v6472_v55  ;;  %v5849_v55 = vld [vmem:[%s7992_s6 + $0x48] sm:$0xff]   ;;  %v5859_v16 = vld [vmem:[%s7992_s6 + $0x70] sm:$0xff]  }
 0x166   :  { %1606 = vmatpush1.bf16.msra.mxu0 %v5841_v4  ;;  %1832 = vmatpush1.bf16.msra.mxu1 %v5844_v60  ;;  %vm507_vm2 = vcmp.gt.f32.partialorder %v442_v17, 0.0  ;;  %v571_v32 = vmul.f32 0.2, %v442_v17  ;;  %v6794_v42 = vpack.c.bf16 %v622_v41, %v618_v27  ;;  %v446_v36 = vadd.f32 %v445_v61, %v6480_v13  ;;  %v5860_v3 = vld [vmem:[%s7992_s6 + $0x30] sm:$0xff]   ;;  %v5867_v61 = vld [vmem:[%s7994_s8 + $0x20] sm:$0xff]   ;;  %v5868_v4 = vld [vmem:[%s7994_s8 + $0x28] sm:$0xff]  }
 0x167   :  { %5240 = vmatprep.subr.bf16.mxu0 %v5847_v14  ;;  %vm510_vm3 = vcmp.gt.f32.partialorder %v444_v28, 0.0  ;;  %v574_v34 = vmul.f32 0.2, %v444_v28  ;;  %v627_v22 = vsel %vm499_vm13, %v432_v33, %v563_v7  ;;  %v631_v2 = vsel %vm503_vm15, %v436_v26, %v567_v25  ;;  %v5866_v33 = vld [vmem:[%s7994_s8 + $0x18] sm:$0xff]   ;;  %v800_v21 = vld [vmem:[%s7991_s5] sm:$0xf] }
 0x168   :  { %vm511_vm4 = vcmp.gt.f32.partialorder %v446_v36, 0.0  ;;  %v575_v13 = vmul.f32 0.2, %v446_v36  ;;  %v667_v63 = vpack.c.bf16 %v631_v2, %v627_v22  ;;  %v626_v45 = vsel %vm498_vm12, %v6752_v59, %v562_v43  ;;  %v5856_v59 = vld [vmem:[%s7992_s6 + $0x20] sm:$0xff]  }
 0x169   :  { %1608 = vmatmul.mubr.bf16.vlgmr.msra.gmra.mrb[32].mxu0 %v6502_v6  ;;  %1834 = vmatmul.mubr.bf16.vlgmr.msra.gmra.mrb[32].mxu1 %v6502_v6  ;;  %v630_v47 = vsel %vm502_vm14, %v434_v12, %v566_v8  ;;  %v635_v31 = vsel %vm507_vm2, %v442_v17, %v571_v32  ;;  %v634_v52 = vsel %vm506_vm1, %v440_v50, %v570_v20 }
 0x16a   :  { %1617 = vmatprep.mubr.bf16.mxu0 %v6574_v39  ;;  %1843 = vmatprep.mubr.bf16.mxu1 %v6574_v39  ;;  %v666_v48 = vpack.c.bf16 %v630_v47, %v626_v45  ;;  %v639_v18 = vsel %vm511_vm4, %v446_v36, %v575_v13  ;;  %v638_v6 = vsel %vm510_vm3, %v444_v28, %v574_v34  ;;  %v5851_v39 = vld [vmem:[%s7992_s6 + $0x50] sm:$0xff]  }
 0x16b   :  { %5241 = vmatpush3.bf16.msra.mxu0 %v5848_v29  ;;  %v671_v10 = vpack.c.bf16 %v639_v18, %v635_v31  ;;  %v670_v30 = vpack.c.bf16 %v638_v6, %v634_v52  ;;  %v6895_v58 = vrot.slane %v800_v21, %v6452_v38  ;;  %v6898_v19 = vrot.slane %v800_v21, %v6457_v40 }
 0x16c   :  { %5242 = vmatprep.subr.bf16.mxu0 %v5849_v55  ;;  %v6901_v60 = vrot.slane %v800_v21, %v6466_v46  ;;  %v6904_v12 = vrot.slane %v800_v21, %v6474_v57 }
 0x16f   :  { %5243 = vmatpush3.bf16.msra.mxu0 %v5850_v53 }
 0x170   :  { %5244 = vmatprep.subr.bf16.mxu0 %v5851_v39 }
 0x171   :  { %1618 = vmatmul.mubr.bf16.gmra.mrb[36].mxu0 %v6599_v9  ;;  %1844 = vmatmul.mubr.bf16.gmra.mrb[36].mxu1 %v6599_v9  ;;  %v5857_v9 = vld [vmem:[%s7992_s6 + $0x68] sm:$0xff]  }
 0x172   :  { %1627 = vmatprep.mubr.bf16.mxu0 %v6631_v54  ;;  %1853 = vmatprep.mubr.bf16.mxu1 %v6631_v54  ;;  %v5858_v54 = vld [vmem:[%s7992_s6 + $0x28] sm:$0xff]  }
 0x173   :  { %5245 = vmatpush3.bf16.msra.mxu0 %v5852_v37 }
 0x174   :  { %5246 = vmatprep.subr.bf16.mxu0 %v5853_v5 }
 0x177   :  { %5247 = vmatpush3.bf16.msra.mxu0 %v5854_v23 }
 0x178   :  { %5248 = vmatprep.subr.bf16.mxu0 %v5855_v51 }
 0x179   :  { %1628 = vmatmul.mubr.bf16.gmra.mrb[40].mxu0 %v6675_v35  ;;  %1854 = vmatmul.mubr.bf16.gmra.mrb[40].mxu1 %v6675_v35  ;;  %v5861_v35 = vld [vmem:[%s7992_s6 + $0x78] sm:$0xff]  }
 0x17a   :  { %1637 = vmatprep.mubr.bf16.mxu0 %v6709_v1  ;;  %1863 = vmatprep.mubr.bf16.mxu1 %v6709_v1  ;;  %v5862_v1 = vld [vmem:[%s7992_s6 + $0x38] sm:$0xff]  }
 0x17b   :  { %5249 = vmatpush3.bf16.msra.mxu0 %v5856_v59 }
 0x17c   :  { %5250 = vmatprep.subr.bf16.mxu0 %v5857_v9 }
 0x17f   :  { %5251 = vmatpush3.bf16.msra.mxu0 %v5858_v54 }
 0x180   :  { %5252 = vmatprep.subr.bf16.mxu0 %v5859_v16 }
 0x181   :  { %1638 = vmatmul.mubr.bf16.gmra.mrb[44].mxu0 %v6734_v49  ;;  %1864 = vmatmul.mubr.bf16.gmra.mrb[44].mxu1 %v6734_v49  ;;  %v5863_v49 = vld [vmem:[%s7994_s8] sm:$0xff]  }
 0x182   :  { %1647 = vmatprep.mubr.bf16.mxu0 %v6754_v56  ;;  %1873 = vmatprep.mubr.bf16.mxu1 %v6754_v56  ;;  %v5865_v56 = vld [vmem:[%s7994_s8 + $0x10] sm:$0xff]  }
 0x183   :  { %5253 = vmatpush3.bf16.msra.mxu0 %v5860_v3  ;;  %5457 = vmatprep.subr.bf16.mxu1 %v5863_v49 }
 0x184   :  { %5254 = vmatprep.subr.bf16.mxu0 %v5861_v35  ;;  %5458 = vmatpush3.bf16.msra.mxu1 %v5863_v49 }
 0x185   :  { %5459 = vmatprep.subr.bf16.mxu1 %v5864_v62 }
 0x187   :  { %5255 = vmatpush3.bf16.msra.mxu0 %v5862_v1 }
 0x188   :  { %5460 = vmatpush3.bf16.msra.mxu1 %v5864_v62 }
 0x189   :  { %1648 = vmatmul.mubr.bf16.gmra.mrb[48].mxu0 %v6769_v11  ;;  %1874 = vmatmul.mubr.bf16.gmra.mrb[48].mxu1 %v6769_v11 }
 0x18a   :  { %1657 = vmatprep.mubr.bf16.mxu0 %v6782_v24  ;;  %1883 = vmatprep.mubr.bf16.mxu1 %v6782_v24 }
 0x18b   :  { %5461 = vmatprep.subr.bf16.mxu1 %v5865_v56 }
 0x18c   :  { %5462 = vmatpush3.bf16.msra.mxu1 %v5865_v56 }
 0x18d   :  { %5463 = vmatprep.subr.bf16.mxu1 %v5866_v33 }
 0x190   :  { %5464 = vmatpush3.bf16.msra.mxu1 %v5866_v33 }
 0x191   :  { %1658 = vmatmul.mubr.bf16.gmra.mrb[52].mxu0 %v6794_v42  ;;  %1884 = vmatmul.mubr.bf16.gmra.mrb[52].mxu1 %v6794_v42 }
 0x192   :  { %1667 = vmatprep.mubr.bf16.mxu0 %v667_v63  ;;  %1893 = vmatprep.mubr.bf16.mxu1 %v667_v63 }
 0x193   :  { %5465 = vmatprep.subr.bf16.mxu1 %v5867_v61 }
 0x194   :  { %5466 = vmatpush3.bf16.msra.mxu1 %v5867_v61 }
 0x195   :  { %5467 = vmatprep.subr.bf16.mxu1 %v5868_v4 }
 0x198   :  { %5468 = vmatpush3.bf16.msra.mxu1 %v5868_v4 }
 0x199   :  { %1668 = vmatmul.mubr.bf16.gmra.mrb[56].mxu0 %v666_v48  ;;  %1894 = vmatmul.mubr.bf16.gmra.mrb[56].mxu1 %v666_v48 }
 0x19a   :  { %1677 = vmatprep.mubr.bf16.mxu0 %v671_v10  ;;  %1903 = vmatprep.mubr.bf16.mxu1 %v671_v10 }
 0x1a1   :  { %1678 = vmatmul.mubr.bf16.gmra.mrb[60].mxu0 %v670_v30  ;;  %1904 = vmatmul.mubr.bf16.gmra.mrb[60].mxu1 %v670_v30 }
 0x23c   :  { %v1609_v43 = vpop.f32.mrb[32].mxu0  ;;  %v1835_v11 = vpop.f32.mrb[32].mxu1 }
 0x23d   :  { %v5507_v7 = vadd.f32 %v1609_v43, %v6895_v58  ;;  %v1611_v26 = vpop.f32.mrb[33].mxu0  ;;  %v1837_v44 = vpop.f32.mrb[33].mxu1  ;;  %v5539_v50 = vadd.f32 %v1835_v11, %v6901_v60 }
 0x23e   :  { %v5508_v15 = vadd.f32 %v1611_v26, %v6898_v19  ;;  %v1613_v14 = vpop.f32.mrb[34].mxu0  ;;  %v1839_v8 = vpop.f32.mrb[34].mxu1  ;;  %v5540_v41 = vadd.f32 %v1837_v44, %v6904_v12 }
 0x23f   :  { %vm1914_vm5 = vcmp.gt.f32.partialorder %v5507_v7, 0.0  ;;  %v1946_v24 = vmul.f32 0.2, %v5507_v7  ;;  %v5509_v25 = vadd.f32 %v1613_v14, %v6895_v58  ;;  %v1615_v17 = vpop.f32.mrb[35].mxu0  ;;  %v1841_v27 = vpop.f32.mrb[35].mxu1  ;;  %v5541_v36 = vadd.f32 %v1839_v8, %v6901_v60 }
 0x240   :  { %vm1915_vm6 = vcmp.gt.f32.partialorder %v5508_v15, 0.0  ;;  %v1947_v20 = vmul.f32 0.2, %v5508_v15  ;;  %v5510_v28 = vadd.f32 %v1615_v17, %v6898_v19  ;;  %v5542_v13 = vadd.f32 %v1841_v27, %v6904_v12 }
 0x241   :  { %v1978_v32 = vsel %vm1914_vm5, %v5507_v7, %v1946_v24  ;;  %vm1916_vm7 = vcmp.gt.f32.partialorder %v5509_v25, 0.0  ;;  %v1948_v42 = vmul.f32 0.2, %v5509_v25 }
 0x242   :  { %v2010_v29 = vadd.f32 %v5539_v50, %v1978_v32  ;;  %v1979_v34 = vsel %vm1915_vm6, %v5508_v15, %v1947_v20  ;;  %vm1917_vm8 = vcmp.gt.f32.partialorder %v5510_v28, 0.0  ;;  %v1949_v22 = vmul.f32 0.2, %v5510_v28 }
 0x243   :  { %v2011_v2 = vadd.f32 %v5540_v41, %v1979_v34  ;;  %v1980_v55 = vsel %vm1916_vm7, %v5509_v25, %v1948_v42 }
 0x244   :  { %v2012_v63 = vadd.f32 %v5541_v36, %v1980_v55  ;;  %v1981_v45 = vsel %vm1917_vm8, %v5510_v28, %v1949_v22  ;;  %v1619_v47 = vpop.f32.mrb[36].mxu0  ;;  %v1845_v31 = vpop.f32.mrb[36].mxu1 }
 0x245   :  { %v2013_v52 = vadd.f32 %v5542_v13, %v1981_v45  ;;  %v5511_v48 = vadd.f32 %v1619_v47, %v6895_v58  ;;  %v1621_v18 = vpop.f32.mrb[37].mxu0  ;;  %v1847_v6 = vpop.f32.mrb[37].mxu1  ;;  %v5543_v10 = vadd.f32 %v1845_v31, %v6901_v60 }
 0x246   :  { %v2042_v53 = vpack.c.bf16 %v2012_v63, %v2010_v29  ;;  %v5512_v30 = vadd.f32 %v1621_v18, %v6898_v19  ;;  %v1623_v39 = vpop.f32.mrb[38].mxu0  ;;  %v1849_v37 = vpop.f32.mrb[38].mxu1  ;;  %v5544_v23 = vadd.f32 %v1847_v6, %v6904_v12 }
 0x247   :  { %vm1918_vm9 = vcmp.gt.f32.partialorder %v5511_v48, 0.0  ;;  %v1950_v5 = vmul.f32 0.2, %v5511_v48  ;;  %v5513_v51 = vadd.f32 %v1623_v39, %v6895_v58  ;;  %v1625_v59 = vpop.f32.mrb[39].mxu0  ;;  %v1851_v9 = vpop.f32.mrb[39].mxu1  ;;  %v5545_v16 = vadd.f32 %v1849_v37, %v6901_v60 }
 0x248   :  { %vm1919_vm10 = vcmp.gt.f32.partialorder %v5512_v30, 0.0  ;;  %v1951_v54 = vmul.f32 0.2, %v5512_v30  ;;  %v5514_v3 = vadd.f32 %v1625_v59, %v6898_v19  ;;  %v2043_v49 = vpack.c.bf16 %v2013_v52, %v2011_v2 }
 0x249   :  { %v1982_v35 = vsel %vm1918_vm9, %v5511_v48, %v1950_v5  ;;  %vm1920_vm11 = vcmp.gt.f32.partialorder %v5513_v51, 0.0  ;;  %v1952_v1 = vmul.f32 0.2, %v5513_v51  ;;  %v5546_v21 = vadd.f32 %v1851_v9, %v6904_v12 }
 0x24a   :  { %v2014_v62 = vadd.f32 %v5543_v10, %v1982_v35  ;;  %v1983_v56 = vsel %vm1919_vm10, %v5512_v30, %v1951_v54  ;;  %vm1921_vm12 = vcmp.gt.f32.partialorder %v5514_v3, 0.0  ;;  %v1953_v33 = vmul.f32 0.2, %v5514_v3  ;;  %2225 = vmatprep.mubr.bf16.mxu0 %v2043_v49 }
 0x24b   :  { %v2015_v61 = vadd.f32 %v5544_v23, %v1983_v56  ;;  %v1984_v4 = vsel %vm1920_vm11, %v5513_v51, %v1952_v1  ;;  %2226 = vmatmul.mubr.bf16.vlgmr.msra.gmra.mrb[64].mxu0 %v2042_v53 }
 0x24c   :  { %v2016_v43 = vadd.f32 %v5545_v16, %v1984_v4  ;;  %v1985_v11 = vsel %vm1921_vm12, %v5514_v3, %v1953_v33  ;;  %v1629_v7 = vpop.f32.mrb[40].mxu0  ;;  %v1855_v26 = vpop.f32.mrb[40].mxu1 }
 0x24d   :  { %v2017_v44 = vadd.f32 %v5546_v21, %v1985_v11  ;;  %v5515_v15 = vadd.f32 %v1629_v7, %v6895_v58  ;;  %v1631_v14 = vpop.f32.mrb[41].mxu0  ;;  %v1857_v8 = vpop.f32.mrb[41].mxu1  ;;  %v5547_v24 = vadd.f32 %v1855_v26, %v6901_v60 }
 0x24e   :  { %v5516_v50 = vadd.f32 %v1631_v14, %v6898_v19  ;;  %v1633_v25 = vpop.f32.mrb[42].mxu0  ;;  %v1859_v17 = vpop.f32.mrb[42].mxu1  ;;  %v2044_v27 = vpack.c.bf16 %v2016_v43, %v2014_v62  ;;  %v5548_v41 = vadd.f32 %v1857_v8, %v6904_v12 }
 0x24f   :  { %vm1922_vm13 = vcmp.gt.f32.partialorder %v5515_v15, 0.0  ;;  %v1954_v20 = vmul.f32 0.2, %v5515_v15  ;;  %v5517_v28 = vadd.f32 %v1633_v25, %v6895_v58  ;;  %v1635_v32 = vpop.f32.mrb[43].mxu0  ;;  %v1861_v42 = vpop.f32.mrb[43].mxu1  ;;  %v5549_v29 = vadd.f32 %v1859_v17, %v6901_v60 }
 0x250   :  { %vm1923_vm14 = vcmp.gt.f32.partialorder %v5516_v50, 0.0  ;;  %v1955_v36 = vmul.f32 0.2, %v5516_v50  ;;  %v5518_v34 = vadd.f32 %v1635_v32, %v6898_v19  ;;  %v2045_v55 = vpack.c.bf16 %v2017_v44, %v2015_v61 }
 0x251   :  { %v1986_v22 = vsel %vm1922_vm13, %v5515_v15, %v1954_v20  ;;  %vm1924_vm15 = vcmp.gt.f32.partialorder %v5517_v28, 0.0  ;;  %v1956_v2 = vmul.f32 0.2, %v5517_v28  ;;  %v5550_v52 = vadd.f32 %v1861_v42, %v6904_v12 }
 0x252   :  { %v2018_v13 = vadd.f32 %v5547_v24, %v1986_v22  ;;  %v1987_v63 = vsel %vm1923_vm14, %v5516_v50, %v1955_v36  ;;  %vm1925_vm1 = vcmp.gt.f32.partialorder %v5518_v34, 0.0  ;;  %v1957_v45 = vmul.f32 0.2, %v5518_v34  ;;  %2233 = vmatprep.mubr.bf16.mxu0 %v2045_v55 }
 0x253   :  { %v2019_v47 = vadd.f32 %v5548_v41, %v1987_v63  ;;  %v1988_v31 = vsel %vm1924_vm15, %v5517_v28, %v1956_v2  ;;  %2234 = vmatmul.mubr.bf16.gmra.mrb[68].mxu0 %v2044_v27 }
 0x254   :  { %v2020_v48 = vadd.f32 %v5549_v29, %v1988_v31  ;;  %v1989_v18 = vsel %vm1925_vm1, %v5518_v34, %v1957_v45  ;;  %v1639_v6 = vpop.f32.mrb[44].mxu0  ;;  %v1865_v53 = vpop.f32.mrb[44].mxu1 }
 0x255   :  { %v2021_v10 = vadd.f32 %v5550_v52, %v1989_v18  ;;  %v5519_v30 = vadd.f32 %v1639_v6, %v6895_v58  ;;  %v1641_v39 = vpop.f32.mrb[45].mxu0  ;;  %v1867_v37 = vpop.f32.mrb[45].mxu1  ;;  %v5551_v5 = vadd.f32 %v1865_v53, %v6901_v60 }
 0x256   :  { %v5520_v23 = vadd.f32 %v1641_v39, %v6898_v19  ;;  %v1643_v51 = vpop.f32.mrb[46].mxu0  ;;  %v1869_v59 = vpop.f32.mrb[46].mxu1  ;;  %v2046_v9 = vpack.c.bf16 %v2020_v48, %v2018_v13  ;;  %v5552_v16 = vadd.f32 %v1867_v37, %v6904_v12 }
 0x257   :  { %vm1926_vm2 = vcmp.gt.f32.partialorder %v5519_v30, 0.0  ;;  %v1958_v54 = vmul.f32 0.2, %v5519_v30  ;;  %v5521_v3 = vadd.f32 %v1643_v51, %v6895_v58  ;;  %v1645_v35 = vpop.f32.mrb[47].mxu0  ;;  %v1871_v1 = vpop.f32.mrb[47].mxu1  ;;  %v5553_v62 = vadd.f32 %v1869_v59, %v6901_v60 }
 0x258   :  { %vm1927_vm3 = vcmp.gt.f32.partialorder %v5520_v23, 0.0  ;;  %v1959_v49 = vmul.f32 0.2, %v5520_v23  ;;  %v5522_v56 = vadd.f32 %v1645_v35, %v6898_v19  ;;  %v2047_v4 = vpack.c.bf16 %v2021_v10, %v2019_v47 }
 0x259   :  { %v1990_v33 = vsel %vm1926_vm2, %v5519_v30, %v1958_v54  ;;  %vm1928_vm4 = vcmp.gt.f32.partialorder %v5521_v3, 0.0  ;;  %v1960_v61 = vmul.f32 0.2, %v5521_v3  ;;  %v5554_v44 = vadd.f32 %v1871_v1, %v6904_v12 }
 0x25a   :  { %v2022_v21 = vadd.f32 %v5551_v5, %v1990_v33  ;;  %v1991_v43 = vsel %vm1927_vm3, %v5520_v23, %v1959_v49  ;;  %vm1929_vm5 = vcmp.gt.f32.partialorder %v5522_v56, 0.0  ;;  %v1961_v11 = vmul.f32 0.2, %v5522_v56  ;;  %2241 = vmatprep.mubr.bf16.mxu0 %v2047_v4 }
 0x25b   :  { %v2023_v7 = vadd.f32 %v5552_v16, %v1991_v43  ;;  %v1992_v26 = vsel %vm1928_vm4, %v5521_v3, %v1960_v61  ;;  %2242 = vmatmul.mubr.bf16.gmra.mrb[72].mxu0 %v2046_v9 }
 0x25c   :  { %v2024_v15 = vadd.f32 %v5553_v62, %v1992_v26  ;;  %v1993_v14 = vsel %vm1929_vm5, %v5522_v56, %v1961_v11  ;;  %v1649_v8 = vpop.f32.mrb[48].mxu0  ;;  %v1875_v24 = vpop.f32.mrb[48].mxu1 }
 0x25d   :  { %v2025_v50 = vadd.f32 %v5554_v44, %v1993_v14  ;;  %v5523_v25 = vadd.f32 %v1649_v8, %v6895_v58  ;;  %v1651_v17 = vpop.f32.mrb[49].mxu0  ;;  %v1877_v27 = vpop.f32.mrb[49].mxu1  ;;  %v5555_v20 = vadd.f32 %v1875_v24, %v6901_v60 }
 0x25e   :  { %v5524_v41 = vadd.f32 %v1651_v17, %v6898_v19  ;;  %v1653_v28 = vpop.f32.mrb[50].mxu0  ;;  %v1879_v32 = vpop.f32.mrb[50].mxu1  ;;  %v2048_v42 = vpack.c.bf16 %v2024_v15, %v2022_v21  ;;  %v5556_v29 = vadd.f32 %v1877_v27, %v6904_v12 }
 0x25f   :  { %vm1930_vm6 = vcmp.gt.f32.partialorder %v5523_v25, 0.0  ;;  %v1962_v36 = vmul.f32 0.2, %v5523_v25  ;;  %v5525_v34 = vadd.f32 %v1653_v28, %v6895_v58  ;;  %v1655_v22 = vpop.f32.mrb[51].mxu0  ;;  %v1881_v2 = vpop.f32.mrb[51].mxu1  ;;  %v5557_v13 = vadd.f32 %v1879_v32, %v6901_v60 }
 0x260   :  { %vm1931_vm7 = vcmp.gt.f32.partialorder %v5524_v41, 0.0  ;;  %v1963_v55 = vmul.f32 0.2, %v5524_v41  ;;  %v5526_v63 = vadd.f32 %v1655_v22, %v6898_v19  ;;  %v2049_v31 = vpack.c.bf16 %v2025_v50, %v2023_v7 }
 0x261   :  { %v1994_v45 = vsel %vm1930_vm6, %v5523_v25, %v1962_v36  ;;  %vm1932_vm8 = vcmp.gt.f32.partialorder %v5525_v34, 0.0  ;;  %v1964_v47 = vmul.f32 0.2, %v5525_v34  ;;  %v5558_v10 = vadd.f32 %v1881_v2, %v6904_v12 }
 0x262   :  { %v2026_v52 = vadd.f32 %v5555_v20, %v1994_v45  ;;  %v1995_v48 = vsel %vm1931_vm7, %v5524_v41, %v1963_v55  ;;  %vm1933_vm9 = vcmp.gt.f32.partialorder %v5526_v63, 0.0  ;;  %v1965_v18 = vmul.f32 0.2, %v5526_v63  ;;  %2249 = vmatprep.mubr.bf16.mxu0 %v2049_v31 }
 0x263   :  { %v2027_v6 = vadd.f32 %v5556_v29, %v1995_v48  ;;  %v1996_v53 = vsel %vm1932_vm8, %v5525_v34, %v1964_v47  ;;  %2250 = vmatmul.mubr.bf16.gmra.mrb[76].mxu0 %v2048_v42 }
 0x264   :  { %v2028_v30 = vadd.f32 %v5557_v13, %v1996_v53  ;;  %v1997_v39 = vsel %vm1933_vm9, %v5526_v63, %v1965_v18  ;;  %v1659_v37 = vpop.f32.mrb[52].mxu0  ;;  %v1885_v5 = vpop.f32.mrb[52].mxu1 }
 0x265   :  { %v2029_v23 = vadd.f32 %v5558_v10, %v1997_v39  ;;  %v5527_v51 = vadd.f32 %v1659_v37, %v6895_v58  ;;  %v1661_v59 = vpop.f32.mrb[53].mxu0  ;;  %v1887_v9 = vpop.f32.mrb[53].mxu1  ;;  %v5559_v54 = vadd.f32 %v1885_v5, %v6901_v60 }
 0x266   :  { %v5528_v16 = vadd.f32 %v1661_v59, %v6898_v19  ;;  %v1663_v3 = vpop.f32.mrb[54].mxu0  ;;  %v1889_v35 = vpop.f32.mrb[54].mxu1  ;;  %v2050_v1 = vpack.c.bf16 %v2028_v30, %v2026_v52  ;;  %v5560_v62 = vadd.f32 %v1887_v9, %v6904_v12 }
 0x267   :  { %vm1934_vm10 = vcmp.gt.f32.partialorder %v5527_v51, 0.0  ;;  %v1966_v49 = vmul.f32 0.2, %v5527_v51  ;;  %v5529_v56 = vadd.f32 %v1663_v3, %v6895_v58  ;;  %v1665_v33 = vpop.f32.mrb[55].mxu0  ;;  %v1891_v61 = vpop.f32.mrb[55].mxu1  ;;  %v5561_v21 = vadd.f32 %v1889_v35, %v6901_v60 }
 0x268   :  { %vm1935_vm11 = vcmp.gt.f32.partialorder %v5528_v16, 0.0  ;;  %v1967_v4 = vmul.f32 0.2, %v5528_v16  ;;  %v5530_v43 = vadd.f32 %v1665_v33, %v6898_v19  ;;  %v2051_v26 = vpack.c.bf16 %v2029_v23, %v2027_v6 }
 0x269   :  { %v1998_v11 = vsel %vm1934_vm10, %v5527_v51, %v1966_v49  ;;  %vm1936_vm12 = vcmp.gt.f32.partialorder %v5529_v56, 0.0  ;;  %v1968_v7 = vmul.f32 0.2, %v5529_v56  ;;  %v5562_v50 = vadd.f32 %v1891_v61, %v6904_v12 }
 0x26a   :  { %v2030_v44 = vadd.f32 %v5559_v54, %v1998_v11  ;;  %v1999_v15 = vsel %vm1935_vm11, %v5528_v16, %v1967_v4  ;;  %vm1937_vm13 = vcmp.gt.f32.partialorder %v5530_v43, 0.0  ;;  %v1969_v14 = vmul.f32 0.2, %v5530_v43  ;;  %2257 = vmatprep.mubr.bf16.mxu0 %v2051_v26 }
 0x26b   :  { %v2031_v8 = vadd.f32 %v5560_v62, %v1999_v15  ;;  %v2000_v24 = vsel %vm1936_vm12, %v5529_v56, %v1968_v7  ;;  %2258 = vmatmul.mubr.bf16.gmra.mrb[80].mxu0 %v2050_v1 }
 0x26c   :  { %v2032_v25 = vadd.f32 %v5561_v21, %v2000_v24  ;;  %v2001_v17 = vsel %vm1937_vm13, %v5530_v43, %v1969_v14  ;;  %v1669_v27 = vpop.f32.mrb[56].mxu0  ;;  %v1895_v20 = vpop.f32.mrb[56].mxu1 }
 0x26d   :  { %v2033_v41 = vadd.f32 %v5562_v50, %v2001_v17  ;;  %v5531_v28 = vadd.f32 %v1669_v27, %v6895_v58  ;;  %v1671_v32 = vpop.f32.mrb[57].mxu0  ;;  %v1897_v42 = vpop.f32.mrb[57].mxu1  ;;  %v5563_v36 = vadd.f32 %v1895_v20, %v6901_v60 }
 0x26e   :  { %v5532_v29 = vadd.f32 %v1671_v32, %v6898_v19  ;;  %v1673_v34 = vpop.f32.mrb[58].mxu0  ;;  %v1899_v22 = vpop.f32.mrb[58].mxu1  ;;  %v2052_v2 = vpack.c.bf16 %v2032_v25, %v2030_v44  ;;  %v5564_v13 = vadd.f32 %v1897_v42, %v6904_v12 }
 0x26f   :  { %vm1938_vm14 = vcmp.gt.f32.partialorder %v5531_v28, 0.0  ;;  %v1970_v55 = vmul.f32 0.2, %v5531_v28  ;;  %v5533_v63 = vadd.f32 %v1673_v34, %v6895_v58  ;;  %v1675_v45 = vpop.f32.mrb[59].mxu0  ;;  %v1901_v47 = vpop.f32.mrb[59].mxu1  ;;  %v5565_v52 = vadd.f32 %v1899_v22, %v6901_v60 }
 0x270   :  { %vm1939_vm15 = vcmp.gt.f32.partialorder %v5532_v29, 0.0  ;;  %v1971_v31 = vmul.f32 0.2, %v5532_v29  ;;  %v5534_v48 = vadd.f32 %v1675_v45, %v6898_v19  ;;  %v2053_v53 = vpack.c.bf16 %v2033_v41, %v2031_v8 }
 0x271   :  { %v2002_v18 = vsel %vm1938_vm14, %v5531_v28, %v1970_v55  ;;  %vm1940_vm1 = vcmp.gt.f32.partialorder %v5533_v63, 0.0  ;;  %v1972_v6 = vmul.f32 0.2, %v5533_v63  ;;  %v5566_v23 = vadd.f32 %v1901_v47, %v6904_v12 }
 0x272   :  { %v2034_v10 = vadd.f32 %v5563_v36, %v2002_v18  ;;  %v2003_v30 = vsel %vm1939_vm15, %v5532_v29, %v1971_v31  ;;  %vm1941_vm2 = vcmp.gt.f32.partialorder %v5534_v48, 0.0  ;;  %v1973_v39 = vmul.f32 0.2, %v5534_v48  ;;  %2265 = vmatprep.mubr.bf16.mxu0 %v2053_v53  ;;  %v6980_v29 = vld [vmem:[%s7993_s7] ss:$0 sm:$0xff] }
 0x273   :  { %v2035_v37 = vadd.f32 %v5564_v13, %v2003_v30  ;;  %v2004_v5 = vsel %vm1940_vm1, %v5533_v63, %v1972_v6  ;;  %2266 = vmatmul.mubr.bf16.gmra.mrb[84].mxu0 %v2052_v2 }
 0x274   :  { %v2036_v51 = vadd.f32 %v5565_v52, %v2004_v5  ;;  %v2005_v59 = vsel %vm1941_vm2, %v5534_v48, %v1973_v39  ;;  %v1679_v9 = vpop.f32.mrb[60].mxu0  ;;  %v1905_v54 = vpop.f32.mrb[60].mxu1 }
 0x275   :  { %v2037_v16 = vadd.f32 %v5566_v23, %v2005_v59  ;;  %v5535_v3 = vadd.f32 %v1679_v9, %v6895_v58  ;;  %v1681_v35 = vpop.f32.mrb[61].mxu0  ;;  %v1907_v1 = vpop.f32.mrb[61].mxu1  ;;  %v5567_v49 = vadd.f32 %v1905_v54, %v6901_v60 }
 0x276   :  { %v5536_v62 = vadd.f32 %v1681_v35, %v6898_v19  ;;  %v1683_v56 = vpop.f32.mrb[62].mxu0  ;;  %v1909_v33 = vpop.f32.mrb[62].mxu1  ;;  %v2054_v61 = vpack.c.bf16 %v2036_v51, %v2034_v10  ;;  %v5568_v21 = vadd.f32 %v1907_v1, %v6904_v12 }
 0x277   :  { %vm1942_vm3 = vcmp.gt.f32.partialorder %v5535_v3, 0.0  ;;  %v1974_v4 = vmul.f32 0.2, %v5535_v3  ;;  %v5537_v43 = vadd.f32 %v1683_v56, %v6895_v58  ;;  %v1685_v11 = vpop.f32.mrb[63].mxu0  ;;  %v1911_v7 = vpop.f32.mrb[63].mxu1  ;;  %v5569_v44 = vadd.f32 %v1909_v33, %v6901_v60 }
 0x278   :  { %vm1943_vm4 = vcmp.gt.f32.partialorder %v5536_v62, 0.0  ;;  %v1975_v26 = vmul.f32 0.2, %v5536_v62  ;;  %v5538_v15 = vadd.f32 %v1685_v11, %v6898_v19  ;;  %v2055_v24 = vpack.c.bf16 %v2037_v16, %v2035_v37  ;;  %v5869_v19 = vld [vmem:[%s7994_s8 + $0x30] sm:$0xff]  }
 0x279   :  { %v2006_v14 = vsel %vm1942_vm3, %v5535_v3, %v1974_v4  ;;  %vm1944_vm5 = vcmp.gt.f32.partialorder %v5537_v43, 0.0  ;;  %v1976_v8 = vmul.f32 0.2, %v5537_v43  ;;  %v5570_v58 = vadd.f32 %v1911_v7, %v6904_v12  ;;  %5469 = vmatprep.subr.bf16.mxu1 %v5869_v19  ;;  %v5870_v12 = vld [vmem:[%s7994_s8 + $0x38] sm:$0xff]  }
 0x27a   :  { %v2038_v50 = vadd.f32 %v5567_v49, %v2006_v14  ;;  %v2007_v25 = vsel %vm1943_vm4, %v5536_v62, %v1975_v26  ;;  %vm1945_vm6 = vcmp.gt.f32.partialorder %v5538_v15, 0.0  ;;  %v1977_v17 = vmul.f32 0.2, %v5538_v15  ;;  %2273 = vmatprep.mubr.bf16.mxu0 %v2055_v24  ;;  %5470 = vmatpush3.bf16.msra.mxu1 %v5869_v19 }
 0x27b   :  { %v2039_v27 = vadd.f32 %v5568_v21, %v2007_v25  ;;  %v2008_v20 = vsel %vm1944_vm5, %v5537_v43, %v1976_v8  ;;  %2274 = vmatmul.mubr.bf16.gmra.mrb[88].mxu0 %v2054_v61  ;;  %5471 = vmatprep.subr.bf16.mxu1 %v5870_v12 }
 0x27c   :  { %v2040_v41 = vadd.f32 %v5569_v44, %v2008_v20  ;;  %v2009_v28 = vsel %vm1945_vm6, %v5538_v15, %v1977_v17 }
 0x27d   :  { %v2041_v32 = vadd.f32 %v5570_v58, %v2009_v28 }
 0x27e   :  { %v2056_v60 = vpack.c.bf16 %v2040_v41, %v2038_v50  ;;  %5472 = vmatpush3.bf16.msra.mxu1 %v5870_v12 }
 0x27f   :  { %v2057_v42 = vpack.c.bf16 %v2041_v32, %v2039_v27 }
 0x281   :  { %2281 = vmatprep.mubr.bf16.mxu0 %v2057_v42 }
 0x283   :  { %2282 = vmatmul.mubr.bf16.gmra.mrb[92].mxu0 %v2056_v60 }
 0x284   :  { %3118 = vmatprep.mubr.bf16.mxu0 %v6218_v0 }
 0x31e   :  { %v5256_v36 = vpop.f32.mrb[64].mxu0 }
 0x31f   :  { %v5257_v34 = vpop.f32.mrb[65].mxu0 }
 0x320   :  { %v5258_v22 = vadd.f32 %v5257_v34, %v5256_v36  ;;  %v5259_v2 = vpop.f32.mrb[66].mxu0 }
 0x321   :  { %v5260_v55 = vpop.f32.mrb[67].mxu0 }
 0x322   :  { %v2228_v13 = vadd.f32 %v5258_v22, %v6980_v29  ;;  %v5261_v63 = vadd.f32 %v5260_v55, %v5259_v2 }
 0x324   :  { %v2306_v45 = vmul.f32 0.2, %v2228_v13  ;;  %v2231_v47 = vadd.f32 %v5261_v63, %v6980_v29  ;;  %vm2290_vm7 = vcmp.gt.f32.partialorder %v2228_v13, 0.0 }
 0x326   :  { %vm2291_vm8 = vcmp.gt.f32.partialorder %v2231_v47, 0.0  ;;  %v2307_v31 = vmul.f32 0.2, %v2231_v47  ;;  %v5262_v52 = vpop.f32.mrb[68].mxu0  ;;  %v2322_v53 = vsel %vm2290_vm7, %v2228_v13, %v2306_v45 }
 0x327   :  { %v5263_v48 = vpop.f32.mrb[69].mxu0 }
 0x328   :  { %v5264_v18 = vadd.f32 %v5263_v48, %v5262_v52  ;;  %v5265_v6 = vpop.f32.mrb[70].mxu0  ;;  %v2323_v10 = vsel %vm2291_vm8, %v2231_v47, %v2307_v31  ;;  %vm2715_vm8 = vcmask 1043456  }
 0x329   :  { %v5266_v30 = vpop.f32.mrb[71].mxu0  ;;  %v2338_v39 = vpack.c.bf16 %v2323_v10, %v2322_v53 }
 0x32a   :  { %v2236_v37 = vadd.f32 %v5264_v18, %v6980_v29  ;;  %v5267_v5 = vadd.f32 %v5266_v30, %v5265_v6 }
 0x32b   :  { %5473 = vmatprep.mubr.bf16.mxu1 %v2338_v39 }
 0x32c   :  { %v2308_v23 = vmul.f32 0.2, %v2236_v37  ;;  %v2239_v51 = vadd.f32 %v5267_v5, %v6980_v29  ;;  %vm2292_vm9 = vcmp.gt.f32.partialorder %v2236_v37, 0.0 }
 0x32e   :  { %vm2293_vm10 = vcmp.gt.f32.partialorder %v2239_v51, 0.0  ;;  %v2309_v59 = vmul.f32 0.2, %v2239_v51  ;;  %v5268_v9 = vpop.f32.mrb[72].mxu0  ;;  %v2324_v16 = vsel %vm2292_vm9, %v2236_v37, %v2308_v23  ;;  %vm4881_vm9 = vcmask 130048  }
 0x32f   :  { %v5269_v54 = vpop.f32.mrb[73].mxu0 }
 0x330   :  { %v2325_v3 = vsel %vm2293_vm10, %v2239_v51, %v2309_v59  ;;  %v5270_v35 = vadd.f32 %v5269_v54, %v5268_v9  ;;  %v5271_v1 = vpop.f32.mrb[74].mxu0  ;;  %vm2690_vm10 = vcmask 64512  }
 0x331   :  { %v2339_v49 = vpack.c.bf16 %v2325_v3, %v2324_v16  ;;  %v5272_v62 = vpop.f32.mrb[75].mxu0 }
 0x332   :  { %v2244_v56 = vadd.f32 %v5270_v35, %v6980_v29  ;;  %v5273_v33 = vadd.f32 %v5272_v62, %v5271_v1 }
 0x333   :  { %5474 = vmatmul.mubr.bf16.vlgmr.msra.gmra.mrb[64].mxu1 %v2339_v49 }
 0x334   :  { %v2310_v61 = vmul.f32 0.2, %v2244_v56  ;;  %v2247_v4 = vadd.f32 %v5273_v33, %v6980_v29  ;;  %vm2294_vm11 = vcmp.gt.f32.partialorder %v2244_v56, 0.0 }
 0x336   :  { %vm2295_vm12 = vcmp.gt.f32.partialorder %v2247_v4, 0.0  ;;  %v2311_v21 = vmul.f32 0.2, %v2247_v4  ;;  %v5274_v43 = vpop.f32.mrb[76].mxu0  ;;  %v2326_v44 = vsel %vm2294_vm11, %v2244_v56, %v2310_v61 }
 0x337   :  { %v5275_v11 = vpop.f32.mrb[77].mxu0 }
 0x338   :  { %v5276_v7 = vadd.f32 %v5275_v11, %v5274_v43  ;;  %v5277_v26 = vpop.f32.mrb[78].mxu0  ;;  %v2327_v15 = vsel %vm2295_vm12, %v2247_v4, %v2311_v21 }
 0x339   :  { %v5278_v14 = vpop.f32.mrb[79].mxu0  ;;  %v2340_v8 = vpack.c.bf16 %v2327_v15, %v2326_v44 }
 0x33a   :  { %v2252_v24 = vadd.f32 %v5276_v7, %v6980_v29  ;;  %v5279_v50 = vadd.f32 %v5278_v14, %v5277_v26 }
 0x33b   :  { %5477 = vmatprep.mubr.bf16.mxu1 %v2340_v8 }
 0x33c   :  { %v2312_v25 = vmul.f32 0.2, %v2252_v24  ;;  %v2255_v17 = vadd.f32 %v5279_v50, %v6980_v29  ;;  %vm2296_vm13 = vcmp.gt.f32.partialorder %v2252_v24, 0.0 }
 0x33e   :  { %vm2297_vm14 = vcmp.gt.f32.partialorder %v2255_v17, 0.0  ;;  %v2313_v27 = vmul.f32 0.2, %v2255_v17  ;;  %v5280_v20 = vpop.f32.mrb[80].mxu0  ;;  %v2328_v32 = vsel %vm2296_vm13, %v2252_v24, %v2312_v25  ;;  %v2682_v25 = vld [vmem:[%s7996_s10] sm:$0xf] }
 0x33f   :  { %v5281_v58 = vpop.f32.mrb[81].mxu0  ;;  %5635 = vmatprep.subr.msk.bf16.mxu1 %vm2715_vm8, %v2682_v25 }
 0x340   :  { %v5282_v41 = vadd.f32 %v5281_v58, %v5280_v20  ;;  %v5283_v28 = vpop.f32.mrb[82].mxu0  ;;  %v2329_v60 = vsel %vm2297_vm14, %v2255_v17, %v2313_v27  ;;  %v2717_v17 = vsel %vm2715_vm8, %v2682_v25, 0  ;;  %v7004_v27 = vld [vmem:[%s7995_s9] ss:$0 sm:$0xff] }
 0x341   :  { %v5284_v42 = vpop.f32.mrb[83].mxu0  ;;  %v2341_v19 = vpack.c.bf16 %v2329_v60, %v2328_v32  ;;  %5490 = vmatpush3.bf16.msra.mxu1 %v2717_v17 }
 0x342   :  { %v2260_v12 = vadd.f32 %v5282_v41, %v6980_v29  ;;  %v5285_v36 = vadd.f32 %v5284_v42, %v5283_v28 }
 0x343   :  { %5478 = vmatmul.mubr.bf16.gmra.mrb[68].mxu1 %v2341_v19 }
 0x344   :  { %v2314_v34 = vmul.f32 0.2, %v2260_v12  ;;  %v2263_v22 = vadd.f32 %v5285_v36, %v6980_v29  ;;  %vm2298_vm15 = vcmp.gt.f32.partialorder %v2260_v12, 0.0 }
 0x346   :  { %vm2299_vm1 = vcmp.gt.f32.partialorder %v2263_v22, 0.0  ;;  %v2315_v2 = vmul.f32 0.2, %v2263_v22  ;;  %v5286_v55 = vpop.f32.mrb[84].mxu0  ;;  %v2330_v47 = vsel %vm2298_vm15, %v2260_v12, %v2314_v34 }
 0x347   :  { %v5287_v13 = vpop.f32.mrb[85].mxu0 }
 0x348   :  { %v5288_v63 = vadd.f32 %v5287_v13, %v5286_v55  ;;  %v5289_v45 = vpop.f32.mrb[86].mxu0  ;;  %v2331_v31 = vsel %vm2299_vm1, %v2263_v22, %v2315_v2 }
 0x349   :  { %v5290_v52 = vpop.f32.mrb[87].mxu0  ;;  %v2342_v48 = vpack.c.bf16 %v2331_v31, %v2330_v47 }
 0x34a   :  { %v2268_v18 = vadd.f32 %v5288_v63, %v6980_v29  ;;  %v5291_v6 = vadd.f32 %v5290_v52, %v5289_v45 }
 0x34b   :  { %5481 = vmatprep.mubr.bf16.mxu1 %v2342_v48 }
 0x34c   :  { %v2316_v53 = vmul.f32 0.2, %v2268_v18  ;;  %v2271_v10 = vadd.f32 %v5291_v6, %v6980_v29  ;;  %vm2300_vm2 = vcmp.gt.f32.partialorder %v2268_v18, 0.0 }
 0x34e   :  { %vm2301_vm3 = vcmp.gt.f32.partialorder %v2271_v10, 0.0  ;;  %v2317_v30 = vmul.f32 0.2, %v2271_v10  ;;  %v5292_v39 = vpop.f32.mrb[88].mxu0  ;;  %v2332_v51 = vsel %vm2300_vm2, %v2268_v18, %v2316_v53 }
 0x34f   :  { %v5293_v37 = vpop.f32.mrb[89].mxu0 }
 0x350   :  { %v5294_v5 = vadd.f32 %v5293_v37, %v5292_v39  ;;  %v5295_v23 = vpop.f32.mrb[90].mxu0  ;;  %v2333_v59 = vsel %vm2301_vm3, %v2271_v10, %v2317_v30 }
 0x351   :  { %v5296_v9 = vpop.f32.mrb[91].mxu0  ;;  %v2343_v54 = vpack.c.bf16 %v2333_v59, %v2332_v51 }
 0x352   :  { %v2276_v16 = vadd.f32 %v5294_v5, %v6980_v29  ;;  %v5297_v3 = vadd.f32 %v5296_v9, %v5295_v23 }
 0x353   :  { %5482 = vmatmul.mubr.bf16.gmra.mrb[72].mxu1 %v2343_v54 }
 0x354   :  { %v2318_v35 = vmul.f32 0.2, %v2276_v16  ;;  %v2279_v1 = vadd.f32 %v5297_v3, %v6980_v29  ;;  %vm2302_vm4 = vcmp.gt.f32.partialorder %v2276_v16, 0.0 }
 0x356   :  { %vm2303_vm5 = vcmp.gt.f32.partialorder %v2279_v1, 0.0  ;;  %v2319_v49 = vmul.f32 0.2, %v2279_v1  ;;  %v5298_v62 = vpop.f32.mrb[92].mxu0  ;;  %v2334_v4 = vsel %vm2302_vm4, %v2276_v16, %v2318_v35 }
 0x357   :  { %v5299_v56 = vpop.f32.mrb[93].mxu0 }
 0x358   :  { %v5300_v33 = vadd.f32 %v5299_v56, %v5298_v62  ;;  %v5301_v61 = vpop.f32.mrb[94].mxu0  ;;  %v2335_v21 = vsel %vm2303_vm5, %v2279_v1, %v2319_v49 }
 0x359   :  { %v5302_v43 = vpop.f32.mrb[95].mxu0  ;;  %v2344_v11 = vpack.c.bf16 %v2335_v21, %v2334_v4 }
 0x35a   :  { %v2284_v7 = vadd.f32 %v5300_v33, %v6980_v29  ;;  %v5303_v26 = vadd.f32 %v5302_v43, %v5301_v61 }
 0x35b   :  { %5485 = vmatprep.mubr.bf16.mxu1 %v2344_v11 }
 0x35c   :  { %v2320_v44 = vmul.f32 0.2, %v2284_v7  ;;  %v2287_v15 = vadd.f32 %v5303_v26, %v6980_v29  ;;  %vm2304_vm6 = vcmp.gt.f32.partialorder %v2284_v7, 0.0 }
 0x35e   :  { %vm2305_vm7 = vcmp.gt.f32.partialorder %v2287_v15, 0.0  ;;  %v2321_v14 = vmul.f32 0.2, %v2287_v15  ;;  %v2336_v8 = vsel %vm2304_vm6, %v2284_v7, %v2320_v44 }
 0x360   :  { %v2337_v24 = vsel %vm2305_vm7, %v2287_v15, %v2321_v14 }
 0x361   :  { %v2345_v50 = vpack.c.bf16 %v2337_v24, %v2336_v8 }
 0x363   :  { %5486 = vmatmul.mubr.bf16.gmra.mrb[76].mxu1 %v2345_v50 }
 0x406   :  { %v5475_v29 = vpop.f32.mrb[64].mxu1 }
 0x407   :  { %v7007_v20 = vadd.f32 %v5475_v29, %v7004_v27  ;;  %v2451_v58 = vpop.f32.mrb[65].mxu1 }
 0x408   :  { %v7010_v41 = vadd.f32 %v7004_v27, %v2451_v58  ;;  %v5476_v28 = vpop.f32.mrb[66].mxu1 }
 0x409   :  { %v2516_v32 = vmul.f32 0.5, %v7007_v20  ;;  %4884 = vst.msk [vmem:[%s8005_s19 + $0x10] sm:$0xff] %vm4881_vm9, %v7007_v20  ;;  %v7019_v60 = vadd.f32 %v5476_v28, %v7004_v27  ;;  %v2454_v42 = vpop.f32.mrb[67].mxu1 }
 0x40a   :  { %v2514_v19 = vmul.f32 0.5, %v7010_v41  ;;  %4882 = vst.msk [vmem:[%s8005_s19] sm:$0xff] %vm4881_vm9, %v7010_v41  ;;  %v7028_v12 = vadd.f32 %v7004_v27, %v2454_v42 }
 0x40b   :  { %v2534_v36 = vmul.f32 1.442695, %v2516_v32  ;;  %v2517_v34 = vmul.f32 0.5, %v7019_v60  ;;  %4885 = vst.msk [vmem:[%s8005_s19 + $0x18] sm:$0xff] %vm4881_vm9, %v7019_v60 }
 0x40c   :  { %v2530_v22 = vmul.f32 1.442695, %v2514_v19  ;;  %v2515_v2 = vmul.f32 0.5, %v7028_v12  ;;  %4883 = vst.msk [vmem:[%s8005_s19 + $0x8] sm:$0xff] %vm4881_vm9, %v7028_v12 }
 0x40d   :  { %6047 = vpow2.f32 %v2534_v36  ;;  %v2536_v55 = vmul.f32 1.442695, %v2517_v34 }
 0x40e   :  { %6049 = vpow2.f32 %v2530_v22  ;;  %v2532_v13 = vmul.f32 1.442695, %v2515_v2 }
 0x40f   :  { %6051 = vpow2.f32 %v2536_v55 }
 0x410   :  { %6053 = vpow2.f32 %v2532_v13 }
 0x416   :  { %v5479_v63 = vpop.f32.mrb[68].mxu1 }
 0x417   :  { %v6048_v45 = vpop.eup %6047  ;;  %v7043_v47 = vadd.f32 %v5479_v63, %v7004_v27  ;;  %v2467_v31 = vpop.f32.mrb[69].mxu1 }
 0x418   :  { %v6050_v52 = vpop.eup %6049  ;;  %v7046_v48 = vadd.f32 %v7004_v27, %v2467_v31  ;;  %2598 = vrot.lane.b32.xlu1 %v6048_v45, %s6219_s2  ;;  %v5480_v18 = vpop.f32.mrb[70].mxu1 }
 0x419   :  { %4888 = vst.msk [vmem:[%s8005_s19 + $0x30] sm:$0xff] %vm4881_vm9, %v7043_v47  ;;  %v7055_v6 = vadd.f32 %v5480_v18, %v7004_v27  ;;  %v2470_v53 = vpop.f32.mrb[71].mxu1  ;;  %2594 = vrot.lane.b32.xlu0 %v6050_v52, %s6219_s2  ;;  %v2520_v10 = vmul.f32 0.5, %v7043_v47  ;;  %v6052_v37 = vpop.eup %6051 }
 0x41a   :  { %v2518_v30 = vmul.f32 0.5, %v7046_v48  ;;  %4886 = vst.msk [vmem:[%s8005_s19 + $0x20] sm:$0xff] %vm4881_vm9, %v7046_v48  ;;  %v7066_v39 = vadd.f32 %v7004_v27, %v2470_v53  ;;  %v6054_v5 = vpop.eup %6053 }
 0x41b   :  { %4889 = vst.msk [vmem:[%s8005_s19 + $0x38] sm:$0xff] %vm4881_vm9, %v7055_v6  ;;  %v2521_v51 = vmul.f32 0.5, %v7055_v6  ;;  %v2542_v9 = vmul.f32 1.442695, %v2520_v10  ;;  %v5871_v10 = vld [vmem:[#allocation6] ss:$16 sps:$4 sm:$0xff]  }
 0x41c   :  { %v2538_v23 = vmul.f32 1.442695, %v2518_v30  ;;  %v2519_v59 = vmul.f32 0.5, %v7066_v39  ;;  %4887 = vst.msk [vmem:[%s8005_s19 + $0x28] sm:$0xff] %vm4881_vm9, %v7066_v39  ;;  %2600 = vrot.lane.b32.xlu1 %v6052_v37, %s6219_s2  ;;  %v5873_v30 = vld [vmem:[#allocation6 + $0x4] ss:$16 sps:$4 sm:$0xff]  }
 0x41d   :  { %2596 = vrot.lane.b32.xlu0 %v6054_v5, %s6219_s2  ;;  %v2544_v16 = vmul.f32 1.442695, %v2521_v51  ;;  %v5876_v37 = vld [vmem:[#allocation6 + $0x24] ss:$16 sps:$4 sm:$0xff]   ;;  %3086 = vmatprep.subr.bf16.mxu0 %v5873_v30  ;;  %v5885_v51 = vld [vmem:[#allocation6 + $0xc] ss:$16 sps:$4 sm:$0xff]  }
 0x41e   :  { %6055 = vpow2.f32 %v2538_v23  ;;  %v2540_v54 = vmul.f32 1.442695, %v2519_v59  ;;  %3087 = vmatpush1.bf16.msra.mxu0 %v5871_v10  ;;  %v5874_v23 = vld [vmem:[#allocation6 + $0x20] ss:$16 sps:$4 sm:$0xff]   ;;  %3199 = vmatprep.subr.bf16.mxu1 %v5885_v51  ;;  %v5900_v10 = vld [vmem:[#allocation6 + $0x6c] ss:$16 sps:$4 sm:$0xff]  }
 0x41f   :  { %3088 = vmatprep.subr.bf16.mxu0 %v5876_v37 }
 0x420   :  { %6057 = vpow2.f32 %v2540_v54 }
 0x421   :  { %6059 = vpow2.f32 %v2542_v9  ;;  %v5879_v9 = vld [vmem:[#allocation6 + $0x44] ss:$16 sps:$4 sm:$0xff]  }
 0x422   :  { %6061 = vpow2.f32 %v2544_v16  ;;  %3089 = vmatpush1.bf16.msra.mxu0 %v5874_v23  ;;  %v5877_v16 = vld [vmem:[#allocation6 + $0x40] ss:$16 sps:$4 sm:$0xff]  }
 0x423   :  { %3090 = vmatprep.subr.bf16.mxu0 %v5879_v9  ;;  %v5898_v9 = vld [vmem:[#allocation6 + $0x68] ss:$16 sps:$4 sm:$0xff]  }
 0x426   :  { %v5483_v3 = vpop.f32.mrb[72].mxu1  ;;  %3091 = vmatpush1.bf16.msra.mxu0 %v5877_v16  ;;  %v5903_v16 = vld [vmem:[#allocation6 + $0x8c] ss:$16 sps:$4 sm:$0xff]  }
 0x427   :  { %v7083_v35 = vadd.f32 %v5483_v3, %v7004_v27  ;;  %v2483_v1 = vpop.f32.mrb[73].mxu1  ;;  %v5882_v3 = vld [vmem:[#allocation6 + $0x64] ss:$16 sps:$4 sm:$0xff]  }
 0x428   :  { %v6056_v49 = vpop.eup %6055  ;;  %v7086_v62 = vadd.f32 %v7004_v27, %v2483_v1  ;;  %v5484_v56 = vpop.f32.mrb[74].mxu1  ;;  %v5880_v1 = vld [vmem:[#allocation6 + $0x60] ss:$16 sps:$4 sm:$0xff]   ;;  %3092 = vmatprep.subr.bf16.mxu0 %v5882_v3 }
 0x429   :  { %4892 = vst.msk [vmem:[%s8005_s19 + $0x50] sm:$0xff] %vm4881_vm9, %v7083_v35  ;;  %v7094_v33 = vadd.f32 %v5484_v56, %v7004_v27  ;;  %v2486_v61 = vpop.f32.mrb[75].mxu1  ;;  %2602 = vrot.lane.b32.xlu0 %v6056_v49, %s6219_s2  ;;  %v2524_v21 = vmul.f32 0.5, %v7083_v35  ;;  %v5888_v49 = vld [vmem:[#allocation6 + $0x84] ss:$16 sps:$4 sm:$0xff]  }
 0x42a   :  { %v6058_v4 = vpop.eup %6057  ;;  %v2522_v43 = vmul.f32 0.5, %v7086_v62  ;;  %4890 = vst.msk [vmem:[%s8005_s19 + $0x40] sm:$0xff] %vm4881_vm9, %v7086_v62  ;;  %v7105_v11 = vadd.f32 %v7004_v27, %v2486_v61  ;;  %3093 = vmatpush1.bf16.msra.mxu0 %v5880_v1  ;;  %v5886_v56 = vld [vmem:[#allocation6 + $0x80] ss:$16 sps:$4 sm:$0xff]   ;;  %v5897_v61 = vld [vmem:[#allocation6 + $0xa4] ss:$16 sps:$4 sm:$0xff]  }
 0x42b   :  { %4893 = vst.msk [vmem:[%s8005_s19 + $0x58] sm:$0xff] %vm4881_vm9, %v7094_v33  ;;  %2604 = vrot.lane.b32.xlu1 %v6058_v4, %s6219_s2  ;;  %v6060_v7 = vpop.eup %6059  ;;  %v2525_v44 = vmul.f32 0.5, %v7094_v33  ;;  %v2550_v8 = vmul.f32 1.442695, %v2524_v21  ;;  %3094 = vmatprep.subr.bf16.mxu0 %v5888_v49  ;;  %v5895_v4 = vld [vmem:[#allocation6 + $0xa0] ss:$16 sps:$4 sm:$0xff]  }
 0x42c   :  { %v2546_v26 = vmul.f32 1.442695, %v2522_v43  ;;  %v2523_v15 = vmul.f32 0.5, %v7105_v11  ;;  %4891 = vst.msk [vmem:[%s8005_s19 + $0x48] sm:$0xff] %vm4881_vm9, %v7105_v11  ;;  %v6062_v14 = vpop.eup %6061  ;;  %v5906_v21 = vld [vmem:[#allocation6 + $0xc4] ss:$16 sps:$4 sm:$0xff]  }
 0x42d   :  { %2606 = vrot.lane.b32.xlu0 %v6060_v7, %s6219_s2  ;;  %v2552_v50 = vmul.f32 1.442695, %v2525_v44  ;;  %v5904_v43 = vld [vmem:[#allocation6 + $0xc0] ss:$16 sps:$4 sm:$0xff]  }
 0x42e   :  { %6063 = vpow2.f32 %v2546_v26  ;;  %v2548_v24 = vmul.f32 1.442695, %v2523_v15  ;;  %3095 = vmatpush1.bf16.msra.mxu0 %v5886_v56  ;;  %v2562_v26 = vld [vmem:[%s8017_s25] sm:$0xff]  ;;  %v2564_v15 = vld [vmem:[%s8017_s25 + $0x10] sm:$0xff] }
 0x42f   :  { %2608 = vrot.lane.b32.xlu1 %v6062_v14, %s6219_s2  ;;  %3096 = vmatprep.subr.bf16.mxu0 %v5897_v61  ;;  %v2565_v14 = vld [vmem:[%s8017_s25 + $0x18] sm:$0xff] }
 0x430   :  { %6065 = vpow2.f32 %v2548_v24  ;;  %v5901_v61 = vld [vmem:[#allocation6 + $0x88] ss:$16 sps:$4 sm:$0xff]  }
 0x431   :  { %6067 = vpow2.f32 %v2550_v8  ;;  %v2563_v8 = vld [vmem:[%s8017_s25 + $0x8] sm:$0xff] }
 0x432   :  { %6069 = vpow2.f32 %v2552_v50  ;;  %3097 = vmatpush1.bf16.msra.mxu0 %v5895_v4  ;;  %v5909_v4 = vld [vmem:[#allocation6 + $0xac] ss:$16 sps:$4 sm:$0xff]  }
 0x433   :  { %3098 = vmatprep.subr.bf16.mxu0 %v5906_v21  ;;  %v5907_v21 = vld [vmem:[#allocation6 + $0xa8] ss:$16 sps:$4 sm:$0xff]  }
 0x436   :  { %v5487_v25 = vpop.f32.mrb[76].mxu1  ;;  %3099 = vmatpush1.bf16.msra.mxu0 %v5904_v43 }
 0x437   :  { %v7123_v17 = vadd.f32 %v5487_v25, %v7004_v27  ;;  %v2499_v29 = vpop.f32.mrb[77].mxu1 }
 0x438   :  { %v6064_v58 = vpop.eup %6063  ;;  %v7126_v28 = vadd.f32 %v7004_v27, %v2499_v29  ;;  %v5488_v32 = vpop.f32.mrb[78].mxu1 }
 0x439   :  { %4896 = vst.msk [vmem:[%s8005_s19 + $0x70] sm:$0xff] %vm4881_vm9, %v7123_v17  ;;  %v7134_v42 = vadd.f32 %v5488_v32, %v7004_v27  ;;  %v2502_v19 = vpop.f32.mrb[79].mxu1  ;;  %2610 = vrot.lane.b32.xlu0 %v6064_v58, %s6219_s2  ;;  %v2528_v34 = vmul.f32 0.5, %v7123_v17 }
 0x43a   :  { %v6066_v36 = vpop.eup %6065  ;;  %v2526_v22 = vmul.f32 0.5, %v7126_v28  ;;  %4894 = vst.msk [vmem:[%s8005_s19 + $0x60] sm:$0xff] %vm4881_vm9, %v7126_v28  ;;  %v7145_v2 = vadd.f32 %v7004_v27, %v2502_v19 }
 0x43b   :  { %4897 = vst.msk [vmem:[%s8005_s19 + $0x78] sm:$0xff] %vm4881_vm9, %v7134_v42  ;;  %2612 = vrot.lane.b32.xlu1 %v6066_v36, %s6219_s2  ;;  %v6068_v55 = vpop.eup %6067  ;;  %v2529_v63 = vmul.f32 0.5, %v7134_v42  ;;  %v2558_v31 = vmul.f32 1.442695, %v2528_v34 }
 0x43c   :  { %v2554_v13 = vmul.f32 1.442695, %v2526_v22  ;;  %v2527_v45 = vmul.f32 0.5, %v7145_v2  ;;  %4895 = vst.msk [vmem:[%s8005_s19 + $0x68] sm:$0xff] %vm4881_vm9, %v7145_v2  ;;  %v6070_v27 = vpop.eup %6069 }
 0x43d   :  { %2614 = vrot.lane.b32.xlu0 %v6068_v55, %s6219_s2  ;;  %v2560_v18 = vmul.f32 1.442695, %v2529_v63 }
 0x43e   :  { %6071 = vpow2.f32 %v2554_v13  ;;  %v2556_v52 = vmul.f32 1.442695, %v2527_v45  ;;  %v5883_v13 = vld [vmem:[#allocation6 + $0x8] ss:$16 sps:$4 sm:$0xff]   ;;  %v5891_v45 = vld [vmem:[#allocation6 + $0x2c] ss:$16 sps:$4 sm:$0xff]  }
 0x43f   :  { %2616 = vrot.lane.b32.xlu1 %v6070_v27, %s6219_s2  ;;  %v5889_v27 = vld [vmem:[#allocation6 + $0x28] ss:$16 sps:$4 sm:$0xff]  }
 0x440   :  { %6073 = vpow2.f32 %v2556_v52  ;;  %v5892_v52 = vld [vmem:[#allocation6 + $0x48] ss:$16 sps:$4 sm:$0xff]  }
 0x441   :  { %6075 = vpow2.f32 %v2558_v31 }
 0x442   :  { %6077 = vpow2.f32 %v2560_v18 }
 0x448   :  { %v6072_v53 = vpop.eup %6071 }
 0x449   :  { %2618 = vrot.lane.b32.xlu0 %v6072_v53, %s6219_s2  ;;  %v2568_v53 = vld [vmem:[%s8017_s25 + $0x30] sm:$0xff] }
 0x44a   :  { %v6074_v5 = vpop.eup %6073 }
 0x44b   :  { %2620 = vrot.lane.b32.xlu1 %v6074_v5, %s6219_s2  ;;  %v6076_v59 = vpop.eup %6075  ;;  %v2569_v5 = vld [vmem:[%s8017_s25 + $0x38] sm:$0xff] }
 0x44c   :  { %v6078_v54 = vpop.eup %6077 }
 0x44d   :  { %2622 = vrot.lane.b32.xlu0 %v6076_v59, %s6219_s2 }
 0x44f   :  { %2624 = vrot.lane.b32.xlu1 %v6078_v54, %s6219_s2 }
 0x48a   :  { %v2599_v7 = vpop.permute.xlu1 %2598 }
 0x48b   :  { %v2595_v44 = vpop.permute.xlu0 %2594  ;;  %v2644_v25 = vmul.f32 %v2599_v7, %v2564_v15 }
 0x48c   :  { %v2642_v24 = vmul.f32 %v2595_v44, %v2562_v26  ;;  %v2572_v26 = vld [vmem:[%s8017_s25 + $0x50] sm:$0xff] }
 0x48d   :  { %v2660_v22 = vadd.f32 %v2644_v25, %v7007_v20  ;;  %v2567_v20 = vld [vmem:[%s8017_s25 + $0x28] sm:$0xff] }
 0x48e   :  { %v2601_v50 = vpop.permute.xlu1 %2600  ;;  %v2658_v36 = vadd.f32 %v2642_v24, %v7010_v41  ;;  %v5894_v41 = vld [vmem:[#allocation6 + $0x4c] ss:$16 sps:$4 sm:$0xff]  }
 0x48f   :  { %v2645_v29 = vmul.f32 %v2601_v50, %v2565_v14  ;;  %v2597_v58 = vpop.permute.xlu0 %2596  ;;  %v2573_v14 = vld [vmem:[%s8017_s25 + $0x58] sm:$0xff] }
 0x490   :  { %v2643_v32 = vmul.f32 %v2597_v58, %v2563_v8 }
 0x491   :  { %v2661_v19 = vadd.f32 %v2645_v29, %v7019_v60  ;;  %v2566_v60 = vld [vmem:[%s8017_s25 + $0x20] sm:$0xff] }
 0x492   :  { %v2659_v34 = vadd.f32 %v2643_v32, %v7028_v12 }
 0x493   :  { %v2675_v63 = vpack.c.bf16 %v2661_v19, %v2660_v22 }
 0x494   :  { %v2674_v55 = vpack.c.bf16 %v2659_v34, %v2658_v36  ;;  %v2574_v34 = vld [vmem:[%s8017_s25 + $0x60] sm:$0xff] }
 0x496   :  { %5491 = vmatprep.mubr.msk.bf16.mxu1 %vm2690_vm10, %v2674_v55 }
 0x497   :  { %5492 = vmatmul.mubr.msk.bf16.vlgmr.msra.gmra.mrb[80].mxu1 %vm2690_vm10, %v2675_v63  ;;  %v2577_v63 = vld [vmem:[%s8017_s25 + $0x78] sm:$0xff] }
 0x498   :  { %3200 = vmatpush1.bf16.msra.mxu1 %v5883_v13 }
 0x499   :  { %3201 = vmatprep.subr.bf16.mxu1 %v5891_v45 }
 0x49b   :  { %v2603_v12 = vpop.permute.xlu0 %2602 }
 0x49c   :  { %v2646_v31 = vmul.f32 %v2603_v12, %v2566_v60  ;;  %3202 = vmatpush1.bf16.msra.mxu1 %v5889_v27 }
 0x49d   :  { %v2605_v18 = vpop.permute.xlu1 %2604  ;;  %3203 = vmatprep.subr.bf16.mxu1 %v5894_v41 }
 0x49e   :  { %v2647_v30 = vmul.f32 %v2605_v18, %v2567_v20  ;;  %v2662_v23 = vadd.f32 %v2646_v31, %v7046_v48 }
 0x49f   :  { %v2607_v37 = vpop.permute.xlu0 %2606 }
 0x4a0   :  { %v2663_v51 = vadd.f32 %v2647_v30, %v7066_v39  ;;  %v2648_v59 = vmul.f32 %v2607_v37, %v2568_v53  ;;  %3204 = vmatpush1.bf16.msra.mxu1 %v5892_v52  ;;  %v2570_v39 = vld [vmem:[%s8017_s25 + $0x40] sm:$0xff]  ;;  %v5912_v53 = vld [vmem:[#allocation6 + $0xcc] ss:$16 sps:$4 sm:$0xff]   ;;  %v5916_v37 = vld [vmem:[#allocation6 + $0xe8] ss:$16 sps:$4 sm:$0xff]  }
 0x4a1   :  { %v2609_v54 = vpop.permute.xlu1 %2608  ;;  %3205 = vmatprep.subr.bf16.mxu1 %v5900_v10  ;;  %v5910_v10 = vld [vmem:[#allocation6 + $0xc8] ss:$16 sps:$4 sm:$0xff]   ;;  %v5913_v30 = vld [vmem:[#allocation6 + $0xe0] ss:$16 sps:$4 sm:$0xff]  }
 0x4a2   :  { %v2676_v3 = vpack.c.bf16 %v2663_v51, %v2662_v23  ;;  %v2649_v1 = vmul.f32 %v2609_v54, %v2569_v5  ;;  %v2664_v49 = vadd.f32 %v2648_v59, %v7043_v47  ;;  %v2571_v47 = vld [vmem:[%s8017_s25 + $0x48] sm:$0xff]  ;;  %v7248_v5 = vld [vmem:[%s7997_s11] ss:$0 sm:$0xff] }
 0x4a4   :  { %v2665_v56 = vadd.f32 %v2649_v1, %v7055_v6  ;;  %5495 = vmatprep.mubr.msk.bf16.mxu1 %vm2690_vm10, %v2676_v3  ;;  %3206 = vmatpush1.bf16.msra.mxu1 %v5898_v9 }
 0x4a5   :  { %3207 = vmatprep.subr.bf16.mxu1 %v5903_v16 }
 0x4a6   :  { %v2677_v48 = vpack.c.bf16 %v2665_v56, %v2664_v49 }
 0x4a8   :  { %5496 = vmatmul.mubr.msk.bf16.gmra.mrb[84].mxu1 %vm2690_vm10, %v2677_v48 }
 0x4a9   :  { %3208 = vmatpush1.bf16.msra.mxu1 %v5901_v61 }
 0x4aa   :  { %3209 = vmatprep.subr.bf16.mxu1 %v5909_v4 }
 0x4ab   :  { %v2611_v43 = vpop.permute.xlu0 %2610 }
 0x4ac   :  { %v2650_v6 = vmul.f32 %v2611_v43, %v2570_v39 }
 0x4ad   :  { %v2613_v7 = vpop.permute.xlu1 %2612  ;;  %3210 = vmatpush1.bf16.msra.mxu1 %v5907_v21 }
 0x4ae   :  { %v2651_v44 = vmul.f32 %v2613_v7, %v2571_v47  ;;  %v2666_v8 = vadd.f32 %v2650_v6, %v7086_v62  ;;  %3211 = vmatprep.subr.bf16.mxu1 %v5912_v53  ;;  %v5919_v7 = vld [vmem:[%s8000_s14] ss:$16 sps:$4 sm:$0xff]  }
 0x4af   :  { %v2615_v15 = vpop.permute.xlu0 %2614 }
 0x4b0   :  { %v2667_v24 = vadd.f32 %v2651_v44, %v7105_v11  ;;  %v2652_v50 = vmul.f32 %v2615_v15, %v2572_v26  ;;  %v2575_v11 = vld [vmem:[%s8017_s25 + $0x68] sm:$0xff]  ;;  %v5927_v44 = vld [vmem:[%s8000_s14 + $0x24] ss:$16 sps:$4 sm:$0xff]  }
 0x4b1   :  { %v2617_v25 = vpop.permute.xlu1 %2616  ;;  %3212 = vmatpush1.bf16.msra.mxu1 %v5910_v10  ;;  %v5922_v26 = vld [vmem:[%s8000_s14 + $0x8] ss:$16 sps:$4 sm:$0xff]   ;;  %v5930_v15 = vld [vmem:[%s8000_s14 + $0x2c] ss:$16 sps:$4 sm:$0xff]  }
 0x4b2   :  { %v2678_v29 = vpack.c.bf16 %v2667_v24, %v2666_v8  ;;  %v2653_v58 = vmul.f32 %v2617_v25, %v2573_v14  ;;  %v2668_v32 = vadd.f32 %v2652_v50, %v7083_v35  ;;  %v2576_v35 = vld [vmem:[%s8017_s25 + $0x70] sm:$0xff]  ;;  %v5928_v8 = vld [vmem:[%s8000_s14 + $0x28] ss:$16 sps:$4 sm:$0xff]   ;;  %v5936_v50 = vld [vmem:[%s8000_s14 + $0x4c] ss:$16 sps:$4 sm:$0xff]  }
 0x4b3   :  { %v5925_v14 = vld [vmem:[%s8000_s14 + $0x20] ss:$16 sps:$4 sm:$0xff]   ;;  %v5933_v24 = vld [vmem:[%s8000_s14 + $0x44] ss:$16 sps:$4 sm:$0xff]  }
 0x4b4   :  { %v2669_v19 = vadd.f32 %v2653_v58, %v7094_v33  ;;  %5499 = vmatprep.mubr.msk.bf16.mxu1 %vm2690_vm10, %v2678_v29  ;;  %v5931_v29 = vld [vmem:[%s8000_s14 + $0x40] ss:$16 sps:$4 sm:$0xff]   ;;  %v5934_v58 = vld [vmem:[%s8000_s14 + $0x48] ss:$16 sps:$4 sm:$0xff]  }
 0x4b6   :  { %v2679_v36 = vpack.c.bf16 %v2669_v19, %v2668_v32 }
 0x4b8   :  { %5500 = vmatmul.mubr.msk.bf16.gmra.mrb[88].mxu1 %vm2690_vm10, %v2679_v36  ;;  %v5939_v36 = vld [vmem:[%s8000_s14 + $0x64] ss:$16 sps:$4 sm:$0xff]  }
 0x4bb   :  { %v2619_v62 = vpop.permute.xlu0 %2618 }
 0x4bc   :  { %v2654_v22 = vmul.f32 %v2619_v62, %v2574_v34  ;;  %v5942_v34 = vld [vmem:[%s8000_s14 + $0x6c] ss:$16 sps:$4 sm:$0xff]  }
 0x4bd   :  { %v2621_v55 = vpop.permute.xlu1 %2620 }
 0x4be   :  { %v2655_v33 = vmul.f32 %v2621_v55, %v2575_v11  ;;  %v2670_v45 = vadd.f32 %v2654_v22, %v7126_v28  ;;  %v5915_v28 = vld [vmem:[#allocation6 + $0xe4] ss:$16 sps:$4 sm:$0xff]   ;;  %v5937_v22 = vld [vmem:[%s8000_s14 + $0x60] ss:$16 sps:$4 sm:$0xff]  }
 0x4bf   :  { %v2623_v13 = vpop.permute.xlu0 %2622  ;;  %3100 = vmatprep.subr.bf16.mxu0 %v5915_v28  ;;  %v5943_v28 = vld [vmem:[%s8000_s14 + $0x80] ss:$16 sps:$4 sm:$0xff]  }
 0x4c0   :  { %v2671_v27 = vadd.f32 %v2655_v33, %v7145_v2  ;;  %v2656_v60 = vmul.f32 %v2623_v13, %v2576_v35  ;;  %v5918_v2 = vld [vmem:[#allocation6 + $0xec] ss:$16 sps:$4 sm:$0xff]   ;;  %3101 = vmatpush1.bf16.msra.mxu0 %v5913_v30  ;;  %v5940_v13 = vld [vmem:[%s8000_s14 + $0x68] ss:$16 sps:$4 sm:$0xff]   ;;  %v5951_v30 = vld [vmem:[%s8000_s14 + $0xa4] ss:$16 sps:$4 sm:$0xff]  }
 0x4c1   :  { %v2625_v41 = vpop.permute.xlu1 %2624  ;;  %3213 = vmatprep.subr.bf16.mxu1 %v5918_v2  ;;  %v5946_v2 = vld [vmem:[%s8000_s14 + $0x88] ss:$16 sps:$4 sm:$0xff]  }
 0x4c2   :  { %v2680_v12 = vpack.c.bf16 %v2671_v27, %v2670_v45  ;;  %v2657_v20 = vmul.f32 %v2625_v41, %v2577_v63  ;;  %v2672_v31 = vadd.f32 %v2656_v60, %v7123_v17  ;;  %3214 = vmatpush1.bf16.msra.mxu1 %v5916_v37  ;;  %v5921_v17 = vld [vmem:[%s8000_s14 + $0x4] ss:$16 sps:$4 sm:$0xff]   ;;  %v5948_v41 = vld [vmem:[%s8000_s14 + $0x8c] ss:$16 sps:$4 sm:$0xff]  }
 0x4c3   :  { %3862 = vmatprep.subr.bf16.mxu0 %v5921_v17  ;;  %v5945_v27 = vld [vmem:[%s8000_s14 + $0x84] ss:$16 sps:$4 sm:$0xff]   ;;  %v5954_v37 = vld [vmem:[%s8000_s14 + $0xac] ss:$16 sps:$4 sm:$0xff]   ;;  %v5949_v17 = vld [vmem:[%s8000_s14 + $0xa0] ss:$16 sps:$4 sm:$0xff]  }
 0x4c4   :  { %v2673_v52 = vadd.f32 %v2657_v20, %v7134_v42  ;;  %5503 = vmatprep.mubr.msk.bf16.mxu1 %vm2690_vm10, %v2680_v12  ;;  %v5924_v42 = vld [vmem:[%s8000_s14 + $0xc] ss:$16 sps:$4 sm:$0xff]  }
 0x4c5   :  { %3975 = vmatprep.subr.bf16.mxu1 %v5924_v42  ;;  %v5952_v42 = vld [vmem:[%s8000_s14 + $0xa8] ss:$16 sps:$4 sm:$0xff]  }
 0x4c6   :  { %v2681_v18 = vpack.c.bf16 %v2673_v52, %v2672_v31 }
 0x4c8   :  { %5504 = vmatmul.mubr.msk.bf16.gmra.mrb[92].mxu1 %vm2690_vm10, %v2681_v18 }
 0x4c9   :  { %3231 = vmatprep.mubr.bf16.mxu1 %v6218_v0 }
 0x56a   :  { %v5493_v23 = vpop.f32.mrb[80].mxu1 }
 0x56b   :  { %v2762_v51 = vadd.f32 %v5493_v23, %v7248_v5  ;;  %v2753_v59 = vpop.f32.mrb[81].mxu1  ;;  %v5957_v23 = vld [vmem:[%s8000_s14 + $0xc4] ss:$16 sps:$4 sm:$0xff]  }
 0x56c   :  { %v2754_v9 = vadd.f32 %v7248_v5, %v2753_v59  ;;  %v5494_v54 = vpop.f32.mrb[82].mxu1 }
 0x56d   :  { %v2834_v16 = vmul.f32 0.2, %v2762_v51  ;;  %v2765_v3 = vadd.f32 %v5494_v54, %v7248_v5  ;;  %v2756_v1 = vpop.f32.mrb[83].mxu1  ;;  %vm2818_vm11 = vcmp.gt.f32.partialorder %v2762_v51, 0.0 }
 0x56e   :  { %v2832_v49 = vmul.f32 0.2, %v2754_v9  ;;  %v2757_v56 = vadd.f32 %v7248_v5, %v2756_v1  ;;  %vm2816_vm12 = vcmp.gt.f32.partialorder %v2754_v9, 0.0 }
 0x56f   :  { %vm2819_vm13 = vcmp.gt.f32.partialorder %v2765_v3, 0.0  ;;  %v2835_v61 = vmul.f32 0.2, %v2765_v3  ;;  %v2850_v4 = vsel %vm2818_vm11, %v2762_v51, %v2834_v16  ;;  %v5960_v51 = vld [vmem:[%s8000_s14 + $0xcc] ss:$16 sps:$4 sm:$0xff]  }
 0x570   :  { %vm2817_vm14 = vcmp.gt.f32.partialorder %v2757_v56, 0.0  ;;  %v2833_v48 = vmul.f32 0.2, %v2757_v56  ;;  %v2848_v21 = vsel %vm2816_vm12, %v2754_v9, %v2832_v49  ;;  %v5955_v16 = vld [vmem:[%s8000_s14 + $0xc0] ss:$16 sps:$4 sm:$0xff]  }
 0x571   :  { %v2851_v39 = vsel %vm2819_vm13, %v2765_v3, %v2835_v61  ;;  %v5958_v3 = vld [vmem:[%s8000_s14 + $0xc8] ss:$16 sps:$4 sm:$0xff]   ;;  %v5966_v61 = vld [vmem:[%s8000_s14 + $0xec] ss:$16 sps:$4 sm:$0xff]  }
 0x572   :  { %v2849_v43 = vsel %vm2817_vm14, %v2757_v56, %v2833_v48  ;;  %v2865_v47 = vpack.c.bf16 %v2851_v39, %v2850_v4  ;;  %v5963_v56 = vld [vmem:[%s8000_s14 + $0xe4] ss:$16 sps:$4 sm:$0xff]  }
 0x573   :  { %v2864_v6 = vpack.c.bf16 %v2849_v43, %v2848_v21  ;;  %v5961_v21 = vld [vmem:[%s8000_s14 + $0xe0] ss:$16 sps:$4 sm:$0xff]  }
 0x575   :  { %3119 = vmatmul.mubr.bf16.vlgmr.msra.gmra.mrb[96].mxu0 %v2864_v6  ;;  %3232 = vmatmul.mubr.bf16.vlgmr.msra.gmra.mrb[96].mxu1 %v2864_v6  ;;  %v5964_v6 = vld [vmem:[%s8000_s14 + $0xe8] ss:$16 sps:$4 sm:$0xff]  }
 0x576   :  { %3128 = vmatprep.mubr.bf16.mxu0 %v6218_v0  ;;  %3241 = vmatprep.mubr.bf16.mxu1 %v6218_v0 }
 0x577   :  { %3863 = vmatpush1.bf16.msra.mxu0 %v5919_v7  ;;  %3976 = vmatpush1.bf16.msra.mxu1 %v5922_v26  ;;  %v5969_v26 = vld [vmem:[%s8000_s14 + $0x104] ss:$16 sps:$4 sm:$0xff]  }
 0x578   :  { %3864 = vmatprep.subr.bf16.mxu0 %v5927_v44  ;;  %3977 = vmatprep.subr.bf16.mxu1 %v5930_v15  ;;  %v5972_v15 = vld [vmem:[%s8000_s14 + $0x10c] ss:$16 sps:$4 sm:$0xff]  }
 0x57b   :  { %v5497_v25 = vpop.f32.mrb[84].mxu1  ;;  %3865 = vmatpush1.bf16.msra.mxu0 %v5925_v14  ;;  %3978 = vmatpush1.bf16.msra.mxu1 %v5928_v8 }
 0x57c   :  { %v2778_v32 = vadd.f32 %v5497_v25, %v7248_v5  ;;  %v2769_v19 = vpop.f32.mrb[85].mxu1  ;;  %3866 = vmatprep.subr.bf16.mxu0 %v5933_v24  ;;  %3979 = vmatprep.subr.bf16.mxu1 %v5936_v50 }
 0x57d   :  { %v2770_v62 = vadd.f32 %v7248_v5, %v2769_v19  ;;  %v5498_v11 = vpop.f32.mrb[86].mxu1  ;;  %3129 = vmatmul.mubr.bf16.gmra.mrb[100].mxu0 %v2865_v47  ;;  %3242 = vmatmul.mubr.bf16.gmra.mrb[100].mxu1 %v2865_v47  ;;  %v5975_v19 = vld [vmem:[%s8000_s14 + $0x124] ss:$16 sps:$4 sm:$0xff]  }
 0x57e   :  { %v2838_v55 = vmul.f32 0.2, %v2778_v32  ;;  %v2781_v35 = vadd.f32 %v5498_v11, %v7248_v5  ;;  %v2772_v33 = vpop.f32.mrb[87].mxu1  ;;  %3138 = vmatprep.mubr.bf16.mxu0 %v6218_v0  ;;  %3251 = vmatprep.mubr.bf16.mxu1 %v6218_v0  ;;  %vm2822_vm15 = vcmp.gt.f32.partialorder %v2778_v32, 0.0  ;;  %v5981_v11 = vld [vmem:[%s8000_s14 + $0x144] ss:$16 sps:$4 sm:$0xff]  }
 0x57f   :  { %v2836_v63 = vmul.f32 0.2, %v2770_v62  ;;  %v2773_v45 = vadd.f32 %v7248_v5, %v2772_v33  ;;  %3867 = vmatpush1.bf16.msra.mxu0 %v5931_v29  ;;  %3980 = vmatpush1.bf16.msra.mxu1 %v5934_v58  ;;  %vm2820_vm1 = vcmp.gt.f32.partialorder %v2770_v62, 0.0  ;;  %v5967_v58 = vld [vmem:[%s8000_s14 + $0x100] ss:$16 sps:$4 sm:$0xff]  }
 0x580   :  { %vm2823_vm2 = vcmp.gt.f32.partialorder %v2781_v35, 0.0  ;;  %v2839_v60 = vmul.f32 0.2, %v2781_v35  ;;  %3868 = vmatprep.subr.bf16.mxu0 %v5939_v36  ;;  %3981 = vmatprep.subr.bf16.mxu1 %v5942_v34  ;;  %v2854_v20 = vsel %vm2822_vm15, %v2778_v32, %v2838_v55  ;;  %v5970_v32 = vld [vmem:[%s8000_s14 + $0x108] ss:$16 sps:$4 sm:$0xff]  }
 0x581   :  { %vm2821_vm3 = vcmp.gt.f32.partialorder %v2773_v45, 0.0  ;;  %v2837_v12 = vmul.f32 0.2, %v2773_v45  ;;  %v2852_v52 = vsel %vm2820_vm1, %v2770_v62, %v2836_v63  ;;  %v5978_v36 = vld [vmem:[%s8000_s14 + $0x12c] ss:$16 sps:$4 sm:$0xff]  }
 0x582   :  { %v2855_v31 = vsel %vm2823_vm2, %v2781_v35, %v2839_v60  ;;  %v5973_v34 = vld [vmem:[%s8000_s14 + $0x120] ss:$16 sps:$4 sm:$0xff]   ;;  %v5976_v62 = vld [vmem:[%s8000_s14 + $0x128] ss:$16 sps:$4 sm:$0xff]   ;;  %v5987_v60 = vld [vmem:[%s8000_s14 + $0x164] ss:$16 sps:$4 sm:$0xff]  }
 0x583   :  { %v2853_v18 = vsel %vm2821_vm3, %v2773_v45, %v2837_v12  ;;  %v2867_v53 = vpack.c.bf16 %v2855_v31, %v2854_v20  ;;  %3869 = vmatpush1.bf16.msra.mxu0 %v5937_v22  ;;  %3982 = vmatpush1.bf16.msra.mxu1 %v5940_v13  ;;  %v5984_v22 = vld [vmem:[%s8000_s14 + $0x14c] ss:$16 sps:$4 sm:$0xff]   ;;  %v5979_v13 = vld [vmem:[%s8000_s14 + $0x140] ss:$16 sps:$4 sm:$0xff]   ;;  %v5982_v63 = vld [vmem:[%s8000_s14 + $0x148] ss:$16 sps:$4 sm:$0xff]  }
 0x584   :  { %v2866_v10 = vpack.c.bf16 %v2853_v18, %v2852_v52  ;;  %3870 = vmatprep.subr.bf16.mxu0 %v5945_v27  ;;  %3983 = vmatprep.subr.bf16.mxu1 %v5948_v41  ;;  %v5990_v41 = vld [vmem:[%s8000_s14 + $0x16c] ss:$16 sps:$4 sm:$0xff]   ;;  %v5985_v52 = vld [vmem:[%s8000_s14 + $0x160] ss:$16 sps:$4 sm:$0xff]  }
 0x586   :  { %3139 = vmatmul.mubr.bf16.gmra.mrb[104].mxu0 %v2866_v10  ;;  %3252 = vmatmul.mubr.bf16.gmra.mrb[104].mxu1 %v2866_v10  ;;  %v5988_v10 = vld [vmem:[%s8000_s14 + $0x168] ss:$16 sps:$4 sm:$0xff]  }
 0x587   :  { %3148 = vmatprep.mubr.bf16.mxu0 %v6218_v0  ;;  %3261 = vmatprep.mubr.bf16.mxu1 %v6218_v0 }
 0x588   :  { %3871 = vmatpush1.bf16.msra.mxu0 %v5943_v28  ;;  %3984 = vmatpush1.bf16.msra.mxu1 %v5946_v2  ;;  %v5993_v2 = vld [vmem:[%s8000_s14 + $0x184] ss:$16 sps:$4 sm:$0xff]  }
 0x589   :  { %3872 = vmatprep.subr.bf16.mxu0 %v5951_v30  ;;  %3985 = vmatprep.subr.bf16.mxu1 %v5954_v37 }
 0x58b   :  { %v5501_v59 = vpop.f32.mrb[88].mxu1 }
 0x58c   :  { %v2794_v9 = vadd.f32 %v5501_v59, %v7248_v5  ;;  %v2785_v54 = vpop.f32.mrb[89].mxu1  ;;  %3873 = vmatpush1.bf16.msra.mxu0 %v5949_v17  ;;  %3986 = vmatpush1.bf16.msra.mxu1 %v5952_v42 }
 0x58d   :  { %v2786_v1 = vadd.f32 %v7248_v5, %v2785_v54  ;;  %v5502_v49 = vpop.f32.mrb[90].mxu1  ;;  %3874 = vmatprep.subr.bf16.mxu0 %v5957_v23  ;;  %3987 = vmatprep.subr.bf16.mxu1 %v5960_v51  ;;  %v5994_v54 = vld [vmem:[%s8000_s14 + $0x188] ss:$16 sps:$4 sm:$0xff]  }
 0x58e   :  { %v2842_v48 = vmul.f32 0.2, %v2794_v9  ;;  %v2797_v4 = vadd.f32 %v5502_v49, %v7248_v5  ;;  %v2788_v39 = vpop.f32.mrb[91].mxu1  ;;  %3149 = vmatmul.mubr.bf16.gmra.mrb[108].mxu0 %v2867_v53  ;;  %3262 = vmatmul.mubr.bf16.gmra.mrb[108].mxu1 %v2867_v53  ;;  %vm2826_vm4 = vcmp.gt.f32.partialorder %v2794_v9, 0.0  ;;  %v6005_v49 = vld [vmem:[%s8000_s14 + $0x1c4] ss:$16 sps:$4 sm:$0xff]  }
 0x58f   :  { %v2840_v43 = vmul.f32 0.2, %v2786_v1  ;;  %v2789_v47 = vadd.f32 %v7248_v5, %v2788_v39  ;;  %3158 = vmatprep.mubr.bf16.mxu0 %v6218_v0  ;;  %3271 = vmatprep.mubr.bf16.mxu1 %v6218_v0  ;;  %vm2824_vm5 = vcmp.gt.f32.partialorder %v2786_v1, 0.0  ;;  %v6014_v39 = vld [vmem:[%s8000_s14 + $0x1ec] ss:$16 sps:$4 sm:$0xff]  }
 0x590   :  { %vm2827_vm6 = vcmp.gt.f32.partialorder %v2797_v4, 0.0  ;;  %v2843_v7 = vmul.f32 0.2, %v2797_v4  ;;  %3875 = vmatpush1.bf16.msra.mxu0 %v5955_v16  ;;  %3988 = vmatpush1.bf16.msra.mxu1 %v5958_v3  ;;  %v2858_v14 = vsel %vm2826_vm4, %v2794_v9, %v2842_v48  ;;  %v5991_v9 = vld [vmem:[%s8000_s14 + $0x180] ss:$16 sps:$4 sm:$0xff]  }
 0x591   :  { %vm2825_vm7 = vcmp.gt.f32.partialorder %v2789_v47, 0.0  ;;  %v2841_v44 = vmul.f32 0.2, %v2789_v47  ;;  %3876 = vmatprep.subr.bf16.mxu0 %v5963_v56  ;;  %3989 = vmatprep.subr.bf16.mxu1 %v5966_v61  ;;  %v2856_v24 = vsel %vm2824_vm5, %v2786_v1, %v2840_v43  ;;  %v5999_v16 = vld [vmem:[%s8000_s14 + $0x1a4] ss:$16 sps:$4 sm:$0xff]  }
 0x592   :  { %v2859_v8 = vsel %vm2827_vm6, %v2797_v4, %v2843_v7  ;;  %v6002_v3 = vld [vmem:[%s8000_s14 + $0x1ac] ss:$16 sps:$4 sm:$0xff]   ;;  %v5997_v1 = vld [vmem:[%s8000_s14 + $0x1a0] ss:$16 sps:$4 sm:$0xff]   ;;  %v6006_v48 = vld [vmem:[%s8000_s14 + $0x1c8] ss:$16 sps:$4 sm:$0xff]  }
 0x593   :  { %v2857_v50 = vsel %vm2825_vm7, %v2789_v47, %v2841_v44  ;;  %v2869_v25 = vpack.c.bf16 %v2859_v8, %v2858_v14  ;;  %v6008_v56 = vld [vmem:[%s8000_s14 + $0x1cc] ss:$16 sps:$4 sm:$0xff]   ;;  %v6003_v61 = vld [vmem:[%s8000_s14 + $0x1c0] ss:$16 sps:$4 sm:$0xff]   ;;  %v6011_v4 = vld [vmem:[%s8000_s14 + $0x1e4] ss:$16 sps:$4 sm:$0xff]  }
 0x594   :  { %v2868_v29 = vpack.c.bf16 %v2857_v50, %v2856_v24  ;;  %3877 = vmatpush1.bf16.msra.mxu0 %v5961_v21  ;;  %3990 = vmatpush1.bf16.msra.mxu1 %v5964_v6  ;;  %v6009_v21 = vld [vmem:[%s8000_s14 + $0x1e0] ss:$16 sps:$4 sm:$0xff]   ;;  %v6012_v43 = vld [vmem:[%s8000_s14 + $0x1e8] ss:$16 sps:$4 sm:$0xff]  }
 0x595   :  { %3878 = vmatprep.subr.bf16.mxu0 %v5969_v26  ;;  %3991 = vmatprep.subr.bf16.mxu1 %v5972_v15  ;;  %v6015_v47 = vld [vmem:[%s8002_s16 + $0x40] sm:$0xff]  }
 0x596   :  { %3159 = vmatmul.mubr.bf16.gmra.mrb[112].mxu0 %v2868_v29  ;;  %3272 = vmatmul.mubr.bf16.gmra.mrb[112].mxu1 %v2868_v29  ;;  %v6017_v6 = vld [vmem:[%s8002_s16 + $0xc0] sm:$0xff]  }
 0x597   :  { %3168 = vmatprep.mubr.bf16.mxu0 %v6218_v0  ;;  %3281 = vmatprep.mubr.bf16.mxu1 %v6218_v0  ;;  %v2904_v7 = vld [vmem:[%s7999_s13] sm:$0xf] }
 0x598   :  { %3879 = vmatpush1.bf16.msra.mxu0 %v5967_v58  ;;  %3992 = vmatpush1.bf16.msra.mxu1 %v5970_v32  ;;  %v7478_v26 = vrot.slane %v2904_v7, %v6466_v46  ;;  %v7481_v44 = vrot.slane %v2904_v7, %v6474_v57  ;;  %v7484_v15 = vrot.slane %v2904_v7, %v6452_v38 }
 0x599   :  { %3880 = vmatprep.subr.bf16.mxu0 %v5975_v19  ;;  %3993 = vmatprep.subr.bf16.mxu1 %v5978_v36  ;;  %v7487_v24 = vrot.slane %v2904_v7, %v6457_v40  ;;  %v6021_v7 = vld [vmem:[%s8002_s16 + $0xc8] sm:$0xff]  }
 0x59b   :  { %v5505_v55 = vpop.f32.mrb[92].mxu1 }
 0x59c   :  { %v2810_v35 = vadd.f32 %v5505_v55, %v7248_v5  ;;  %v2801_v33 = vpop.f32.mrb[93].mxu1  ;;  %3881 = vmatpush1.bf16.msra.mxu0 %v5973_v34  ;;  %3994 = vmatpush1.bf16.msra.mxu1 %v5976_v62 }
 0x59d   :  { %v2802_v45 = vadd.f32 %v7248_v5, %v2801_v33  ;;  %v5506_v27 = vpop.f32.mrb[94].mxu1  ;;  %3882 = vmatprep.subr.bf16.mxu0 %v5981_v11  ;;  %3995 = vmatprep.subr.bf16.mxu1 %v5984_v22 }
 0x59e   :  { %v2846_v12 = vmul.f32 0.2, %v2810_v35  ;;  %v2813_v20 = vadd.f32 %v5506_v27, %v7248_v5  ;;  %v2804_v31 = vpop.f32.mrb[95].mxu1  ;;  %3169 = vmatmul.mubr.bf16.gmra.mrb[116].mxu0 %v2869_v25  ;;  %3282 = vmatmul.mubr.bf16.gmra.mrb[116].mxu1 %v2869_v25  ;;  %vm2830_vm8 = vcmp.gt.f32.partialorder %v2810_v35, 0.0 }
 0x59f   :  { %v2844_v18 = vmul.f32 0.2, %v2802_v45  ;;  %v2805_v53 = vadd.f32 %v7248_v5, %v2804_v31  ;;  %3178 = vmatprep.mubr.bf16.mxu0 %v6218_v0  ;;  %3291 = vmatprep.mubr.bf16.mxu1 %v6218_v0  ;;  %vm2828_vm9 = vcmp.gt.f32.partialorder %v2802_v45, 0.0  ;;  %v5996_v5 = vld [vmem:[%s8000_s14 + $0x18c] ss:$16 sps:$4 sm:$0xff]  }
 0x5a0   :  { %vm2831_vm10 = vcmp.gt.f32.partialorder %v2813_v20, 0.0  ;;  %v2847_v28 = vmul.f32 0.2, %v2813_v20  ;;  %3883 = vmatpush1.bf16.msra.mxu0 %v5979_v13  ;;  %3996 = vmatpush1.bf16.msra.mxu1 %v5982_v63  ;;  %v2862_v37 = vsel %vm2830_vm8, %v2810_v35, %v2846_v12 }
 0x5a1   :  { %vm2829_vm11 = vcmp.gt.f32.partialorder %v2805_v53, 0.0  ;;  %v2845_v30 = vmul.f32 0.2, %v2805_v53  ;;  %3884 = vmatprep.subr.bf16.mxu0 %v5987_v60  ;;  %3997 = vmatprep.subr.bf16.mxu1 %v5990_v41  ;;  %v2860_v42 = vsel %vm2828_vm9, %v2802_v45, %v2844_v18 }
 0x5a2   :  { %v2863_v17 = vsel %vm2831_vm10, %v2813_v20, %v2847_v28 }
 0x5a3   :  { %v2861_v23 = vsel %vm2829_vm11, %v2805_v53, %v2845_v30  ;;  %v2871_v51 = vpack.c.bf16 %v2863_v17, %v2862_v37 }
 0x5a4   :  { %v2870_v59 = vpack.c.bf16 %v2861_v23, %v2860_v42  ;;  %3885 = vmatpush1.bf16.msra.mxu0 %v5985_v52  ;;  %3998 = vmatpush1.bf16.msra.mxu1 %v5988_v10 }
 0x5a5   :  { %3886 = vmatprep.subr.bf16.mxu0 %v5993_v2  ;;  %3999 = vmatprep.subr.bf16.mxu1 %v5996_v5 }
 0x5a6   :  { %3179 = vmatmul.mubr.bf16.gmra.mrb[120].mxu0 %v2870_v59  ;;  %3292 = vmatmul.mubr.bf16.gmra.mrb[120].mxu1 %v2870_v59 }
 0x5a7   :  { %3188 = vmatprep.mubr.bf16.mxu0 %v6218_v0  ;;  %3301 = vmatprep.mubr.bf16.mxu1 %v6218_v0  ;;  %v6000_v0 = vld [vmem:[%s8000_s14 + $0x1a8] ss:$16 sps:$4 sm:$0xff]  }
 0x5a8   :  { %3887 = vmatpush1.bf16.msra.mxu0 %v5991_v9  ;;  %4000 = vmatpush1.bf16.msra.mxu1 %v5994_v54 }
 0x5a9   :  { %3888 = vmatprep.subr.bf16.mxu0 %v5999_v16  ;;  %4001 = vmatprep.subr.bf16.mxu1 %v6002_v3 }
 0x5ac   :  { %3889 = vmatpush1.bf16.msra.mxu0 %v5997_v1  ;;  %4002 = vmatpush1.bf16.msra.mxu1 %v6000_v0 }
 0x5ad   :  { %3890 = vmatprep.subr.bf16.mxu0 %v6005_v49  ;;  %4003 = vmatprep.subr.bf16.mxu1 %v6008_v56 }
 0x5ae   :  { %3189 = vmatmul.mubr.bf16.gmra.mrb[124].mxu0 %v2871_v51  ;;  %3302 = vmatmul.mubr.bf16.gmra.mrb[124].mxu1 %v2871_v51 }
 0x5b0   :  { %3891 = vmatpush1.bf16.msra.mxu0 %v6003_v61  ;;  %4004 = vmatpush1.bf16.msra.mxu1 %v6006_v48 }
 0x5b1   :  { %3892 = vmatprep.subr.bf16.mxu0 %v6011_v4  ;;  %4005 = vmatprep.subr.bf16.mxu1 %v6014_v39  ;;  %v6016_v4 = vld [vmem:[%s8002_s16] sm:$0xff]  }
 0x5b2   :  { %v6018_v39 = vld [vmem:[%s8002_s16 + $0x80] sm:$0xff]  }
 0x5b4   :  { %3893 = vmatpush1.bf16.msra.mxu0 %v6009_v21  ;;  %4006 = vmatpush1.bf16.msra.mxu1 %v6012_v43 }
 0x5b5   :  { %5329 = vmatprep.subr.bf16.mxu0 %v6015_v47  ;;  %5393 = vmatprep.subr.bf16.mxu1 %v6017_v6  ;;  %v6019_v6 = vld [vmem:[%s8002_s16 + $0x48] sm:$0xff]  }
 0x648   :  { %v3120_v14 = vpop.f32.mrb[96].mxu0  ;;  %v3233_v8 = vpop.f32.mrb[96].mxu1 }
 0x649   :  { %v3234_v50 = vadd.f32 %v3233_v8, %v7478_v26  ;;  %v3122_v25 = vpop.f32.mrb[97].mxu0  ;;  %v3235_v29 = vpop.f32.mrb[97].mxu1  ;;  %v3121_v36 = vadd.f32 %v3120_v14, %v7484_v15 }
 0x64a   :  { %v3236_v58 = vadd.f32 %v3235_v29, %v7481_v44  ;;  %v3124_v32 = vpop.f32.mrb[98].mxu0  ;;  %v3237_v19 = vpop.f32.mrb[98].mxu1  ;;  %v3123_v55 = vadd.f32 %v3122_v25, %v7487_v24 }
 0x64b   :  { %vm3312_vm12 = vcmp.gt.f32.partialorder %v3234_v50, 0.0  ;;  %v3344_v34 = vmul.f32 0.2, %v3234_v50  ;;  %v3238_v62 = vadd.f32 %v3237_v19, %v7478_v26  ;;  %v3126_v11 = vpop.f32.mrb[99].mxu0  ;;  %v3239_v22 = vpop.f32.mrb[99].mxu1  ;;  %v3125_v63 = vadd.f32 %v3124_v32, %v7484_v15 }
 0x64c   :  { %vm3313_vm13 = vcmp.gt.f32.partialorder %v3236_v58, 0.0  ;;  %v3345_v35 = vmul.f32 0.2, %v3236_v58  ;;  %v3240_v33 = vadd.f32 %v3239_v22, %v7481_v44  ;;  %v3127_v20 = vadd.f32 %v3126_v11, %v7487_v24  ;;  %v6020_v22 = vld [vmem:[%s8002_s16 + $0x8] sm:$0xff]  }
 0x64d   :  { %v3376_v13 = vsel %vm3312_vm12, %v3234_v50, %v3344_v34  ;;  %vm3314_vm14 = vcmp.gt.f32.partialorder %v3238_v62, 0.0  ;;  %v3346_v45 = vmul.f32 0.2, %v3238_v62 }
 0x64e   :  { %v3408_v27 = vadd.f32 %v3376_v13, %v3121_v36  ;;  %v3377_v60 = vsel %vm3313_vm13, %v3236_v58, %v3345_v35  ;;  %vm3315_vm15 = vcmp.gt.f32.partialorder %v3240_v33, 0.0  ;;  %v3347_v41 = vmul.f32 0.2, %v3240_v33 }
 0x64f   :  { %v3378_v12 = vsel %vm3314_vm14, %v3238_v62, %v3346_v45  ;;  %v3409_v31 = vadd.f32 %v3377_v60, %v3123_v55  ;;  %v6022_v55 = vld [vmem:[%s8002_s16 + $0x88] sm:$0xff]   ;;  %v6023_v45 = vld [vmem:[%s8002_s16 + $0x50] sm:$0xff]  }
 0x650   :  { %v3410_v52 = vadd.f32 %v3378_v12, %v3125_v63  ;;  %v3379_v18 = vsel %vm3315_vm15, %v3240_v33, %v3347_v41  ;;  %v3130_v53 = vpop.f32.mrb[100].mxu0  ;;  %v3243_v10 = vpop.f32.mrb[100].mxu1 }
 0x651   :  { %v3244_v28 = vadd.f32 %v3243_v10, %v7478_v26  ;;  %v3132_v2 = vpop.f32.mrb[101].mxu0  ;;  %v3245_v30 = vpop.f32.mrb[101].mxu1  ;;  %v3411_v5 = vadd.f32 %v3379_v18, %v3127_v20  ;;  %v3131_v17 = vadd.f32 %v3130_v53, %v7484_v15 }
 0x652   :  { %v3440_v37 = vpack.c.bf16 %v3410_v52, %v3408_v27  ;;  %v3246_v42 = vadd.f32 %v3245_v30, %v7481_v44  ;;  %v3134_v23 = vpop.f32.mrb[102].mxu0  ;;  %v3247_v51 = vpop.f32.mrb[102].mxu1  ;;  %v3133_v9 = vadd.f32 %v3132_v2, %v7487_v24  ;;  %v6025_v27 = vld [vmem:[%s8002_s16 + $0xd0] sm:$0xff]  }
 0x653   :  { %vm3316_vm1 = vcmp.gt.f32.partialorder %v3244_v28, 0.0  ;;  %v3348_v59 = vmul.f32 0.2, %v3244_v28  ;;  %v3248_v54 = vadd.f32 %v3247_v51, %v7478_v26  ;;  %v3136_v16 = vpop.f32.mrb[103].mxu0  ;;  %v3249_v3 = vpop.f32.mrb[103].mxu1  ;;  %v3135_v0 = vadd.f32 %v3134_v23, %v7484_v15  ;;  %v6024_v30 = vld [vmem:[%s8002_s16 + $0x10] sm:$0xff]  }
 0x654   :  { %vm3317_vm2 = vcmp.gt.f32.partialorder %v3246_v42, 0.0  ;;  %v3349_v1 = vmul.f32 0.2, %v3246_v42  ;;  %v3250_v49 = vadd.f32 %v3249_v3, %v7481_v44  ;;  %v3441_v48 = vpack.c.bf16 %v3411_v5, %v3409_v31  ;;  %v6026_v5 = vld [vmem:[%s8002_s16 + $0x90] sm:$0xff]   ;;  %v6027_v23 = vld [vmem:[%s8002_s16 + $0x58] sm:$0xff]  }
 0x655   :  { %v3380_v56 = vsel %vm3316_vm1, %v3244_v28, %v3348_v59  ;;  %vm3318_vm3 = vcmp.gt.f32.partialorder %v3248_v54, 0.0  ;;  %v3350_v61 = vmul.f32 0.2, %v3248_v54  ;;  %v3137_v8 = vadd.f32 %v3136_v16, %v7487_v24  ;;  %v6029_v51 = vld [vmem:[%s8002_s16 + $0xd8] sm:$0xff]  }
 0x656   :  { %v3381_v21 = vsel %vm3317_vm2, %v3246_v42, %v3349_v1  ;;  %vm3319_vm4 = vcmp.gt.f32.partialorder %v3250_v49, 0.0  ;;  %v3351_v43 = vmul.f32 0.2, %v3250_v49  ;;  %v3412_v47 = vadd.f32 %v3380_v56, %v3131_v17  ;;  %3894 = vmatprep.mubr.bf16.mxu0 %v3441_v48  ;;  %4007 = vmatprep.mubr.bf16.mxu1 %v3441_v48 }
 0x657   :  { %v3382_v14 = vsel %vm3318_vm3, %v3248_v54, %v3350_v61  ;;  %v3413_v50 = vadd.f32 %v3381_v21, %v3133_v9  ;;  %3895 = vmatmul.mubr.bf16.vlgmr.msra.gmra.mrb[128].mxu0 %v3440_v37  ;;  %4008 = vmatmul.mubr.bf16.vlgmr.msra.gmra.mrb[128].mxu1 %v3440_v37 }
 0x658   :  { %v3383_v25 = vsel %vm3319_vm4, %v3250_v49, %v3351_v43  ;;  %v3414_v29 = vadd.f32 %v3382_v14, %v3135_v0  ;;  %5330 = vmatpush3.bf16.msra.mxu0 %v6016_v4  ;;  %5394 = vmatpush3.bf16.msra.mxu1 %v6018_v39  ;;  %v6028_v4 = vld [vmem:[%s8002_s16 + $0x18] sm:$0xff]   ;;  %v6031_v14 = vld [vmem:[%s8002_s16 + $0x60] sm:$0xff]  }
 0x659   :  { %v3140_v58 = vpop.f32.mrb[104].mxu0  ;;  %v3253_v32 = vpop.f32.mrb[104].mxu1  ;;  %v3415_v19 = vadd.f32 %v3383_v25, %v3137_v8  ;;  %5331 = vmatprep.subr.bf16.mxu0 %v6019_v6  ;;  %5395 = vmatprep.subr.bf16.mxu1 %v6021_v7  ;;  %v6030_v39 = vld [vmem:[%s8002_s16 + $0x98] sm:$0xff]   ;;  %v6033_v8 = vld [vmem:[%s8002_s16 + $0xe0] sm:$0xff]  }
 0x65a   :  { %v3254_v36 = vadd.f32 %v3253_v32, %v7478_v26  ;;  %v3142_v34 = vpop.f32.mrb[105].mxu0  ;;  %v3255_v62 = vpop.f32.mrb[105].mxu1  ;;  %v3442_v11 = vpack.c.bf16 %v3414_v29, %v3412_v47  ;;  %v3141_v60 = vadd.f32 %v3140_v58, %v7484_v15 }
 0x65b   :  { %v3256_v35 = vadd.f32 %v3255_v62, %v7481_v44  ;;  %v3144_v33 = vpop.f32.mrb[106].mxu0  ;;  %v3257_v13 = vpop.f32.mrb[106].mxu1  ;;  %v3443_v63 = vpack.c.bf16 %v3415_v19, %v3413_v50  ;;  %v3143_v52 = vadd.f32 %v3142_v34, %v7487_v24 }
 0x65c   :  { %vm3320_vm5 = vcmp.gt.f32.partialorder %v3254_v36, 0.0  ;;  %v3352_v41 = vmul.f32 0.2, %v3254_v36  ;;  %v3258_v12 = vadd.f32 %v3257_v13, %v7478_v26  ;;  %v3146_v20 = vpop.f32.mrb[107].mxu0  ;;  %v3259_v31 = vpop.f32.mrb[107].mxu1  ;;  %v3145_v28 = vadd.f32 %v3144_v33, %v7484_v15  ;;  %5332 = vmatpush3.bf16.msra.mxu0 %v6020_v22  ;;  %5396 = vmatpush3.bf16.msra.mxu1 %v6022_v55  ;;  %v6032_v55 = vld [vmem:[%s8002_s16 + $0x20] sm:$0xff]  }
 0x65d   :  { %vm3321_vm6 = vcmp.gt.f32.partialorder %v3256_v35, 0.0  ;;  %v3353_v18 = vmul.f32 0.2, %v3256_v35  ;;  %v3260_v53 = vadd.f32 %v3259_v31, %v7481_v44  ;;  %3904 = vmatprep.mubr.bf16.mxu0 %v3443_v63  ;;  %4017 = vmatprep.mubr.bf16.mxu1 %v3443_v63  ;;  %v3147_v9 = vadd.f32 %v3146_v20, %v7487_v24 }
 0x65e   :  { %v3384_v10 = vsel %vm3320_vm5, %v3254_v36, %v3352_v41  ;;  %vm3322_vm7 = vcmp.gt.f32.partialorder %v3258_v12, 0.0  ;;  %v3354_v2 = vmul.f32 0.2, %v3258_v12  ;;  %5333 = vmatprep.subr.bf16.mxu0 %v6023_v45  ;;  %5397 = vmatprep.subr.bf16.mxu1 %v6025_v27  ;;  %v6035_v45 = vld [vmem:[%s8002_s16 + $0x68] sm:$0xff]  }
 0x65f   :  { %v3385_v37 = vsel %vm3321_vm6, %v3256_v35, %v3353_v18  ;;  %vm3323_vm8 = vcmp.gt.f32.partialorder %v3260_v53, 0.0  ;;  %v3355_v17 = vmul.f32 0.2, %v3260_v53  ;;  %v3416_v42 = vadd.f32 %v3384_v10, %v3141_v60  ;;  %3905 = vmatmul.mubr.bf16.gmra.mrb[132].mxu0 %v3442_v11  ;;  %4018 = vmatmul.mubr.bf16.gmra.mrb[132].mxu1 %v3442_v11  ;;  %v6034_v35 = vld [vmem:[%s8002_s16 + $0xa0] sm:$0xff]   ;;  %v6037_v27 = vld [vmem:[%s8002_s16 + $0xe8] sm:$0xff]  }
 0x660   :  { %v3386_v59 = vsel %vm3322_vm7, %v3258_v12, %v3354_v2  ;;  %v3417_v54 = vadd.f32 %v3385_v37, %v3143_v52  ;;  %5334 = vmatpush3.bf16.msra.mxu0 %v6024_v30  ;;  %5398 = vmatpush3.bf16.msra.mxu1 %v6026_v5  ;;  %v6036_v30 = vld [vmem:[%s8002_s16 + $0x28] sm:$0xff]  }
 0x661   :  { %v3387_v16 = vsel %vm3323_vm8, %v3260_v53, %v3355_v17  ;;  %v3150_v3 = vpop.f32.mrb[108].mxu0  ;;  %v3263_v1 = vpop.f32.mrb[108].mxu1  ;;  %v3418_v0 = vadd.f32 %v3386_v59, %v3145_v28  ;;  %5335 = vmatprep.subr.bf16.mxu0 %v6027_v23  ;;  %5399 = vmatprep.subr.bf16.mxu1 %v6029_v51  ;;  %v6038_v5 = vld [vmem:[%s8002_s16 + $0xa8] sm:$0xff]   ;;  %v6039_v59 = vld [vmem:[%s8002_s16 + $0x70] sm:$0xff]  }
 0x662   :  { %v3264_v49 = vadd.f32 %v3263_v1, %v7478_v26  ;;  %v3152_v56 = vpop.f32.mrb[109].mxu0  ;;  %v3265_v61 = vpop.f32.mrb[109].mxu1  ;;  %v3419_v48 = vadd.f32 %v3387_v16, %v3147_v9  ;;  %v3151_v21 = vadd.f32 %v3150_v3, %v7484_v15  ;;  %v6041_v9 = vld [vmem:[%s8002_s16 + $0xf0] sm:$0xff]  }
 0x663   :  { %v3266_v43 = vadd.f32 %v3265_v61, %v7481_v44  ;;  %v3154_v47 = vpop.f32.mrb[110].mxu0  ;;  %v3267_v6 = vpop.f32.mrb[110].mxu1  ;;  %v3444_v7 = vpack.c.bf16 %v3418_v0, %v3416_v42  ;;  %v3153_v25 = vadd.f32 %v3152_v56, %v7487_v24 }
 0x664   :  { %vm3324_vm9 = vcmp.gt.f32.partialorder %v3264_v49, 0.0  ;;  %v3356_v50 = vmul.f32 0.2, %v3264_v49  ;;  %v3268_v29 = vadd.f32 %v3267_v6, %v7478_v26  ;;  %v3156_v58 = vpop.f32.mrb[111].mxu0  ;;  %v3269_v32 = vpop.f32.mrb[111].mxu1  ;;  %v3155_v36 = vadd.f32 %v3154_v47, %v7484_v15  ;;  %5336 = vmatpush3.bf16.msra.mxu0 %v6028_v4  ;;  %5400 = vmatpush3.bf16.msra.mxu1 %v6030_v39 }
 0x665   :  { %vm3325_vm10 = vcmp.gt.f32.partialorder %v3266_v43, 0.0  ;;  %v3357_v19 = vmul.f32 0.2, %v3266_v43  ;;  %v3270_v34 = vadd.f32 %v3269_v32, %v7481_v44  ;;  %v3445_v22 = vpack.c.bf16 %v3419_v48, %v3417_v54  ;;  %5337 = vmatprep.subr.bf16.mxu0 %v6031_v14  ;;  %5401 = vmatprep.subr.bf16.mxu1 %v6033_v8 }
 0x666   :  { %v3388_v62 = vsel %vm3324_vm9, %v3264_v49, %v3356_v50  ;;  %vm3326_vm11 = vcmp.gt.f32.partialorder %v3268_v29, 0.0  ;;  %v3358_v11 = vmul.f32 0.2, %v3268_v29  ;;  %v3157_v41 = vadd.f32 %v3156_v58, %v7487_v24 }
 0x667   :  { %v3389_v33 = vsel %vm3325_vm10, %v3266_v43, %v3357_v19  ;;  %vm3327_vm12 = vcmp.gt.f32.partialorder %v3270_v34, 0.0  ;;  %v3359_v13 = vmul.f32 0.2, %v3270_v34  ;;  %v3420_v63 = vadd.f32 %v3388_v62, %v3151_v21  ;;  %3914 = vmatprep.mubr.bf16.mxu0 %v3445_v22  ;;  %4027 = vmatprep.mubr.bf16.mxu1 %v3445_v22  ;;  %v6040_v21 = vld [vmem:[%s8002_s16 + $0x30] sm:$0xff]  }
 0x668   :  { %v3390_v60 = vsel %vm3326_vm11, %v3268_v29, %v3358_v11  ;;  %v3421_v12 = vadd.f32 %v3389_v33, %v3153_v25  ;;  %3915 = vmatmul.mubr.bf16.gmra.mrb[136].mxu0 %v3444_v7  ;;  %4028 = vmatmul.mubr.bf16.gmra.mrb[136].mxu1 %v3444_v7  ;;  %v6042_v43 = vld [vmem:[%s8002_s16 + $0xb0] sm:$0xff]  }
 0x669   :  { %v3391_v20 = vsel %vm3327_vm12, %v3270_v34, %v3359_v13  ;;  %v3160_v31 = vpop.f32.mrb[112].mxu0  ;;  %v3273_v52 = vpop.f32.mrb[112].mxu1  ;;  %v3422_v18 = vadd.f32 %v3390_v60, %v3155_v36  ;;  %5338 = vmatpush3.bf16.msra.mxu0 %v6032_v55  ;;  %5402 = vmatpush3.bf16.msra.mxu1 %v6034_v35 }
 0x66a   :  { %v3274_v53 = vadd.f32 %v3273_v52, %v7478_v26  ;;  %v3162_v10 = vpop.f32.mrb[113].mxu0  ;;  %v3275_v28 = vpop.f32.mrb[113].mxu1  ;;  %v3423_v2 = vadd.f32 %v3391_v20, %v3157_v41  ;;  %v3161_v37 = vadd.f32 %v3160_v31, %v7484_v15  ;;  %5339 = vmatprep.subr.bf16.mxu0 %v6035_v45  ;;  %5403 = vmatprep.subr.bf16.mxu1 %v6037_v27 }
 0x66b   :  { %v3276_v17 = vadd.f32 %v3275_v28, %v7481_v44  ;;  %v3164_v42 = vpop.f32.mrb[114].mxu0  ;;  %v3277_v23 = vpop.f32.mrb[114].mxu1  ;;  %v3446_v51 = vpack.c.bf16 %v3422_v18, %v3420_v63  ;;  %v3163_v16 = vadd.f32 %v3162_v10, %v7487_v24 }
 0x66c   :  { %vm3328_vm13 = vcmp.gt.f32.partialorder %v3274_v53, 0.0  ;;  %v3360_v54 = vmul.f32 0.2, %v3274_v53  ;;  %v3278_v3 = vadd.f32 %v3277_v23, %v7478_v26  ;;  %v3166_v1 = vpop.f32.mrb[115].mxu0  ;;  %v3279_v0 = vpop.f32.mrb[115].mxu1  ;;  %v3165_v56 = vadd.f32 %v3164_v42, %v7484_v15 }
 0x66d   :  { %vm3329_vm14 = vcmp.gt.f32.partialorder %v3276_v17, 0.0  ;;  %v3361_v49 = vmul.f32 0.2, %v3276_v17  ;;  %v3280_v61 = vadd.f32 %v3279_v0, %v7481_v44  ;;  %v3447_v39 = vpack.c.bf16 %v3423_v2, %v3421_v12  ;;  %5340 = vmatpush3.bf16.msra.mxu0 %v6036_v30  ;;  %5404 = vmatpush3.bf16.msra.mxu1 %v6038_v5 }
 0x66e   :  { %v3392_v48 = vsel %vm3328_vm13, %v3274_v53, %v3360_v54  ;;  %vm3330_vm15 = vcmp.gt.f32.partialorder %v3278_v3, 0.0  ;;  %v3362_v4 = vmul.f32 0.2, %v3278_v3  ;;  %5341 = vmatprep.subr.bf16.mxu0 %v6039_v59  ;;  %5405 = vmatprep.subr.bf16.mxu1 %v6041_v9  ;;  %v3167_v8 = vadd.f32 %v3166_v1, %v7487_v24 }
 0x66f   :  { %v3393_v47 = vsel %vm3329_vm14, %v3276_v17, %v3361_v49  ;;  %vm3331_vm1 = vcmp.gt.f32.partialorder %v3280_v61, 0.0  ;;  %v3363_v6 = vmul.f32 0.2, %v3280_v61  ;;  %v3424_v7 = vadd.f32 %v3392_v48, %v3161_v37  ;;  %3924 = vmatprep.mubr.bf16.mxu0 %v3447_v39  ;;  %4037 = vmatprep.mubr.bf16.mxu1 %v3447_v39 }
 0x670   :  { %v3394_v14 = vsel %vm3330_vm15, %v3278_v3, %v3362_v4  ;;  %v3425_v50 = vadd.f32 %v3393_v47, %v3163_v16  ;;  %3925 = vmatmul.mubr.bf16.gmra.mrb[140].mxu0 %v3446_v51  ;;  %4038 = vmatmul.mubr.bf16.gmra.mrb[140].mxu1 %v3446_v51 }
 0x671   :  { %v3395_v25 = vsel %vm3331_vm1, %v3280_v61, %v3363_v6  ;;  %v3170_v29 = vpop.f32.mrb[116].mxu0  ;;  %v3283_v58 = vpop.f32.mrb[116].mxu1  ;;  %v3426_v32 = vadd.f32 %v3394_v14, %v3165_v56  ;;  %5342 = vmatpush3.bf16.msra.mxu0 %v6040_v21  ;;  %5406 = vmatpush3.bf16.msra.mxu1 %v6042_v43 }
 0x672   :  { %v3284_v19 = vadd.f32 %v3283_v58, %v7478_v26  ;;  %v3172_v36 = vpop.f32.mrb[117].mxu0  ;;  %v3285_v34 = vpop.f32.mrb[117].mxu1  ;;  %v3427_v62 = vadd.f32 %v3395_v25, %v3167_v8  ;;  %v3171_v11 = vadd.f32 %v3170_v29, %v7484_v15 }
 0x673   :  { %v3286_v22 = vadd.f32 %v3285_v34, %v7481_v44  ;;  %v3174_v55 = vpop.f32.mrb[118].mxu0  ;;  %v3287_v35 = vpop.f32.mrb[118].mxu1  ;;  %v3448_v33 = vpack.c.bf16 %v3426_v32, %v3424_v7  ;;  %v3173_v63 = vadd.f32 %v3172_v36, %v7487_v24 }
 0x674   :  { %vm3332_vm2 = vcmp.gt.f32.partialorder %v3284_v19, 0.0  ;;  %v3364_v13 = vmul.f32 0.2, %v3284_v19  ;;  %v3288_v45 = vadd.f32 %v3287_v35, %v7478_v26  ;;  %v3176_v27 = vpop.f32.mrb[119].mxu0  ;;  %v3289_v60 = vpop.f32.mrb[119].mxu1  ;;  %v3175_v12 = vadd.f32 %v3174_v55, %v7484_v15 }
 0x675   :  { %vm3333_vm3 = vcmp.gt.f32.partialorder %v3286_v22, 0.0  ;;  %v3365_v41 = vmul.f32 0.2, %v3286_v22  ;;  %v3290_v20 = vadd.f32 %v3289_v60, %v7481_v44  ;;  %v3449_v18 = vpack.c.bf16 %v3427_v62, %v3425_v50 }
 0x676   :  { %v3396_v31 = vsel %vm3332_vm2, %v3284_v19, %v3364_v13  ;;  %vm3334_vm4 = vcmp.gt.f32.partialorder %v3288_v45, 0.0  ;;  %v3366_v52 = vmul.f32 0.2, %v3288_v45  ;;  %v3177_v30 = vadd.f32 %v3176_v27, %v7487_v24 }
 0x677   :  { %v3397_v53 = vsel %vm3333_vm3, %v3286_v22, %v3365_v41  ;;  %vm3335_vm5 = vcmp.gt.f32.partialorder %v3290_v20, 0.0  ;;  %v3367_v10 = vmul.f32 0.2, %v3290_v20  ;;  %v3428_v28 = vadd.f32 %v3396_v31, %v3171_v11  ;;  %3934 = vmatprep.mubr.bf16.mxu0 %v3449_v18  ;;  %4047 = vmatprep.mubr.bf16.mxu1 %v3449_v18 }
 0x678   :  { %v3398_v2 = vsel %vm3334_vm4, %v3288_v45, %v3366_v52  ;;  %v3429_v5 = vadd.f32 %v3397_v53, %v3173_v63  ;;  %3935 = vmatmul.mubr.bf16.gmra.mrb[144].mxu0 %v3448_v33  ;;  %4048 = vmatmul.mubr.bf16.gmra.mrb[144].mxu1 %v3448_v33 }
 0x679   :  { %v3399_v37 = vsel %vm3335_vm5, %v3290_v20, %v3367_v10  ;;  %v3180_v17 = vpop.f32.mrb[120].mxu0  ;;  %v3293_v42 = vpop.f32.mrb[120].mxu1  ;;  %v3430_v23 = vadd.f32 %v3398_v2, %v3175_v12 }
 0x67a   :  { %v3294_v51 = vadd.f32 %v3293_v42, %v7478_v26  ;;  %v3182_v59 = vpop.f32.mrb[121].mxu0  ;;  %v3295_v9 = vpop.f32.mrb[121].mxu1  ;;  %v3431_v54 = vadd.f32 %v3399_v37, %v3177_v30  ;;  %v3181_v16 = vadd.f32 %v3180_v17, %v7484_v15 }
 0x67b   :  { %v3296_v3 = vadd.f32 %v3295_v9, %v7481_v44  ;;  %v3184_v1 = vpop.f32.mrb[122].mxu0  ;;  %v3297_v0 = vpop.f32.mrb[122].mxu1  ;;  %v3450_v49 = vpack.c.bf16 %v3430_v23, %v3428_v28  ;;  %v3183_v61 = vadd.f32 %v3182_v59, %v7487_v24  ;;  %v6043_v9 = vld [vmem:[%s8002_s16 + $0x78] sm:$0xff]  }
 0x67c   :  { %vm3336_vm6 = vcmp.gt.f32.partialorder %v3294_v51, 0.0  ;;  %v3368_v56 = vmul.f32 0.2, %v3294_v51  ;;  %v3298_v48 = vadd.f32 %v3297_v0, %v7478_v26  ;;  %v3186_v4 = vpop.f32.mrb[123].mxu0  ;;  %v3299_v39 = vpop.f32.mrb[123].mxu1  ;;  %v3185_v43 = vadd.f32 %v3184_v1, %v7484_v15  ;;  %5343 = vmatprep.subr.bf16.mxu0 %v6043_v9 }
 0x67d   :  { %vm3337_vm7 = vcmp.gt.f32.partialorder %v3296_v3, 0.0  ;;  %v3369_v21 = vmul.f32 0.2, %v3296_v3  ;;  %v3300_v47 = vadd.f32 %v3299_v39, %v7481_v44  ;;  %v3451_v14 = vpack.c.bf16 %v3431_v54, %v3429_v5  ;;  %v6044_v54 = vld [vmem:[%s8002_s16 + $0x38] sm:$0xff]  }
 0x67e   :  { %v3400_v6 = vsel %vm3336_vm6, %v3294_v51, %v3368_v56  ;;  %vm3338_vm8 = vcmp.gt.f32.partialorder %v3298_v48, 0.0  ;;  %v3370_v7 = vmul.f32 0.2, %v3298_v48  ;;  %v3187_v58 = vadd.f32 %v3186_v4, %v7487_v24  ;;  %5344 = vmatpush3.bf16.msra.mxu0 %v6044_v54 }
 0x67f   :  { %v3401_v8 = vsel %vm3337_vm7, %v3296_v3, %v3369_v21  ;;  %vm3339_vm9 = vcmp.gt.f32.partialorder %v3300_v47, 0.0  ;;  %v3371_v50 = vmul.f32 0.2, %v3300_v47  ;;  %v3432_v25 = vadd.f32 %v3400_v6, %v3181_v16  ;;  %3944 = vmatprep.mubr.bf16.mxu0 %v3451_v14  ;;  %4057 = vmatprep.mubr.bf16.mxu1 %v3451_v14  ;;  %v6046_v16 = vld [vmem:[%s8002_s16 + $0xb8] sm:$0xff]   ;;  %v3520_v3 = vld [vmem:[%s8001_s15] sm:$0xf] }
 0x680   :  { %v3402_v29 = vsel %vm3338_vm8, %v3298_v48, %v3370_v7  ;;  %v3433_v32 = vadd.f32 %v3401_v8, %v3183_v61  ;;  %3945 = vmatmul.mubr.bf16.gmra.mrb[148].mxu0 %v3450_v49  ;;  %4058 = vmatmul.mubr.bf16.gmra.mrb[148].mxu1 %v3450_v49  ;;  %v7647_v1 = vrot.slane %v3520_v3, %v6452_v38 }
 0x681   :  { %v3403_v19 = vsel %vm3339_vm9, %v3300_v47, %v3371_v50  ;;  %v3190_v36 = vpop.f32.mrb[124].mxu0  ;;  %v3303_v34 = vpop.f32.mrb[124].mxu1  ;;  %v3434_v62 = vadd.f32 %v3402_v29, %v3185_v43  ;;  %v7650_v0 = vrot.slane %v3520_v3, %v6466_v46  ;;  %v7653_v49 = vrot.slane %v3520_v3, %v6457_v40 }
 0x682   :  { %v3304_v11 = vadd.f32 %v3303_v34, %v7478_v26  ;;  %v3192_v22 = vpop.f32.mrb[125].mxu0  ;;  %v3305_v55 = vpop.f32.mrb[125].mxu1  ;;  %v3435_v35 = vadd.f32 %v3403_v19, %v3187_v58  ;;  %v3191_v33 = vadd.f32 %v3190_v36, %v7484_v15  ;;  %v7656_v56 = vrot.slane %v3520_v3, %v6474_v57 }
 0x683   :  { %v3306_v13 = vadd.f32 %v3305_v55, %v7481_v44  ;;  %v3194_v63 = vpop.f32.mrb[126].mxu0  ;;  %v3307_v45 = vpop.f32.mrb[126].mxu1  ;;  %v3452_v27 = vpack.c.bf16 %v3434_v62, %v3432_v25  ;;  %v3193_v41 = vadd.f32 %v3192_v22, %v7487_v24 }
 0x684   :  { %vm3340_vm10 = vcmp.gt.f32.partialorder %v3304_v11, 0.0  ;;  %v3372_v60 = vmul.f32 0.2, %v3304_v11  ;;  %v3308_v12 = vadd.f32 %v3307_v45, %v7478_v26  ;;  %v3196_v20 = vpop.f32.mrb[127].mxu0  ;;  %v3309_v31 = vpop.f32.mrb[127].mxu1  ;;  %v3195_v18 = vadd.f32 %v3194_v63, %v7484_v15 }
 0x685   :  { %vm3341_vm11 = vcmp.gt.f32.partialorder %v3306_v13, 0.0  ;;  %v3373_v52 = vmul.f32 0.2, %v3306_v13  ;;  %v3310_v53 = vadd.f32 %v3309_v31, %v7481_v44  ;;  %v3453_v2 = vpack.c.bf16 %v3435_v35, %v3433_v32 }
 0x686   :  { %v3404_v10 = vsel %vm3340_vm10, %v3304_v11, %v3372_v60  ;;  %vm3342_vm12 = vcmp.gt.f32.partialorder %v3308_v12, 0.0  ;;  %v3374_v28 = vmul.f32 0.2, %v3308_v12  ;;  %v3197_v42 = vadd.f32 %v3196_v20, %v7487_v24  ;;  %v6045_v24 = vld [vmem:[%s8002_s16 + $0xf8] sm:$0xff]  }
 0x687   :  { %v3405_v30 = vsel %vm3341_vm11, %v3306_v13, %v3373_v52  ;;  %vm3343_vm13 = vcmp.gt.f32.partialorder %v3310_v53, 0.0  ;;  %v3375_v5 = vmul.f32 0.2, %v3310_v53  ;;  %v3436_v37 = vadd.f32 %v3404_v10, %v3191_v33  ;;  %3954 = vmatprep.mubr.bf16.mxu0 %v3453_v2  ;;  %4067 = vmatprep.mubr.bf16.mxu1 %v3453_v2 }
 0x688   :  { %v3406_v17 = vsel %vm3342_vm12, %v3308_v12, %v3374_v28  ;;  %v3437_v26 = vadd.f32 %v3405_v30, %v3193_v41  ;;  %3955 = vmatmul.mubr.bf16.gmra.mrb[152].mxu0 %v3452_v27  ;;  %4068 = vmatmul.mubr.bf16.gmra.mrb[152].mxu1 %v3452_v27 }
 0x689   :  { %v3407_v23 = vsel %vm3343_vm13, %v3310_v53, %v3375_v5  ;;  %v3438_v15 = vadd.f32 %v3406_v17, %v3195_v18  ;;  %5407 = vmatprep.subr.bf16.mxu1 %v6045_v24 }
 0x68a   :  { %v3439_v51 = vadd.f32 %v3407_v23, %v3197_v42  ;;  %5408 = vmatpush3.bf16.msra.mxu1 %v6046_v16 }
 0x68b   :  { %v3454_v44 = vpack.c.bf16 %v3438_v15, %v3436_v37 }
 0x68c   :  { %v3455_v59 = vpack.c.bf16 %v3439_v51, %v3437_v26 }
 0x68e   :  { %3964 = vmatprep.mubr.bf16.mxu0 %v3455_v59  ;;  %4077 = vmatprep.mubr.bf16.mxu1 %v3455_v59 }
 0x690   :  { %3965 = vmatmul.mubr.bf16.gmra.mrb[156].mxu0 %v3454_v44  ;;  %4078 = vmatmul.mubr.bf16.gmra.mrb[156].mxu1 %v3454_v44 }
 0x72a   :  { %v3896_v61 = vpop.f32.mrb[128].mxu0  ;;  %v4009_v48 = vpop.f32.mrb[128].mxu1 }
 0x72b   :  { %v3897_v4 = vadd.f32 %v3896_v61, %v7647_v1  ;;  %v4010_v39 = vadd.f32 %v4009_v48, %v7650_v0  ;;  %v3898_v21 = vpop.f32.mrb[129].mxu0  ;;  %v4011_v43 = vpop.f32.mrb[129].mxu1 }
 0x72c   :  { %v3899_v38 = vadd.f32 %v3898_v21, %v7653_v49  ;;  %v4012_v47 = vadd.f32 %v4011_v43, %v7656_v56  ;;  %v3900_v46 = vpop.f32.mrb[130].mxu0  ;;  %v4013_v6 = vpop.f32.mrb[130].mxu1 }
 0x72d   :  { %vm4088_vm14 = vcmp.gt.f32.partialorder %v3897_v4, 0.0  ;;  %v4152_v40 = vmul.f32 0.2, %v3897_v4  ;;  %vm4090_vm15 = vcmp.gt.f32.partialorder %v4010_v39, 0.0  ;;  %v4154_v7 = vmul.f32 0.2, %v4010_v39 }
 0x72e   :  { %vm4089_vm1 = vcmp.gt.f32.partialorder %v3899_v38, 0.0  ;;  %v4153_v57 = vmul.f32 0.2, %v3899_v38  ;;  %v3901_v14 = vadd.f32 %v3900_v46, %v7647_v1  ;;  %v4014_v8 = vadd.f32 %v4013_v6, %v7650_v0  ;;  %v3902_v50 = vpop.f32.mrb[131].mxu0  ;;  %v4015_v25 = vpop.f32.mrb[131].mxu1 }
 0x72f   :  { %vm4091_vm2 = vcmp.gt.f32.partialorder %v4012_v47, 0.0  ;;  %v4155_v29 = vmul.f32 0.2, %v4012_v47  ;;  %v3903_v58 = vadd.f32 %v3902_v50, %v7653_v49  ;;  %v4016_v32 = vadd.f32 %v4015_v25, %v7656_v56 }
 0x730   :  { %vm4092_vm3 = vcmp.gt.f32.partialorder %v3901_v14, 0.0  ;;  %v4156_v19 = vmul.f32 0.2, %v3901_v14  ;;  %vm4094_vm4 = vcmp.gt.f32.partialorder %v4014_v8, 0.0  ;;  %v4158_v36 = vmul.f32 0.2, %v4014_v8 }
 0x731   :  { %vm4093_vm5 = vcmp.gt.f32.partialorder %v3903_v58, 0.0  ;;  %v4157_v34 = vmul.f32 0.2, %v3903_v58  ;;  %vm4095_vm6 = vcmp.gt.f32.partialorder %v4016_v32, 0.0  ;;  %v4159_v62 = vmul.f32 0.2, %v4016_v32 }
 0x732   :  { %v4216_v11 = vsel %vm4088_vm14, %v3897_v4, %v4152_v40  ;;  %v4218_v22 = vsel %vm4090_vm15, %v4010_v39, %v4154_v7  ;;  %v4220_v55 = vsel %vm4092_vm3, %v3901_v14, %v4156_v19  ;;  %v4222_v35 = vsel %vm4094_vm4, %v4014_v8, %v4158_v36  ;;  %v3906_v33 = vpop.f32.mrb[132].mxu0  ;;  %v4019_v13 = vpop.f32.mrb[132].mxu1 }
 0x733   :  { %v4280_v63 = vpack.c.bf16 %v4220_v55, %v4216_v11  ;;  %v4282_v45 = vpack.c.bf16 %v4222_v35, %v4218_v22  ;;  %v3907_v27 = vadd.f32 %v3906_v33, %v7647_v1  ;;  %v4020_v60 = vadd.f32 %v4019_v13, %v7650_v0  ;;  %v3908_v41 = vpop.f32.mrb[133].mxu0  ;;  %v4021_v12 = vpop.f32.mrb[133].mxu1 }
 0x734   :  { %v3909_v20 = vadd.f32 %v3908_v41, %v7653_v49  ;;  %v4022_v31 = vadd.f32 %v4021_v12, %v7656_v56  ;;  %v3910_v52 = vpop.f32.mrb[134].mxu0  ;;  %v4023_v18 = vpop.f32.mrb[134].mxu1  ;;  %v4221_v53 = vsel %vm4093_vm5, %v3903_v58, %v4157_v34  ;;  %v4223_v10 = vsel %vm4095_vm6, %v4016_v32, %v4159_v62 }
 0x735   :  { %vm4096_vm7 = vcmp.gt.f32.partialorder %v3907_v27, 0.0  ;;  %v4160_v28 = vmul.f32 0.2, %v3907_v27  ;;  %v4217_v2 = vsel %vm4089_vm1, %v3899_v38, %v4153_v57  ;;  %v4162_v30 = vmul.f32 0.2, %v4020_v60  ;;  %v3912_v23 = vpop.f32.mrb[135].mxu0 }
 0x736   :  { %v4161_v5 = vmul.f32 0.2, %v3909_v20  ;;  %v4163_v37 = vmul.f32 0.2, %v4022_v31  ;;  %v4219_v17 = vsel %vm4091_vm2, %v4012_v47, %v4155_v29  ;;  %v3911_v42 = vadd.f32 %v3910_v52, %v7647_v1  ;;  %v4025_v15 = vpop.f32.mrb[135].mxu1 }
 0x737   :  { %v4024_v26 = vadd.f32 %v4023_v18, %v7650_v0  ;;  %v4281_v51 = vpack.c.bf16 %v4221_v53, %v4217_v2  ;;  %v4283_v44 = vpack.c.bf16 %v4223_v10, %v4219_v17  ;;  %vm4097_vm8 = vcmp.gt.f32.partialorder %v3909_v20, 0.0 }
 0x738   :  { %vm4099_vm9 = vcmp.gt.f32.partialorder %v4022_v31, 0.0  ;;  %v3913_v59 = vadd.f32 %v3912_v23, %v7653_v49  ;;  %v4026_v9 = vadd.f32 %v4025_v15, %v7656_v56  ;;  %vm4100_vm10 = vcmp.gt.f32.partialorder %v3911_v42, 0.0 }
 0x739   :  { %v4164_v24 = vmul.f32 0.2, %v3911_v42  ;;  %vm4102_vm11 = vcmp.gt.f32.partialorder %v4024_v26, 0.0  ;;  %v4166_v54 = vmul.f32 0.2, %v4024_v26  ;;  %4607 = vmatprep.mubr.bf16.mxu0 %v4281_v51  ;;  %4704 = vmatprep.mubr.bf16.mxu1 %v4283_v44  ;;  %vm4098_vm14 = vcmp.gt.f32.partialorder %v4020_v60, 0.0 }
 0x73a   :  { %vm4101_vm12 = vcmp.gt.f32.partialorder %v3913_v59, 0.0  ;;  %v4165_v16 = vmul.f32 0.2, %v3913_v59  ;;  %vm4103_vm13 = vcmp.gt.f32.partialorder %v4026_v9, 0.0  ;;  %v4167_v3 = vmul.f32 0.2, %v4026_v9  ;;  %4608 = vmatmul.mubr.bf16.vlgmr.msra.gmra.mrb[160].mxu0 %v4280_v63  ;;  %4705 = vmatmul.mubr.bf16.vlgmr.msra.gmra.mrb[160].mxu1 %v4282_v45 }
 0x73b   :  { %v3916_v61 = vpop.f32.mrb[136].mxu0  ;;  %v4029_v48 = vpop.f32.mrb[136].mxu1  ;;  %v4225_v4 = vsel %vm4097_vm8, %v3909_v20, %v4161_v5  ;;  %v4227_v39 = vsel %vm4099_vm9, %v4022_v31, %v4163_v37  ;;  %v4228_v21 = vsel %vm4100_vm10, %v3911_v42, %v4164_v24  ;;  %v4230_v40 = vsel %vm4102_vm11, %v4024_v26, %v4166_v54 }
 0x73c   :  { %v7684_v43 = vadd.f32 %v3916_v61, %v7647_v1  ;;  %v3918_v38 = vpop.f32.mrb[137].mxu0  ;;  %v4031_v47 = vpop.f32.mrb[137].mxu1  ;;  %v4229_v46 = vsel %vm4101_vm12, %v3913_v59, %v4165_v16  ;;  %v4231_v6 = vsel %vm4103_vm13, %v4026_v9, %v4167_v3  ;;  %v4224_v29 = vsel %vm4096_vm7, %v3907_v27, %v4160_v28 }
 0x73d   :  { %v3919_v7 = vadd.f32 %v3918_v38, %v7653_v49  ;;  %v4032_v57 = vadd.f32 %v4031_v47, %v7656_v56  ;;  %v3920_v14 = vpop.f32.mrb[138].mxu0  ;;  %v4033_v8 = vpop.f32.mrb[138].mxu1  ;;  %v4285_v50 = vpack.c.bf16 %v4229_v46, %v4225_v4  ;;  %v4287_v25 = vpack.c.bf16 %v4231_v6, %v4227_v39 }
 0x73e   :  { %vm4104_vm15 = vcmp.gt.f32.partialorder %v7684_v43, 0.0  ;;  %v4226_v58 = vsel %vm4098_vm14, %v4020_v60, %v4162_v30  ;;  %v4168_v32 = vmul.f32 0.2, %v7684_v43  ;;  %v4030_v19 = vadd.f32 %v4029_v48, %v7650_v0  ;;  %v3922_v22 = vpop.f32.mrb[139].mxu0  ;;  %v4035_v55 = vpop.f32.mrb[139].mxu1 }
 0x73f   :  { %v4169_v36 = vmul.f32 0.2, %v3919_v7  ;;  %v4171_v34 = vmul.f32 0.2, %v4032_v57  ;;  %4615 = vmatprep.mubr.bf16.mxu0 %v4285_v50  ;;  %4712 = vmatprep.mubr.bf16.mxu1 %v4287_v25  ;;  %v3921_v62 = vadd.f32 %v3920_v14, %v7647_v1  ;;  %v4034_v11 = vadd.f32 %v4033_v8, %v7650_v0 }
 0x740   :  { %v4284_v35 = vpack.c.bf16 %v4228_v21, %v4224_v29  ;;  %v4286_v33 = vpack.c.bf16 %v4230_v40, %v4226_v58  ;;  %vm4105_vm1 = vcmp.gt.f32.partialorder %v3919_v7, 0.0  ;;  %vm4107_vm2 = vcmp.gt.f32.partialorder %v4032_v57, 0.0 }
 0x741   :  { %v3923_v13 = vadd.f32 %v3922_v22, %v7653_v49  ;;  %v4036_v63 = vadd.f32 %v4035_v55, %v7656_v56  ;;  %vm4108_vm3 = vcmp.gt.f32.partialorder %v3921_v62, 0.0  ;;  %v4172_v45 = vmul.f32 0.2, %v3921_v62 }
 0x742   :  { %vm4110_vm4 = vcmp.gt.f32.partialorder %v4034_v11, 0.0  ;;  %v4174_v27 = vmul.f32 0.2, %v4034_v11  ;;  %4616 = vmatmul.mubr.bf16.gmra.mrb[164].mxu0 %v4284_v35  ;;  %4713 = vmatmul.mubr.bf16.gmra.mrb[164].mxu1 %v4286_v33  ;;  %vm4106_vm7 = vcmp.gt.f32.partialorder %v4030_v19, 0.0  ;;  %v4170_v12 = vmul.f32 0.2, %v4030_v19 }
 0x743   :  { %vm4109_vm5 = vcmp.gt.f32.partialorder %v3923_v13, 0.0  ;;  %v4173_v60 = vmul.f32 0.2, %v3923_v13  ;;  %vm4111_vm6 = vcmp.gt.f32.partialorder %v4036_v63, 0.0  ;;  %v4175_v41 = vmul.f32 0.2, %v4036_v63 }
 0x744   :  { %v3926_v20 = vpop.f32.mrb[140].mxu0  ;;  %v4039_v31 = vpop.f32.mrb[140].mxu1  ;;  %v4233_v52 = vsel %vm4105_vm1, %v3919_v7, %v4169_v36  ;;  %v4235_v18 = vsel %vm4107_vm2, %v4032_v57, %v4171_v34  ;;  %v4236_v5 = vsel %vm4108_vm3, %v3921_v62, %v4172_v45  ;;  %v4238_v15 = vsel %vm4110_vm4, %v4034_v11, %v4174_v27 }
 0x745   :  { %v3927_v53 = vadd.f32 %v3926_v20, %v7647_v1  ;;  %v3928_v10 = vpop.f32.mrb[141].mxu0  ;;  %v4041_v28 = vpop.f32.mrb[141].mxu1  ;;  %v4237_v2 = vsel %vm4109_vm5, %v3923_v13, %v4173_v60  ;;  %v4239_v30 = vsel %vm4111_vm6, %v4036_v63, %v4175_v41  ;;  %v7706_v44 = vadd.f32 %v4039_v31, %v7650_v0 }
 0x746   :  { %v3929_v37 = vadd.f32 %v3928_v10, %v7653_v49  ;;  %v3930_v17 = vpop.f32.mrb[142].mxu0  ;;  %v4043_v42 = vpop.f32.mrb[142].mxu1  ;;  %v4289_v26 = vpack.c.bf16 %v4237_v2, %v4233_v52  ;;  %v4291_v23 = vpack.c.bf16 %v4239_v30, %v4235_v18  ;;  %v4042_v51 = vadd.f32 %v4041_v28, %v7656_v56 }
 0x747   :  { %v4232_v59 = vsel %vm4104_vm15, %v7684_v43, %v4168_v32  ;;  %v4234_v9 = vsel %vm4106_vm7, %v4030_v19, %v4170_v12  ;;  %v4176_v24 = vmul.f32 0.2, %v3927_v53  ;;  %v3931_v54 = vadd.f32 %v3930_v17, %v7647_v1  ;;  %v3932_v16 = vpop.f32.mrb[143].mxu0  ;;  %v4045_v3 = vpop.f32.mrb[143].mxu1 }
 0x748   :  { %4623 = vmatprep.mubr.bf16.mxu0 %v4289_v26  ;;  %4720 = vmatprep.mubr.bf16.mxu1 %v4291_v23  ;;  %v4288_v61 = vpack.c.bf16 %v4236_v5, %v4232_v59  ;;  %v4290_v48 = vpack.c.bf16 %v4238_v15, %v4234_v9  ;;  %vm4113_vm8 = vcmp.gt.f32.partialorder %v3929_v37, 0.0  ;;  %v4177_v4 = vmul.f32 0.2, %v3929_v37 }
 0x749   :  { %v3933_v39 = vadd.f32 %v3932_v16, %v7653_v49  ;;  %v4046_v21 = vadd.f32 %v4045_v3, %v7656_v56  ;;  %v4179_v46 = vmul.f32 0.2, %v4042_v51  ;;  %vm4116_vm9 = vcmp.gt.f32.partialorder %v3931_v54, 0.0 }
 0x74a   :  { %v4180_v43 = vmul.f32 0.2, %v3931_v54  ;;  %v4044_v6 = vadd.f32 %v4043_v42, %v7650_v0  ;;  %4624 = vmatmul.mubr.bf16.gmra.mrb[168].mxu0 %v4288_v61  ;;  %4721 = vmatmul.mubr.bf16.gmra.mrb[168].mxu1 %v4290_v48  ;;  %vm4112_vm12 = vcmp.gt.f32.partialorder %v3927_v53, 0.0  ;;  %vm4115_vm13 = vcmp.gt.f32.partialorder %v4042_v51, 0.0 }
 0x74b   :  { %v3936_v38 = vpop.f32.mrb[144].mxu0  ;;  %v4049_v47 = vpop.f32.mrb[144].mxu1  ;;  %vm4117_vm10 = vcmp.gt.f32.partialorder %v3933_v39, 0.0  ;;  %v4181_v40 = vmul.f32 0.2, %v3933_v39  ;;  %vm4119_vm11 = vcmp.gt.f32.partialorder %v4046_v21, 0.0  ;;  %v4241_v62 = vsel %vm4113_vm8, %v3929_v37, %v4177_v4 }
 0x74c   :  { %v4183_v7 = vmul.f32 0.2, %v4046_v21  ;;  %v7717_v57 = vadd.f32 %v3936_v38, %v7647_v1  ;;  %v7720_v14 = vadd.f32 %v4049_v47, %v7650_v0  ;;  %v3938_v8 = vpop.f32.mrb[145].mxu0  ;;  %v4051_v50 = vpop.f32.mrb[145].mxu1  ;;  %vm4114_vm14 = vcmp.gt.f32.partialorder %v7706_v44, 0.0 }
 0x74d   :  { %v3939_v25 = vadd.f32 %v3938_v8, %v7653_v49  ;;  %v3940_v29 = vpop.f32.mrb[146].mxu0  ;;  %v4053_v58 = vpop.f32.mrb[146].mxu1  ;;  %v4245_v32 = vsel %vm4117_vm10, %v3933_v39, %v4181_v40  ;;  %v4178_v36 = vmul.f32 0.2, %v7706_v44  ;;  %v7726_v34 = vadd.f32 %v4051_v50, %v7656_v56 }
 0x74e   :  { %v4247_v19 = vsel %vm4119_vm11, %v4046_v21, %v4183_v7  ;;  %v4244_v11 = vsel %vm4116_vm9, %v3931_v54, %v4180_v43  ;;  %vm4118_vm15 = vcmp.gt.f32.partialorder %v4044_v6, 0.0  ;;  %v4182_v22 = vmul.f32 0.2, %v4044_v6  ;;  %v3942_v63 = vpop.f32.mrb[147].mxu0  ;;  %v4055_v45 = vpop.f32.mrb[147].mxu1 }
 0x74f   :  { %v4243_v55 = vsel %vm4115_vm13, %v4042_v51, %v4179_v46  ;;  %v4240_v35 = vsel %vm4112_vm12, %v3927_v53, %v4176_v24  ;;  %vm4120_vm1 = vcmp.gt.f32.partialorder %v7717_v57, 0.0  ;;  %v7734_v33 = vmul.f32 0.2, %v7717_v57 }
 0x750   :  { %v7737_v13 = vmul.f32 0.2, %v7720_v14  ;;  %v4293_v27 = vpack.c.bf16 %v4245_v32, %v4241_v62  ;;  %v4295_v60 = vpack.c.bf16 %v4247_v19, %v4243_v55  ;;  %vm4122_vm2 = vcmp.gt.f32.partialorder %v7720_v14, 0.0 }
 0x751   :  { %vm4121_vm3 = vcmp.gt.f32.partialorder %v3939_v25, 0.0  ;;  %v3943_v41 = vadd.f32 %v3942_v63, %v7653_v49  ;;  %v4056_v12 = vadd.f32 %v4055_v45, %v7656_v56  ;;  %v4292_v20 = vpack.c.bf16 %v4244_v11, %v4240_v35 }
 0x752   :  { %v4185_v18 = vmul.f32 0.2, %v3939_v25  ;;  %vm4123_vm4 = vcmp.gt.f32.partialorder %v7726_v34, 0.0  ;;  %v3941_v53 = vadd.f32 %v3940_v29, %v7647_v1  ;;  %v4054_v10 = vadd.f32 %v4053_v58, %v7650_v0  ;;  %4631 = vmatprep.mubr.bf16.mxu0 %v4293_v27  ;;  %4728 = vmatprep.mubr.bf16.mxu1 %v4295_v60 }
 0x753   :  { %v3946_v31 = vpop.f32.mrb[148].mxu0  ;;  %v4059_v52 = vpop.f32.mrb[148].mxu1  ;;  %v4187_v28 = vmul.f32 0.2, %v7726_v34  ;;  %vm4125_vm5 = vcmp.gt.f32.partialorder %v3943_v41, 0.0  ;;  %4632 = vmatmul.mubr.bf16.gmra.mrb[172].mxu0 %v4292_v20  ;;  %v4242_v30 = vsel %vm4114_vm14, %v7706_v44, %v4178_v36  ;;  %v4246_v37 = vsel %vm4118_vm15, %v4044_v6, %v4182_v22 }
 0x754   :  { %v4189_v2 = vmul.f32 0.2, %v3943_v41  ;;  %v4191_v5 = vmul.f32 0.2, %v4056_v12  ;;  %v7751_v17 = vadd.f32 %v3946_v31, %v7647_v1  ;;  %v7754_v42 = vadd.f32 %v4059_v52, %v7650_v0  ;;  %v3948_v26 = vpop.f32.mrb[149].mxu0  ;;  %v4061_v23 = vpop.f32.mrb[149].mxu1 }
 0x755   :  { %v4294_v15 = vpack.c.bf16 %v4246_v37, %v4242_v30  ;;  %v7757_v51 = vadd.f32 %v3948_v26, %v7653_v49  ;;  %v7760_v59 = vadd.f32 %v4061_v23, %v7656_v56  ;;  %v3950_v9 = vpop.f32.mrb[150].mxu0  ;;  %v4063_v44 = vpop.f32.mrb[150].mxu1  ;;  %vm4124_vm6 = vcmp.gt.f32.partialorder %v3941_v53, 0.0 }
 0x756   :  { %v4253_v24 = vsel %vm4125_vm5, %v3943_v41, %v4189_v2  ;;  %v4188_v54 = vmul.f32 0.2, %v3941_v53  ;;  %vm4126_vm7 = vcmp.gt.f32.partialorder %v4054_v10, 0.0  ;;  %vm4127_vm8 = vcmp.gt.f32.partialorder %v4056_v12, 0.0  ;;  %v3952_v21 = vpop.f32.mrb[151].mxu0  ;;  %v4065_v38 = vpop.f32.mrb[151].mxu1 }
 0x757   :  { %v4190_v16 = vmul.f32 0.2, %v4054_v10  ;;  %4729 = vmatmul.mubr.bf16.gmra.mrb[172].mxu1 %v4294_v15  ;;  %v7763_v3 = vmul.f32 0.2, %v7751_v17  ;;  %v7766_v61 = vmul.f32 0.2, %v7754_v42  ;;  %v4249_v48 = vsel %vm4121_vm3, %v3939_v25, %v4185_v18 }
 0x758   :  { %vm4128_vm9 = vcmp.gt.f32.partialorder %v7751_v17, 0.0  ;;  %vm4129_vm10 = vcmp.gt.f32.partialorder %v7757_v51, 0.0  ;;  %v7772_v4 = vadd.f32 %v3950_v9, %v7647_v1  ;;  %v7775_v39 = vadd.f32 %v4063_v44, %v7650_v0 }
 0x759   :  { %v4297_v47 = vpack.c.bf16 %v4253_v24, %v4249_v48  ;;  %v4193_v46 = vmul.f32 0.2, %v7757_v51  ;;  %vm4131_vm11 = vcmp.gt.f32.partialorder %v7760_v59, 0.0  ;;  %v3953_v43 = vadd.f32 %v3952_v21, %v7653_v49 }
 0x75a   :  { %v4255_v6 = vsel %vm4127_vm8, %v4056_v12, %v4191_v5  ;;  %vm4130_vm12 = vcmp.gt.f32.partialorder %v7754_v42, 0.0  ;;  %v4195_v8 = vmul.f32 0.2, %v7760_v59  ;;  %vm4132_vm13 = vcmp.gt.f32.partialorder %v7772_v4, 0.0 }
 0x75b   :  { %v3956_v40 = vpop.f32.mrb[152].mxu0  ;;  %v4069_v7 = vpop.f32.mrb[152].mxu1  ;;  %v4066_v50 = vadd.f32 %v4065_v38, %v7656_v56  ;;  %4639 = vmatprep.mubr.bf16.mxu0 %v4297_v47  ;;  %v4251_v25 = vsel %vm4123_vm4, %v7726_v34, %v4187_v28  ;;  %v4196_v29 = vmul.f32 0.2, %v7772_v4  ;;  %v4198_v58 = vmul.f32 0.2, %v7775_v39 }
 0x75c   :  { %v4197_v32 = vmul.f32 0.2, %v3953_v43  ;;  %v4248_v19 = vsel %vm4120_vm1, %v7717_v57, %v7734_v33  ;;  %v4299_v36 = vpack.c.bf16 %v4255_v6, %v4251_v25  ;;  %v4252_v62 = vsel %vm4124_vm6, %v3941_v53, %v4188_v54  ;;  %v3958_v22 = vpop.f32.mrb[153].mxu0  ;;  %v4071_v55 = vpop.f32.mrb[153].mxu1 }
 0x75d   :  { %v4250_v11 = vsel %vm4122_vm2, %v7720_v14, %v7737_v13  ;;  %v4254_v34 = vsel %vm4126_vm7, %v4054_v10, %v4190_v16  ;;  %v4296_v35 = vpack.c.bf16 %v4252_v62, %v4248_v19  ;;  %v7801_v45 = vadd.f32 %v3956_v40, %v7647_v1  ;;  %v3960_v57 = vpop.f32.mrb[154].mxu0  ;;  %v4073_v33 = vpop.f32.mrb[154].mxu1 }
 0x75e   :  { %v4298_v63 = vpack.c.bf16 %v4254_v34, %v4250_v11  ;;  %v7804_v27 = vadd.f32 %v4069_v7, %v7650_v0  ;;  %4736 = vmatprep.mubr.bf16.mxu1 %v4299_v36  ;;  %v7807_v60 = vadd.f32 %v3958_v22, %v7653_v49  ;;  %v7810_v14 = vadd.f32 %v4071_v55, %v7656_v56  ;;  %v3962_v12 = vpop.f32.mrb[155].mxu0  ;;  %v4075_v20 = vpop.f32.mrb[155].mxu1 }
 0x75f   :  { %v7813_v13 = vadd.f32 %v3960_v57, %v7647_v1  ;;  %v7816_v41 = vadd.f32 %v4073_v33, %v7650_v0  ;;  %vm4134_vm14 = vcmp.gt.f32.partialorder %v7775_v39, 0.0  ;;  %vm4133_vm15 = vcmp.gt.f32.partialorder %v3953_v43, 0.0  ;;  %4640 = vmatmul.mubr.bf16.gmra.mrb[176].mxu0 %v4296_v35 }
 0x760   :  { %v4199_v31 = vmul.f32 0.2, %v4066_v50  ;;  %4737 = vmatmul.mubr.bf16.gmra.mrb[176].mxu1 %v4298_v63  ;;  %v7820_v52 = vmul.f32 0.2, %v7801_v45  ;;  %vm4135_vm1 = vcmp.gt.f32.partialorder %v4066_v50, 0.0  ;;  %vm4137_vm2 = vcmp.gt.f32.partialorder %v7807_v60, 0.0 }
 0x761   :  { %v7823_v18 = vmul.f32 0.2, %v7804_v27  ;;  %v4201_v53 = vmul.f32 0.2, %v7807_v60  ;;  %vm4136_vm3 = vcmp.gt.f32.partialorder %v7801_v45, 0.0  ;;  %vm4139_vm4 = vcmp.gt.f32.partialorder %v7810_v14, 0.0 }
 0x762   :  { %v4203_v10 = vmul.f32 0.2, %v7810_v14  ;;  %v7831_v28 = vmul.f32 0.2, %v7813_v13  ;;  %v7834_v2 = vmul.f32 0.2, %v7816_v41  ;;  %v3963_v30 = vadd.f32 %v3962_v12, %v7653_v49 }
 0x763   :  { %v4076_v5 = vadd.f32 %v4075_v20, %v7656_v56  ;;  %v4257_v37 = vsel %vm4129_vm10, %v7757_v51, %v4193_v46  ;;  %v4261_v26 = vsel %vm4133_vm15, %v3953_v43, %v4197_v32  ;;  %v3966_v23 = vpop.f32.mrb[156].mxu0  ;;  %v4079_v15 = vpop.f32.mrb[156].mxu1  ;;  %vm4138_vm5 = vcmp.gt.f32.partialorder %v7804_v27, 0.0 }
 0x764   :  { %vm4140_vm6 = vcmp.gt.f32.partialorder %v7813_v13, 0.0  ;;  %vm4142_vm7 = vcmp.gt.f32.partialorder %v7816_v41, 0.0  ;;  %v4301_v9 = vpack.c.bf16 %v4261_v26, %v4257_v37  ;;  %v4259_v44 = vsel %vm4131_vm11, %v7760_v59, %v4195_v8  ;;  %v3968_v54 = vpop.f32.mrb[157].mxu0  ;;  %v4081_v16 = vpop.f32.mrb[157].mxu1  ;;  %v7904_v37 = vld [vmem:[%s8003_s17] ss:$0 sm:$0xff] }
 0x765   :  { %v4263_v24 = vsel %vm4135_vm1, %v4066_v50, %v4199_v31  ;;  %v4256_v51 = vsel %vm4128_vm9, %v7751_v17, %v7763_v3  ;;  %vm4141_vm8 = vcmp.gt.f32.partialorder %v3963_v30, 0.0  ;;  %v4205_v48 = vmul.f32 0.2, %v3963_v30  ;;  %v3970_v3 = vpop.f32.mrb[158].mxu0  ;;  %v4083_v46 = vpop.f32.mrb[158].mxu1 }
 0x766   :  { %vm4143_vm10 = vcmp.gt.f32.partialorder %v4076_v5, 0.0  ;;  %v4207_v21 = vmul.f32 0.2, %v4076_v5  ;;  %4647 = vmatprep.mubr.bf16.mxu0 %v4301_v9  ;;  %v4303_v38 = vpack.c.bf16 %v4263_v24, %v4259_v44  ;;  %v4260_v47 = vsel %vm4132_vm13, %v7772_v4, %v4196_v29  ;;  %v3972_v8 = vpop.f32.mrb[159].mxu0  ;;  %v4085_v50 = vpop.f32.mrb[159].mxu1 }
 0x767   :  { %v4258_v59 = vsel %vm4130_vm12, %v7754_v42, %v7766_v61  ;;  %v4262_v17 = vsel %vm4134_vm14, %v7775_v39, %v4198_v58  ;;  %v4300_v43 = vpack.c.bf16 %v4260_v47, %v4256_v51  ;;  %v3967_v40 = vadd.f32 %v3966_v23, %v7647_v1 }
 0x768   :  { %v4302_v6 = vpack.c.bf16 %v4262_v17, %v4258_v59  ;;  %v4080_v7 = vadd.f32 %v4079_v15, %v7650_v0  ;;  %4744 = vmatprep.mubr.bf16.mxu1 %v4303_v38  ;;  %v3969_v4 = vadd.f32 %v3968_v54, %v7653_v49  ;;  %v4082_v25 = vadd.f32 %v4081_v16, %v7656_v56 }
 0x769   :  { %v3971_v42 = vadd.f32 %v3970_v3, %v7647_v1  ;;  %v4084_v61 = vadd.f32 %v4083_v46, %v7650_v0  ;;  %4648 = vmatmul.mubr.bf16.gmra.mrb[180].mxu0 %v4300_v43  ;;  %vm4144_vm9 = vcmp.gt.f32.partialorder %v3967_v40, 0.0  ;;  %v4208_v39 = vmul.f32 0.2, %v3967_v40 }
 0x76a   :  { %4745 = vmatmul.mubr.bf16.gmra.mrb[180].mxu1 %v4302_v6  ;;  %vm4146_vm11 = vcmp.gt.f32.partialorder %v4080_v7, 0.0  ;;  %v4210_v29 = vmul.f32 0.2, %v4080_v7  ;;  %vm4145_vm12 = vcmp.gt.f32.partialorder %v3969_v4, 0.0  ;;  %v4209_v58 = vmul.f32 0.2, %v3969_v4 }
 0x76b   :  { %vm4147_vm13 = vcmp.gt.f32.partialorder %v4082_v25, 0.0  ;;  %v4211_v32 = vmul.f32 0.2, %v4082_v25  ;;  %vm4148_vm14 = vcmp.gt.f32.partialorder %v3971_v42, 0.0  ;;  %v4212_v19 = vmul.f32 0.2, %v3971_v42 }
 0x76c   :  { %vm4150_vm15 = vcmp.gt.f32.partialorder %v4084_v61, 0.0  ;;  %v4214_v36 = vmul.f32 0.2, %v4084_v61  ;;  %v3973_v62 = vadd.f32 %v3972_v8, %v7653_v49  ;;  %v4086_v1 = vadd.f32 %v4085_v50, %v7656_v56 }
 0x76d   :  { %v4265_v0 = vsel %vm4137_vm2, %v7807_v60, %v4201_v53  ;;  %v4269_v11 = vsel %vm4141_vm8, %v3963_v30, %v4205_v48  ;;  %v4267_v22 = vsel %vm4139_vm4, %v7810_v14, %v4203_v10  ;;  %v4271_v55 = vsel %vm4143_vm10, %v4076_v5, %v4207_v21 }
 0x76e   :  { %v4305_v34 = vpack.c.bf16 %v4269_v11, %v4265_v0  ;;  %v4264_v49 = vsel %vm4136_vm3, %v7801_v45, %v7820_v52  ;;  %vm4149_vm1 = vcmp.gt.f32.partialorder %v3973_v62, 0.0  ;;  %v4213_v56 = vmul.f32 0.2, %v3973_v62 }
 0x76f   :  { %vm4151_vm0 = vcmp.gt.f32.partialorder %v4086_v1, 0.0  ;;  %v4215_v35 = vmul.f32 0.2, %v4086_v1  ;;  %v4307_v63 = vpack.c.bf16 %v4271_v55, %v4267_v22  ;;  %v4268_v57 = vsel %vm4140_vm6, %v7813_v13, %v7831_v28 }
 0x770   :  { %4655 = vmatprep.mubr.bf16.mxu0 %v4305_v34  ;;  %v4266_v33 = vsel %vm4138_vm5, %v7804_v27, %v7823_v18  ;;  %v4270_v45 = vsel %vm4142_vm7, %v7816_v41, %v7834_v2  ;;  %v4304_v60 = vpack.c.bf16 %v4268_v57, %v4264_v49  ;;  %v4273_v12 = vsel %vm4145_vm12, %v3969_v4, %v4209_v58 }
 0x771   :  { %v4306_v14 = vpack.c.bf16 %v4270_v45, %v4266_v33  ;;  %v4277_v20 = vsel %vm4149_vm1, %v3973_v62, %v4213_v56  ;;  %4752 = vmatprep.mubr.bf16.mxu1 %v4307_v63  ;;  %v4275_v52 = vsel %vm4147_vm13, %v4082_v25, %v4211_v32  ;;  %v4279_v13 = vsel %vm4151_vm0, %v4086_v1, %v4215_v35 }
 0x772   :  { %v4309_v31 = vpack.c.bf16 %v4277_v20, %v4273_v12  ;;  %4656 = vmatmul.mubr.bf16.gmra.mrb[184].mxu0 %v4304_v60  ;;  %v4311_v53 = vpack.c.bf16 %v4279_v13, %v4275_v52  ;;  %v4272_v27 = vsel %vm4144_vm9, %v3967_v40, %v4208_v39  ;;  %v4276_v18 = vsel %vm4148_vm14, %v3971_v42, %v4212_v19 }
 0x773   :  { %4753 = vmatmul.mubr.bf16.gmra.mrb[184].mxu1 %v4306_v14  ;;  %v4308_v10 = vpack.c.bf16 %v4276_v18, %v4272_v27  ;;  %v4274_v41 = vsel %vm4146_vm11, %v4080_v7, %v4210_v29  ;;  %v4278_v28 = vsel %vm4150_vm15, %v4084_v61, %v4214_v36  ;;  %vm8018_vm0 = vcmask 261120  }
 0x774   :  { %4663 = vmatprep.mubr.bf16.mxu0 %v4309_v31  ;;  %4760 = vmatprep.mubr.bf16.mxu1 %v4311_v53  ;;  %v4310_v2 = vpack.c.bf16 %v4278_v28, %v4274_v41  ;;  %vm8019_vm2 = vmmov %vm8018_vm0 }
 0x775   :  { %vm8020_vm3 = vmmov %vm8018_vm0 }
 0x776   :  { %vm8021_vm4 = vmmov %vm8018_vm0 }
 0x777   :  { %vm8022_vm5 = vmmov %vm8018_vm0 }
 0x778   :  { %vm8023_vm6 = vmmov %vm8018_vm0 }
 0x779   :  { %vm8024_vm7 = vmmov %vm8018_vm0 }
 0x77a   :  { %4664 = vmatmul.mubr.bf16.gmra.mrb[188].mxu0 %v4308_v10  ;;  %vm8025_vm8 = vmmov %vm8018_vm0 }
 0x77b   :  { %4761 = vmatmul.mubr.bf16.gmra.mrb[188].mxu1 %v4310_v2  ;;  %vm8026_vm10 = vmmov %vm8018_vm0 }
 0x77c   :  { %vm8027_vm9 = vmmov %vm8018_vm0 }
 0x77d   :  { %vm8028_vm11 = vmmov %vm8018_vm0 }
 0x77e   :  { %vm8029_vm12 = vmmov %vm8018_vm0 }
 0x77f   :  { %vm8030_vm13 = vmmov %vm8018_vm0 }
 0x780   :  { %vm8031_vm14 = vmmov %vm8018_vm0 }
 0x781   :  { %vm8032_vm15 = vmmov %vm8018_vm0 }
 0x782   :  { %vm8033_vm1 = vmmov %vm8018_vm0 }
 0x80d   :  { %v5345_v30 = vpop.f32.mrb[160].mxu0  ;;  %v5409_v5 = vpop.f32.mrb[160].mxu1 }
 0x80e   :  { %v5346_v26 = vpop.f32.mrb[161].mxu0  ;;  %v5410_v23 = vpop.f32.mrb[161].mxu1 }
 0x80f   :  { %v5347_v15 = vadd.f32 %v5346_v26, %v5345_v30  ;;  %v5411_v9 = vadd.f32 %v5410_v23, %v5409_v5  ;;  %v5348_v44 = vpop.f32.mrb[162].mxu0  ;;  %v5412_v24 = vpop.f32.mrb[162].mxu1 }
 0x810   :  { %v5349_v51 = vpop.f32.mrb[163].mxu0  ;;  %v5413_v54 = vpop.f32.mrb[163].mxu1 }
 0x811   :  { %v4610_v16 = vadd.f32 %v5347_v15, %v7904_v37  ;;  %v5350_v48 = vadd.f32 %v5349_v51, %v5348_v44  ;;  %v5414_v21 = vadd.f32 %v5413_v54, %v5412_v24 }
 0x813   :  { %v4707_v38 = vadd.f32 %v5411_v9, %v4610_v16  ;;  %v4613_v47 = vadd.f32 %v5350_v48, %v7904_v37 }
 0x815   :  { %v5224_v59 = vmul.f32 -1.442695, %v4707_v38  ;;  %v4710_v17 = vadd.f32 %v5414_v21, %v4613_v47  ;;  %v5351_v3 = vpop.f32.mrb[164].mxu0  ;;  %v5415_v46 = vpop.f32.mrb[164].mxu1 }
 0x816   :  { %v5352_v43 = vpop.f32.mrb[165].mxu0  ;;  %v5416_v6 = vpop.f32.mrb[165].mxu1 }
 0x817   :  { %6079 = vpow2.f32 %v5224_v59  ;;  %v5225_v40 = vmul.f32 -1.442695, %v4710_v17  ;;  %v5353_v7 = vadd.f32 %v5352_v43, %v5351_v3  ;;  %v5417_v8 = vadd.f32 %v5416_v6, %v5415_v46  ;;  %v5354_v50 = vpop.f32.mrb[166].mxu0  ;;  %v5418_v4 = vpop.f32.mrb[166].mxu1 }
 0x818   :  { %v5355_v25 = vpop.f32.mrb[167].mxu0  ;;  %v5419_v42 = vpop.f32.mrb[167].mxu1 }
 0x819   :  { %6081 = vpow2.f32 %v5225_v40  ;;  %v4618_v61 = vadd.f32 %v5353_v7, %v7904_v37  ;;  %v5356_v39 = vadd.f32 %v5355_v25, %v5354_v50  ;;  %v5420_v29 = vadd.f32 %v5419_v42, %v5418_v4 }
 0x81b   :  { %v4715_v58 = vadd.f32 %v5417_v8, %v4618_v61  ;;  %v4621_v32 = vadd.f32 %v5356_v39, %v7904_v37 }
 0x81d   :  { %v5226_v19 = vmul.f32 -1.442695, %v4715_v58  ;;  %v4718_v36 = vadd.f32 %v5420_v29, %v4621_v32  ;;  %v5357_v62 = vpop.f32.mrb[168].mxu0  ;;  %v5421_v1 = vpop.f32.mrb[168].mxu1 }
 0x81e   :  { %v5358_v11 = vpop.f32.mrb[169].mxu0  ;;  %v5422_v34 = vpop.f32.mrb[169].mxu1 }
 0x81f   :  { %6083 = vpow2.f32 %v5226_v19  ;;  %v5227_v0 = vmul.f32 -1.442695, %v4718_v36  ;;  %v5359_v22 = vadd.f32 %v5358_v11, %v5357_v62  ;;  %v5423_v55 = vadd.f32 %v5422_v34, %v5421_v1  ;;  %v5360_v49 = vpop.f32.mrb[170].mxu0  ;;  %v5424_v56 = vpop.f32.mrb[170].mxu1 }
 0x820   :  { %v5361_v63 = vpop.f32.mrb[171].mxu0  ;;  %v5425_v57 = vpop.f32.mrb[171].mxu1 }
 0x821   :  { %v6080_v35 = vpop.eup %6079  ;;  %6085 = vpow2.f32 %v5227_v0  ;;  %v4626_v45 = vadd.f32 %v5359_v22, %v7904_v37  ;;  %v5362_v60 = vadd.f32 %v5361_v63, %v5360_v49  ;;  %v5426_v14 = vadd.f32 %v5425_v57, %v5424_v56 }
 0x822   :  { %v4817_v33 = vadd.f32 1.0, %v6080_v35 }
 0x823   :  { %v6082_v12 = vpop.eup %6081  ;;  %v4723_v31 = vadd.f32 %v5423_v55, %v4626_v45  ;;  %v4629_v52 = vadd.f32 %v5362_v60, %v7904_v37 }
 0x824   :  { %6087 = vrcp.f32 %v4817_v33  ;;  %v4818_v20 = vadd.f32 1.0, %v6082_v12 }
 0x825   :  { %v5228_v13 = vmul.f32 -1.442695, %v4723_v31  ;;  %v4726_v53 = vadd.f32 %v5426_v14, %v4629_v52 }
 0x826   :  { %6089 = vrcp.f32 %v4818_v20  ;;  %v5363_v27 = vpop.f32.mrb[172].mxu0 }
 0x827   :  { %6091 = vpow2.f32 %v5228_v13  ;;  %v5229_v18 = vmul.f32 -1.442695, %v4726_v53  ;;  %v5364_v10 = vpop.f32.mrb[173].mxu0 }
 0x828   :  { %v5365_v28 = vadd.f32 %v5364_v10, %v5363_v27  ;;  %v5366_v2 = vpop.f32.mrb[174].mxu0 }
 0x829   :  { %v6084_v41 = vpop.eup %6083  ;;  %6093 = vpow2.f32 %v5229_v18  ;;  %v5367_v5 = vpop.f32.mrb[175].mxu0 }
 0x82a   :  { %v4819_v30 = vadd.f32 1.0, %v6084_v41  ;;  %v5427_v23 = vpop.f32.mrb[172].mxu1  ;;  %v4634_v15 = vadd.f32 %v5365_v28, %v7904_v37  ;;  %v5368_v9 = vadd.f32 %v5367_v5, %v5366_v2 }
 0x82b   :  { %v6086_v26 = vpop.eup %6085  ;;  %v5428_v24 = vpop.f32.mrb[173].mxu1 }
 0x82c   :  { %6095 = vrcp.f32 %v4819_v30  ;;  %v4820_v44 = vadd.f32 1.0, %v6086_v26  ;;  %v5429_v51 = vadd.f32 %v5428_v24, %v5427_v23  ;;  %v5430_v54 = vpop.f32.mrb[174].mxu1  ;;  %v4637_v16 = vadd.f32 %v5368_v9, %v7904_v37 }
 0x82d   :  { %v5431_v21 = vpop.f32.mrb[175].mxu1 }
 0x82e   :  { %v6088_v48 = vpop.eup %6087  ;;  %6097 = vrcp.f32 %v4820_v44  ;;  %v4731_v38 = vadd.f32 %v5429_v51, %v4634_v15  ;;  %v5432_v47 = vadd.f32 %v5431_v21, %v5430_v54 }
 0x82f   :  { %4865 = vst.msk [vmem:[%s8004_s18] sm:$0xff] %vm8018_vm0, %v6088_v48 }
 0x830   :  { %v6090_v59 = vpop.eup %6089  ;;  %v5230_v17 = vmul.f32 -1.442695, %v4731_v38  ;;  %v4734_v3 = vadd.f32 %v5432_v47, %v4637_v16 }
 0x831   :  { %4866 = vst.msk [vmem:[%s8004_s18 + $0x8] sm:$0xff] %vm8019_vm2, %v6090_v59  ;;  %v6092_v46 = vpop.eup %6091 }
 0x832   :  { %v4821_v43 = vadd.f32 1.0, %v6092_v46  ;;  %6099 = vpow2.f32 %v5230_v17  ;;  %v5231_v6 = vmul.f32 -1.442695, %v4734_v3  ;;  %v5369_v40 = vpop.f32.mrb[176].mxu0 }
 0x833   :  { %v5433_v7 = vpop.f32.mrb[176].mxu1  ;;  %v6094_v8 = vpop.eup %6093 }
 0x834   :  { %v5370_v50 = vpop.f32.mrb[177].mxu0  ;;  %v5434_v4 = vpop.f32.mrb[177].mxu1  ;;  %6101 = vrcp.f32 %v4821_v43  ;;  %v4822_v25 = vadd.f32 1.0, %v6094_v8 }
 0x835   :  { %v5371_v42 = vadd.f32 %v5370_v50, %v5369_v40  ;;  %v5435_v61 = vadd.f32 %v5434_v4, %v5433_v7  ;;  %v5372_v39 = vpop.f32.mrb[178].mxu0  ;;  %v5436_v29 = vpop.f32.mrb[178].mxu1  ;;  %6103 = vpow2.f32 %v5231_v6 }
 0x836   :  { %v6096_v58 = vpop.eup %6095  ;;  %v5373_v32 = vpop.f32.mrb[179].mxu0  ;;  %6105 = vrcp.f32 %v4822_v25 }
 0x837   :  { %v5437_v19 = vpop.f32.mrb[179].mxu1  ;;  %4867 = vst.msk [vmem:[%s8004_s18 + $0x10] sm:$0xff] %vm8020_vm3, %v6096_v58  ;;  %v4642_v36 = vadd.f32 %v5371_v42, %v7904_v37  ;;  %v5374_v62 = vadd.f32 %v5373_v32, %v5372_v39 }
 0x838   :  { %v5438_v1 = vadd.f32 %v5437_v19, %v5436_v29  ;;  %v6098_v0 = vpop.eup %6097 }
 0x839   :  { %4868 = vst.msk [vmem:[%s8004_s18 + $0x18] sm:$0xff] %vm8021_vm4, %v6098_v0  ;;  %v4739_v11 = vadd.f32 %v5435_v61, %v4642_v36  ;;  %v4645_v34 = vadd.f32 %v5374_v62, %v7904_v37 }
 0x83b   :  { %v5232_v22 = vmul.f32 -1.442695, %v4739_v11  ;;  %v4742_v55 = vadd.f32 %v5438_v1, %v4645_v34 }
 0x83c   :  { %v5375_v49 = vpop.f32.mrb[180].mxu0  ;;  %v6100_v35 = vpop.eup %6099 }
 0x83d   :  { %v5439_v56 = vpop.f32.mrb[180].mxu1  ;;  %6107 = vpow2.f32 %v5232_v22  ;;  %v5233_v63 = vmul.f32 -1.442695, %v4742_v55  ;;  %v5376_v57 = vpop.f32.mrb[181].mxu0  ;;  %v4823_v45 = vadd.f32 1.0, %v6100_v35 }
 0x83e   :  { %v5440_v33 = vpop.f32.mrb[181].mxu1  ;;  %v5377_v60 = vadd.f32 %v5376_v57, %v5375_v49  ;;  %v5378_v12 = vpop.f32.mrb[182].mxu0 }
 0x83f   :  { %v5441_v14 = vadd.f32 %v5440_v33, %v5439_v56  ;;  %v5442_v20 = vpop.f32.mrb[182].mxu1  ;;  %v6102_v31 = vpop.eup %6101  ;;  %6109 = vpow2.f32 %v5233_v63 }
 0x840   :  { %v5379_v52 = vpop.f32.mrb[183].mxu0  ;;  %v5443_v13 = vpop.f32.mrb[183].mxu1  ;;  %4869 = vst.msk [vmem:[%s8004_s18 + $0x20] sm:$0xff] %vm8022_vm5, %v6102_v31  ;;  %6111 = vrcp.f32 %v4823_v45  ;;  %v4650_v27 = vadd.f32 %v5377_v60, %v7904_v37 }
 0x841   :  { %v6104_v53 = vpop.eup %6103  ;;  %v5380_v18 = vadd.f32 %v5379_v52, %v5378_v12  ;;  %v5444_v10 = vadd.f32 %v5443_v13, %v5442_v20 }
 0x842   :  { %v6106_v41 = vpop.eup %6105  ;;  %v4824_v28 = vadd.f32 1.0, %v6104_v53  ;;  %v4747_v2 = vadd.f32 %v5441_v14, %v4650_v27 }
 0x843   :  { %4870 = vst.msk [vmem:[%s8004_s18 + $0x28] sm:$0xff] %vm8023_vm6, %v6106_v41  ;;  %v4653_v30 = vadd.f32 %v5380_v18, %v7904_v37 }
 0x844   :  { %6113 = vrcp.f32 %v4824_v28  ;;  %v5234_v5 = vmul.f32 -1.442695, %v4747_v2 }
 0x845   :  { %v4750_v26 = vadd.f32 %v5444_v10, %v4653_v30  ;;  %v5381_v23 = vpop.f32.mrb[184].mxu0 }
 0x846   :  { %v5445_v15 = vpop.f32.mrb[184].mxu1  ;;  %6115 = vpow2.f32 %v5234_v5  ;;  %v5382_v44 = vpop.f32.mrb[185].mxu0 }
 0x847   :  { %v5235_v9 = vmul.f32 -1.442695, %v4750_v26  ;;  %v5446_v24 = vpop.f32.mrb[185].mxu1  ;;  %v6108_v51 = vpop.eup %6107  ;;  %v5383_v54 = vadd.f32 %v5382_v44, %v5381_v23 }
 0x848   :  { %v5447_v16 = vadd.f32 %v5446_v24, %v5445_v15  ;;  %v5384_v48 = vpop.f32.mrb[186].mxu0  ;;  %v5448_v21 = vpop.f32.mrb[186].mxu1  ;;  %v4825_v38 = vadd.f32 1.0, %v6108_v51 }
 0x849   :  { %6117 = vpow2.f32 %v5235_v9  ;;  %v5385_v47 = vpop.f32.mrb[187].mxu0  ;;  %v5449_v59 = vpop.f32.mrb[187].mxu1  ;;  %v4658_v3 = vadd.f32 %v5383_v54, %v7904_v37 }
 0x84a   :  { %v6110_v17 = vpop.eup %6109  ;;  %v5386_v46 = vadd.f32 %v5385_v47, %v5384_v48  ;;  %v5450_v43 = vadd.f32 %v5449_v59, %v5448_v21  ;;  %6119 = vrcp.f32 %v4825_v38 }
 0x84b   :  { %v6112_v6 = vpop.eup %6111  ;;  %v4826_v40 = vadd.f32 1.0, %v6110_v17  ;;  %v4755_v7 = vadd.f32 %v5447_v16, %v4658_v3 }
 0x84c   :  { %4871 = vst.msk [vmem:[%s8004_s18 + $0x30] sm:$0xff] %vm8024_vm7, %v6112_v6  ;;  %v4661_v8 = vadd.f32 %v5386_v46, %v7904_v37 }
 0x84d   :  { %6121 = vrcp.f32 %v4826_v40  ;;  %v5236_v4 = vmul.f32 -1.442695, %v4755_v7  ;;  %v5387_v42 = vpop.f32.mrb[188].mxu0 }
 0x84e   :  { %v6114_v50 = vpop.eup %6113  ;;  %v4758_v25 = vadd.f32 %v5450_v43, %v4661_v8  ;;  %v5451_v61 = vpop.f32.mrb[188].mxu1 }
 0x84f   :  { %4872 = vst.msk [vmem:[%s8004_s18 + $0x38] sm:$0xff] %vm8025_vm8, %v6114_v50  ;;  %v5388_v39 = vpop.f32.mrb[189].mxu0  ;;  %v5452_v29 = vpop.f32.mrb[189].mxu1  ;;  %6123 = vpow2.f32 %v5236_v4 }
 0x850   :  { %v5237_v58 = vmul.f32 -1.442695, %v4758_v25  ;;  %v5389_v32 = vadd.f32 %v5388_v39, %v5387_v42  ;;  %v5453_v19 = vadd.f32 %v5452_v29, %v5451_v61  ;;  %v5390_v36 = vpop.f32.mrb[190].mxu0  ;;  %v5454_v62 = vpop.f32.mrb[190].mxu1 }
 0x851   :  { %v6116_v1 = vpop.eup %6115  ;;  %v5391_v0 = vpop.f32.mrb[191].mxu0 }
 0x852   :  { %v5455_v11 = vpop.f32.mrb[191].mxu1  ;;  %v4827_v34 = vadd.f32 1.0, %v6116_v1  ;;  %6125 = vpow2.f32 %v5237_v58  ;;  %v4666_v22 = vadd.f32 %v5389_v32, %v7904_v37  ;;  %v5392_v55 = vadd.f32 %v5391_v0, %v5390_v36 }
 0x853   :  { %v6118_v49 = vpop.eup %6117  ;;  %v5456_v56 = vadd.f32 %v5455_v11, %v5454_v62 }
 0x854   :  { %6127 = vrcp.f32 %v4827_v34  ;;  %v4828_v35 = vadd.f32 1.0, %v6118_v49  ;;  %v4763_v63 = vadd.f32 %v5453_v19, %v4666_v22  ;;  %v4669_v57 = vadd.f32 %v5392_v55, %v7904_v37  ;;  %v6120_v33 = vpop.eup %6119 }
 0x855   :  { %4873 = vst.msk [vmem:[%s8004_s18 + $0x40] sm:$0xff] %vm8026_vm10, %v6120_v33 }
 0x856   :  { %6129 = vrcp.f32 %v4828_v35  ;;  %v5238_v45 = vmul.f32 -1.442695, %v4763_v63  ;;  %v4766_v60 = vadd.f32 %v5456_v56, %v4669_v57 }
 0x857   :  { %v6122_v14 = vpop.eup %6121 }
 0x858   :  { %4874 = vst.msk [vmem:[%s8004_s18 + $0x48] sm:$0xff] %vm8027_vm9, %v6122_v14  ;;  %6131 = vpow2.f32 %v5238_v45  ;;  %v5239_v12 = vmul.f32 -1.442695, %v4766_v60 }
 0x859   :  { %v6124_v20 = vpop.eup %6123 }
 0x85a   :  { %6133 = vpow2.f32 %v5239_v12  ;;  %v4829_v37 = vadd.f32 1.0, %v6124_v20 }
 0x85c   :  { %v6126_v31 = vpop.eup %6125  ;;  %6135 = vrcp.f32 %v4829_v37 }
 0x85d   :  { %v4830_v52 = vadd.f32 1.0, %v6126_v31 }
 0x85e   :  { %v6128_v13 = vpop.eup %6127 }
 0x85f   :  { %4875 = vst.msk [vmem:[%s8004_s18 + $0x50] sm:$0xff] %vm8028_vm11, %v6128_v13  ;;  %6137 = vrcp.f32 %v4830_v52 }
 0x860   :  { %v6130_v53 = vpop.eup %6129 }
 0x861   :  { %4876 = vst.msk [vmem:[%s8004_s18 + $0x58] sm:$0xff] %vm8029_vm12, %v6130_v53 }
 0x862   :  { %v6132_v27 = vpop.eup %6131 }
 0x863   :  { %v4831_v18 = vadd.f32 1.0, %v6132_v27 }
 0x864   :  { %v6134_v10 = vpop.eup %6133 }
 0x865   :  { %6139 = vrcp.f32 %v4831_v18  ;;  %v4832_v41 = vadd.f32 1.0, %v6134_v10 }
 0x866   :  { %v6136_v28 = vpop.eup %6135 }
 0x867   :  { %6141 = vrcp.f32 %v4832_v41  ;;  %4877 = vst.msk [vmem:[%s8004_s18 + $0x60] sm:$0xff] %vm8030_vm13, %v6136_v28 }
 0x869   :  { %v6138_v2 = vpop.eup %6137 }
 0x86a   :  { %4878 = vst.msk [vmem:[%s8004_s18 + $0x68] sm:$0xff] %vm8031_vm14, %v6138_v2 }
 0x86f   :  { %v6140_v30 = vpop.eup %6139 }
 0x870   :  { %4879 = vst.msk [vmem:[%s8004_s18 + $0x70] sm:$0xff] %vm8032_vm15, %v6140_v30 }
 0x871   :  { %v6142_v5 = vpop.eup %6141 }
 0x872   :  { %4880 = vst.msk [vmem:[%s8004_s18 + $0x78] sm:$0xff] %vm8033_vm1, %v6142_v5 }
 0x873   :  { %4906 = vsyncpa [#allocation3], 1 }
 0x874   :  { %4907 = vsyncpa [#allocation5], 1 }

</bundles_post_ra>
